<compile_context>
chip_gen: v7x
topology: tpu7x:2x2x1
jax: 0.10.0
libtpu: 0.0.40
codegen_flags: <defaults>
</compile_context>

<pallas_src>
import functools
import math

import jax
import jax.numpy as jnp
from jax import lax
from jax.experimental import pallas as pl
from jax.experimental.pallas import tpu as pltpu


# ---------------------------------------------------------------------------
# Fused kernel: all LSTM layers + FC head for one batch block.
# ---------------------------------------------------------------------------
def _make_fused_kernel(num_layers: int, hidden_pad: int, seq_len: int,
                       batch_tile: int):
    Hp, T, Bb = hidden_pad, seq_len, batch_tile

    def kernel(*refs):
        state_ref, action_ref = refs[0], refs[1]           # (T*Bb, S/A) time-major
        w0s_ref, w0a_ref, whh0_ref, b0_ref = refs[2:6]
        idx = 6
        deep = [refs[idx + 3 * l: idx + 3 * l + 3] for l in range(num_layers - 1)]
        idx += 3 * (num_layers - 1)
        fcw_ref, fcb_ref, out_ref = refs[idx], refs[idx + 1], refs[idx + 2]

        mm_dt = w0s_ref.dtype                               # matmul operand dtype (bf16)

        def recurrence(gx, whh_ref):
            """Batched LSTM recurrence for one layer.

            gx: (T*Bb, 4*Hp) f32, time-major, input projection + fused bias
                already hoisted out of the serial chain.
            Returns the (T*Bb, Hp) f32 hidden sequence, carried in vregs
            (no VMEM scratch round trips).
            """
            w_hh = whh_ref[...]                             # hoisted out of t-loop
            h = jnp.zeros((Bb, Hp), jnp.float32)
            c = jnp.zeros((Bb, Hp), jnp.float32)
            hs = []
            for t in range(T):                              # static unroll (T small)
                g = gx[t * Bb:(t + 1) * Bb, :] + jnp.dot(
                    h.astype(mm_dt), w_hh, preferred_element_type=jnp.float32)
                # Gates packed [i, f, o | g]; Hp is a multiple of 128, so every
                # slice below is on a full 128-lane vreg boundary.
                sig = jax.nn.sigmoid(g[:, :3 * Hp])
                i_g = sig[:, 0 * Hp:1 * Hp]
                f_g = sig[:, 1 * Hp:2 * Hp]
                o_g = sig[:, 2 * Hp:3 * Hp]
                g_g = jnp.tanh(g[:, 3 * Hp:])
                c = f_g * c + i_g * g_g
                h = o_g * jnp.tanh(c)
                hs.append(h)
            return jnp.concatenate(hs, axis=0)              # (T*Bb, Hp) time-major

        # Layer 0: hoisted projection over all (T*Bb) rows; split state/action
        # weights replace torch.cat([state, action], dim=2).
        gx = (jnp.dot(state_ref[...].astype(mm_dt), w0s_ref[...],
                      preferred_element_type=jnp.float32)
              + jnp.dot(action_ref[...].astype(mm_dt), w0a_ref[...],
                        preferred_element_type=jnp.float32)
              + b0_ref[...])                                # (T*Bb, 4Hp) f32
        seq = recurrence(gx, whh0_ref)

        # Deeper layers: input projection hoisted over the whole sequence.
        for (wih_ref, whh_ref, b_ref) in deep:
            gx = jnp.dot(seq.astype(mm_dt), wih_ref[...],
                         preferred_element_type=jnp.float32) + b_ref[...]
            seq = recurrence(gx, whh_ref)

        # FC head fused: one GEMM over the whole sequence and one store.
        out_ref[...] = (jnp.dot(seq.astype(mm_dt), fcw_ref[...],
                                preferred_element_type=jnp.float32)
                        + fcb_ref[...])                     # (T*Bb, O)

    return kernel


def _full_spec(arr):
    """Whole-array VMEM block, same block for every grid step (no re-DMA)."""
    zeros = (0,) * arr.ndim
    return pl.BlockSpec(arr.shape, lambda i: zeros)


# ---------------------------------------------------------------------------
# Forward pass (PyTorch-equivalent semantics), single fused pallas_call.
# ---------------------------------------------------------------------------
@functools.partial(jax.jit, static_argnames=("if_train", "batch_blocks"))
def critic_lstm_forward(state, action, params, if_train=True, batch_blocks=1):
    """state: (B, T, n_states), action: (B, T, n_actions)  (batch_first).

    Returns (B, T, O) when if_train else (B, O), matching Critic_LSTM.forward.
    batch_blocks=1 (default): single program, fully batched recurrence.
    batch_blocks=2: batch split over a "parallel" grid axis (both v7x TCs).
    """
    B, T, _ = state.shape
    lstm = params["lstm"]
    num_layers = len(lstm)
    Hp = lstm[0]["w_hh"].shape[0]
    O = params["fc_w"].shape[1]

    nb = batch_blocks
    if B % nb:
        raise ValueError(f"batch_blocks={nb} must divide batch={B}")
    Bb = B // nb

    # Wrapper-side layout plumbing (tiny XLA ops): (B, T, F) -> (nb, T*Bb, F),
    # time-major inside each block so every per-timestep gate slice in the
    # kernel is a contiguous sublane range and the hoisted projections are
    # plain 2-D GEMMs with no in-kernel relayout.
    def to_blocks(x):
        f = x.shape[-1]
        return x.reshape(nb, Bb, T, f).transpose(0, 2, 1, 3).reshape(nb, T * Bb, f)

    state_b, action_b = to_blocks(state), to_blocks(action)

    flat = [state_b, action_b,
            lstm[0]["w_ih_s"], lstm[0]["w_ih_a"], lstm[0]["w_hh"], lstm[0]["bias"]]
    for lp in lstm[1:]:
        flat += [lp["w_ih"], lp["w_hh"], lp["bias"]]
    flat += [params["fc_w"], params["fc_b"]]

    def data_spec(arr):
        # One batch block per grid step; leading (block) axis squeezed away.
        return pl.BlockSpec((None,) + arr.shape[1:], lambda i: (i, 0, 0))

    in_specs = [data_spec(state_b), data_spec(action_b)]
    in_specs += [_full_spec(w) for w in flat[2:]]

    out_b = pl.pallas_call(
        _make_fused_kernel(num_layers, Hp, T, Bb),
        grid=(nb,),
        out_shape=jax.ShapeDtypeStruct((nb, T * Bb, O), jnp.float32),
        in_specs=in_specs,
        out_specs=pl.BlockSpec((None, T * Bb, O), lambda i: (i, 0, 0)),
        compiler_params=pltpu.CompilerParams(
            dimension_semantics=("parallel",)),
    )(*flat)

    # Back to batch-first (B, T, O).
    out = out_b.reshape(nb, T, Bb, O).transpose(0, 2, 1, 3).reshape(B, T, O)
    return out if if_train else out[:, -1, :]


# ---------------------------------------------------------------------------
# Raw parameter init (mirrors nn.LSTM / nn.Linear shapes & init ranges).
# ---------------------------------------------------------------------------
def init_params(key, n_states, n_actions, hidden_size, num_layers, output_size,
                init_w=0.01):
    stdv = 1.0 / math.sqrt(hidden_size)
    layers = []
    in_size = n_states + n_actions
    for layer in range(num_layers):
        isz = in_size if layer == 0 else hidden_size
        key, k1, k2, k3, k4 = jax.random.split(key, 5)
        layers.append(dict(
            w_ih=jax.random.uniform(k1, (4 * hidden_size, isz), jnp.float32, -stdv, stdv),
            w_hh=jax.random.uniform(k2, (4 * hidden_size, hidden_size), jnp.float32, -stdv, stdv),
            b_ih=jax.random.uniform(k3, (4 * hidden_size,), jnp.float32, -stdv, stdv),
            b_hh=jax.random.uniform(k4, (4 * hidden_size,), jnp.float32, -stdv, stdv),
        ))
    key, k5, k6 = jax.random.split(key, 3)
    fc_w = jax.random.uniform(k5, (output_size, hidden_size), jnp.float32, -init_w, init_w)
    fc_b = jax.random.uniform(k6, (output_size,), jnp.float32, -init_w, init_w)
    return dict(lstm=layers, fc_w=fc_w, fc_b=fc_b)


# ---------------------------------------------------------------------------
# Kernel-layout packing: transpose, fuse biases, reorder gates to [i,f,o,g],
# zero-pad H to a multiple of 128 lanes, cast matmul operands to bf16.
# Padding is exact: padded gate columns / weight rows / bias entries are 0,
# so padded lanes of c and h stay identically 0 for zero-initialized states.
# ---------------------------------------------------------------------------
def pack_params(raw, n_states, mm_dtype=jnp.bfloat16, lane=128):
    H = raw["lstm"][0]["w_hh"].shape[1]
    Hp = ((H + lane - 1) // lane) * lane

    def pack_cols(m_t):  # (rows, 4H) torch order [i,f,g,o] -> (rows, 4Hp) [i,f,o,g]
        i_, f_, g_, o_ = (m_t[:, k * H:(k + 1) * H] for k in range(4))
        pad = [(0, 0), (0, Hp - H)]
        return jnp.concatenate([jnp.pad(b, pad) for b in (i_, f_, o_, g_)], axis=1)

    packed = {"lstm": []}
    for li, lp in enumerate(raw["lstm"]):
        w_ih_t = pack_cols(lp["w_ih"].T)                          # (I, 4Hp)
        w_hh_t = jnp.pad(pack_cols(lp["w_hh"].T), [(0, Hp - H), (0, 0)])  # (Hp, 4Hp)
        bias = pack_cols((lp["b_ih"] + lp["b_hh"])[None, :])      # (1, 4Hp) fused
        entry = {"w_hh": w_hh_t.astype(mm_dtype),
                 "bias": bias.astype(jnp.float32)}
        if li == 0:
            # x = cat([state, action], 2): rows [0:S) state, [S:S+A) action.
            entry["w_ih_s"] = w_ih_t[:n_states].astype(mm_dtype)  # (S, 4Hp)
            entry["w_ih_a"] = w_ih_t[n_states:].astype(mm_dtype)  # (A, 4Hp)
        else:
            entry["w_ih"] = jnp.pad(w_ih_t, [(0, Hp - H), (0, 0)]).astype(mm_dtype)
        packed["lstm"].append(entry)
    packed["fc_w"] = jnp.pad(raw["fc_w"].T, [(0, Hp - H), (0, 0)]).astype(mm_dtype)  # (Hp, O)
    packed["fc_b"] = raw["fc_b"][None, :].astype(jnp.float32)     # (1, O)
    return packed


# ---------------------------------------------------------------------------
# Pure-JAX f32 reference (same math as PyTorch nn.LSTM + nn.Linear).
# ---------------------------------------------------------------------------
def _reference_forward(state, action, raw, if_train=True):
    hp = lax.Precision.HIGHEST
    x = jnp.concatenate([state, action], axis=2)
    B, T, _ = x.shape
    seq = x
    for lp in raw["lstm"]:
        w_ih_t, w_hh_t = lp["w_ih"].T, lp["w_hh"].T
        bias = (lp["b_ih"] + lp["b_hh"])[None, :]
        H = lp["w_hh"].shape[1]
        h = jnp.zeros((B, H), jnp.float32)
        c = jnp.zeros((B, H), jnp.float32)
        outs = []
        for t in range(T):
            gates = (jnp.dot(seq[:, t, :], w_ih_t, precision=hp)
                     + jnp.dot(h, w_hh_t, precision=hp) + bias)
            i_g = jax.nn.sigmoid(gates[:, 0 * H:1 * H])
            f_g = jax.nn.sigmoid(gates[:, 1 * H:2 * H])
            g_g = jnp.tanh(gates[:, 2 * H:3 * H])
            o_g = jax.nn.sigmoid(gates[:, 3 * H:4 * H])
            c = f_g * c + i_g * g_g
            h = o_g * jnp.tanh(c)
            outs.append(h)
        seq = jnp.stack(outs, axis=1)
    y = jnp.dot(seq, raw["fc_w"].T, precision=hp) + raw["fc_b"]
    return y if if_train else y[:, -1, :]


# ---------------------------------------------------------------------------
if __name__ == "__main__":
    n_states, n_actions = 6, 2
    hidden_size, num_layers, output_size = 32, 2, 1
    B, T = 2, 8

    key = jax.random.PRNGKey(0)
    key, ks, ka, kp = jax.random.split(key, 4)
    state = jax.random.normal(ks, (B, T, n_states), jnp.float32)
    action = jax.random.normal(ka, (B, T, n_actions), jnp.float32)

    raw = init_params(kp, n_states, n_actions, hidden_size, num_layers,
                      output_size, init_w=0.01)
    params = pack_params(raw, n_states)            # bf16 matmul operands, Hp=128

    out_train = critic_lstm_forward(state, action, params, if_train=True)
    out_eval = critic_lstm_forward(state, action, params, if_train=False)
    jax.block_until_ready((out_train, out_eval))

    assert out_train.shape == (B, T, output_size)
    assert out_eval.shape == (B, output_size)

    # Correctness vs f32 PyTorch-semantics reference (bf16 matmul operands,
    # f32 accumulation & gate math => small bounded error).
    ref_train = _reference_forward(state, action, raw, if_train=True)
    ref_eval = _reference_forward(state, action, raw, if_train=False)
    tol = 5e-3
    err_t = float(jnp.max(jnp.abs(out_train - ref_train)))
    err_e = float(jnp.max(jnp.abs(out_eval - ref_eval)))
    assert err_t < tol and err_e < tol, (err_t, err_e)

    # v7x path: batch split over a "parallel" grid so both TensorCores get a
    # slice of the batch (harmless on single-TC chips, just runs sequentially).
    out_2blk = critic_lstm_forward(state, action, params, if_train=True,
                                   batch_blocks=2)
    jax.block_until_ready(out_2blk)
    err_b = float(jnp.max(jnp.abs(out_2blk - ref_train)))
    assert err_b < tol, err_b

    print("KERNEL_OK")
</pallas_src>

<mosaic_0001>
module attributes {stable_mosaic.version = 11 : i64} {
  func.func @kernel(%arg0: i32, %arg1: memref<1x16x6xf32, #tpu.memory_space<vmem>>, %arg2: memref<1x16x2xf32, #tpu.memory_space<vmem>>, %arg3: memref<6x512xbf16, #tpu.memory_space<vmem>>, %arg4: memref<2x512xbf16, #tpu.memory_space<vmem>>, %arg5: memref<128x512xbf16, #tpu.memory_space<vmem>>, %arg6: memref<1x512xf32, #tpu.memory_space<vmem>>, %arg7: memref<128x512xbf16, #tpu.memory_space<vmem>>, %arg8: memref<128x512xbf16, #tpu.memory_space<vmem>>, %arg9: memref<1x512xf32, #tpu.memory_space<vmem>>, %arg10: memref<128x1xbf16, #tpu.memory_space<vmem>>, %arg11: memref<1x1xf32, #tpu.memory_space<vmem>>, %arg12: memref<1x16x1xf32, #tpu.memory_space<vmem>>) attributes {dimension_semantics = [#tpu.dimension_semantics<parallel>], iteration_bounds = array<i64: 1>, scalar_prefetch = 0 : i64, scratch_operands = 0 : i64, tpu.core_type = #tpu.core_type<tc>, window_params = [{transform_indices = @transform_0, window_bounds = array<i64: 1, 16, 6>}, {transform_indices = @transform_1, window_bounds = array<i64: 1, 16, 2>}, {pipeline_mode = #tpu.pipeline_mode<synchronous>, transform_indices = @transform_2, window_bounds = array<i64: 6, 512>}, {pipeline_mode = #tpu.pipeline_mode<synchronous>, transform_indices = @transform_3, window_bounds = array<i64: 2, 512>}, {pipeline_mode = #tpu.pipeline_mode<synchronous>, transform_indices = @transform_4, window_bounds = array<i64: 128, 512>}, {pipeline_mode = #tpu.pipeline_mode<synchronous>, transform_indices = @transform_5, window_bounds = array<i64: 1, 512>}, {pipeline_mode = #tpu.pipeline_mode<synchronous>, transform_indices = @transform_6, window_bounds = array<i64: 128, 512>}, {pipeline_mode = #tpu.pipeline_mode<synchronous>, transform_indices = @transform_7, window_bounds = array<i64: 128, 512>}, {pipeline_mode = #tpu.pipeline_mode<synchronous>, transform_indices = @transform_8, window_bounds = array<i64: 1, 512>}, {pipeline_mode = #tpu.pipeline_mode<synchronous>, transform_indices = @transform_9, window_bounds = array<i64: 128, 1>}, {pipeline_mode = #tpu.pipeline_mode<synchronous>, transform_indices = @transform_10, window_bounds = array<i64: 1, 1>}, {transform_indices = @transform_11, window_bounds = array<i64: 1, 16, 1>}]} {
    %c0 = arith.constant 0 : index
    %c0_0 = arith.constant 0 : index
    %c0_1 = arith.constant 0 : index
    %0 = vector.load %arg1[%c0, %c0_0, %c0_1] : memref<1x16x6xf32, #tpu.memory_space<vmem>>, vector<1x16x6xf32>
    %1 = vector.shape_cast %0 : vector<1x16x6xf32> to vector<16x6xf32>
    %2 = arith.truncf %1 : vector<16x6xf32> to vector<16x6xbf16>
    %c0_2 = arith.constant 0 : index
    %c0_3 = arith.constant 0 : index
    %3 = vector.load %arg3[%c0_2, %c0_3] : memref<6x512xbf16, #tpu.memory_space<vmem>>, vector<6x512xbf16>
    %cst = arith.constant dense<0.000000e+00> : vector<16x512xf32>
    %4 = tpu.matmul %2, %3, %cst {dimension_numbers = #tpu.dot_dimension_numbers<[1], [0], [0], [1], [0, 0, 1, 1], [], []>} : vector<16x6xbf16>, vector<6x512xbf16>, vector<16x512xf32> -> vector<16x512xf32>
    %c0_4 = arith.constant 0 : index
    %c0_5 = arith.constant 0 : index
    %c0_6 = arith.constant 0 : index
    %5 = vector.load %arg2[%c0_4, %c0_5, %c0_6] : memref<1x16x2xf32, #tpu.memory_space<vmem>>, vector<1x16x2xf32>
    %6 = vector.shape_cast %5 : vector<1x16x2xf32> to vector<16x2xf32>
    %7 = arith.truncf %6 : vector<16x2xf32> to vector<16x2xbf16>
    %c0_7 = arith.constant 0 : index
    %c0_8 = arith.constant 0 : index
    %8 = vector.load %arg4[%c0_7, %c0_8] : memref<2x512xbf16, #tpu.memory_space<vmem>>, vector<2x512xbf16>
    %cst_9 = arith.constant dense<0.000000e+00> : vector<16x512xf32>
    %9 = tpu.matmul %7, %8, %cst_9 {dimension_numbers = #tpu.dot_dimension_numbers<[1], [0], [0], [1], [0, 0, 1, 1], [], []>} : vector<16x2xbf16>, vector<2x512xbf16>, vector<16x512xf32> -> vector<16x512xf32>
    %10 = arith.addf %4, %9 : vector<16x512xf32>
    %c0_10 = arith.constant 0 : index
    %c0_11 = arith.constant 0 : index
    %11 = vector.load %arg6[%c0_10, %c0_11] : memref<1x512xf32, #tpu.memory_space<vmem>>, vector<1x512xf32>
    %12 = vector.broadcast %11 : vector<1x512xf32> to vector<16x512xf32>
    %13 = arith.addf %10, %12 : vector<16x512xf32>
    %c0_12 = arith.constant 0 : index
    %c0_13 = arith.constant 0 : index
    %14 = vector.load %arg5[%c0_12, %c0_13] : memref<128x512xbf16, #tpu.memory_space<vmem>>, vector<128x512xbf16>
    %cst_14 = arith.constant 0.000000e+00 : f32
    %15 = vector.broadcast %cst_14 : f32 to vector<2x128xf32>
    %cst_15 = arith.constant 0.000000e+00 : f32
    %16 = vector.broadcast %cst_15 : f32 to vector<2x128xf32>
    %17 = vector.extract_strided_slice %13 {offsets = [0, 0], sizes = [2, 512], strides = [1, 1]} : vector<16x512xf32> to vector<2x512xf32>
    %18 = arith.truncf %15 : vector<2x128xf32> to vector<2x128xbf16>
    %cst_16 = arith.constant dense<0.000000e+00> : vector<2x512xf32>
    %19 = tpu.matmul %18, %14, %cst_16 {dimension_numbers = #tpu.dot_dimension_numbers<[1], [0], [0], [1], [0, 0, 1, 1], [], []>} : vector<2x128xbf16>, vector<128x512xbf16>, vector<2x512xf32> -> vector<2x512xf32>
    %20 = arith.addf %17, %19 : vector<2x512xf32>
    %21 = vector.extract_strided_slice %20 {offsets = [0, 0], sizes = [2, 384], strides = [1, 1]} : vector<2x512xf32> to vector<2x384xf32>
    %22 = arith.negf %21 : vector<2x384xf32>
    %23 = math.exp %22 : vector<2x384xf32>
    %cst_17 = arith.constant 1.000000e+00 : f32
    %24 = vector.broadcast %cst_17 : f32 to vector<2x384xf32>
    %25 = arith.addf %24, %23 : vector<2x384xf32>
    %26 = arith.divf %24, %25 : vector<2x384xf32>
    %27 = vector.extract_strided_slice %26 {offsets = [0, 0], sizes = [2, 128], strides = [1, 1]} : vector<2x384xf32> to vector<2x128xf32>
    %28 = vector.extract_strided_slice %26 {offsets = [0, 128], sizes = [2, 128], strides = [1, 1]} : vector<2x384xf32> to vector<2x128xf32>
    %29 = vector.extract_strided_slice %26 {offsets = [0, 256], sizes = [2, 128], strides = [1, 1]} : vector<2x384xf32> to vector<2x128xf32>
    %30 = vector.extract_strided_slice %20 {offsets = [0, 384], sizes = [2, 128], strides = [1, 1]} : vector<2x512xf32> to vector<2x128xf32>
    %31 = math.tanh %30 : vector<2x128xf32>
    %32 = arith.mulf %28, %16 : vector<2x128xf32>
    %33 = arith.mulf %27, %31 : vector<2x128xf32>
    %34 = arith.addf %32, %33 : vector<2x128xf32>
    %35 = math.tanh %34 : vector<2x128xf32>
    %36 = arith.mulf %29, %35 : vector<2x128xf32>
    %37 = vector.extract_strided_slice %13 {offsets = [2, 0], sizes = [2, 512], strides = [1, 1]} : vector<16x512xf32> to vector<2x512xf32>
    %38 = arith.truncf %36 : vector<2x128xf32> to vector<2x128xbf16>
    %cst_18 = arith.constant dense<0.000000e+00> : vector<2x512xf32>
    %39 = tpu.matmul %38, %14, %cst_18 {dimension_numbers = #tpu.dot_dimension_numbers<[1], [0], [0], [1], [0, 0, 1, 1], [], []>} : vector<2x128xbf16>, vector<128x512xbf16>, vector<2x512xf32> -> vector<2x512xf32>
    %40 = arith.addf %37, %39 : vector<2x512xf32>
    %41 = vector.extract_strided_slice %40 {offsets = [0, 0], sizes = [2, 384], strides = [1, 1]} : vector<2x512xf32> to vector<2x384xf32>
    %42 = arith.negf %41 : vector<2x384xf32>
    %43 = math.exp %42 : vector<2x384xf32>
    %cst_19 = arith.constant 1.000000e+00 : f32
    %44 = vector.broadcast %cst_19 : f32 to vector<2x384xf32>
    %45 = arith.addf %44, %43 : vector<2x384xf32>
    %46 = arith.divf %44, %45 : vector<2x384xf32>
    %47 = vector.extract_strided_slice %46 {offsets = [0, 0], sizes = [2, 128], strides = [1, 1]} : vector<2x384xf32> to vector<2x128xf32>
    %48 = vector.extract_strided_slice %46 {offsets = [0, 128], sizes = [2, 128], strides = [1, 1]} : vector<2x384xf32> to vector<2x128xf32>
    %49 = vector.extract_strided_slice %46 {offsets = [0, 256], sizes = [2, 128], strides = [1, 1]} : vector<2x384xf32> to vector<2x128xf32>
    %50 = vector.extract_strided_slice %40 {offsets = [0, 384], sizes = [2, 128], strides = [1, 1]} : vector<2x512xf32> to vector<2x128xf32>
    %51 = math.tanh %50 : vector<2x128xf32>
    %52 = arith.mulf %48, %34 : vector<2x128xf32>
    %53 = arith.mulf %47, %51 : vector<2x128xf32>
    %54 = arith.addf %52, %53 : vector<2x128xf32>
    %55 = math.tanh %54 : vector<2x128xf32>
    %56 = arith.mulf %49, %55 : vector<2x128xf32>
    %57 = vector.extract_strided_slice %13 {offsets = [4, 0], sizes = [2, 512], strides = [1, 1]} : vector<16x512xf32> to vector<2x512xf32>
    %58 = arith.truncf %56 : vector<2x128xf32> to vector<2x128xbf16>
    %cst_20 = arith.constant dense<0.000000e+00> : vector<2x512xf32>
    %59 = tpu.matmul %58, %14, %cst_20 {dimension_numbers = #tpu.dot_dimension_numbers<[1], [0], [0], [1], [0, 0, 1, 1], [], []>} : vector<2x128xbf16>, vector<128x512xbf16>, vector<2x512xf32> -> vector<2x512xf32>
    %60 = arith.addf %57, %59 : vector<2x512xf32>
    %61 = vector.extract_strided_slice %60 {offsets = [0, 0], sizes = [2, 384], strides = [1, 1]} : vector<2x512xf32> to vector<2x384xf32>
    %62 = arith.negf %61 : vector<2x384xf32>
    %63 = math.exp %62 : vector<2x384xf32>
    %cst_21 = arith.constant 1.000000e+00 : f32
    %64 = vector.broadcast %cst_21 : f32 to vector<2x384xf32>
    %65 = arith.addf %64, %63 : vector<2x384xf32>
    %66 = arith.divf %64, %65 : vector<2x384xf32>
    %67 = vector.extract_strided_slice %66 {offsets = [0, 0], sizes = [2, 128], strides = [1, 1]} : vector<2x384xf32> to vector<2x128xf32>
    %68 = vector.extract_strided_slice %66 {offsets = [0, 128], sizes = [2, 128], strides = [1, 1]} : vector<2x384xf32> to vector<2x128xf32>
    %69 = vector.extract_strided_slice %66 {offsets = [0, 256], sizes = [2, 128], strides = [1, 1]} : vector<2x384xf32> to vector<2x128xf32>
    %70 = vector.extract_strided_slice %60 {offsets = [0, 384], sizes = [2, 128], strides = [1, 1]} : vector<2x512xf32> to vector<2x128xf32>
    %71 = math.tanh %70 : vector<2x128xf32>
    %72 = arith.mulf %68, %54 : vector<2x128xf32>
    %73 = arith.mulf %67, %71 : vector<2x128xf32>
    %74 = arith.addf %72, %73 : vector<2x128xf32>
    %75 = math.tanh %74 : vector<2x128xf32>
    %76 = arith.mulf %69, %75 : vector<2x128xf32>
    %77 = vector.extract_strided_slice %13 {offsets = [6, 0], sizes = [2, 512], strides = [1, 1]} : vector<16x512xf32> to vector<2x512xf32>
    %78 = arith.truncf %76 : vector<2x128xf32> to vector<2x128xbf16>
    %cst_22 = arith.constant dense<0.000000e+00> : vector<2x512xf32>
    %79 = tpu.matmul %78, %14, %cst_22 {dimension_numbers = #tpu.dot_dimension_numbers<[1], [0], [0], [1], [0, 0, 1, 1], [], []>} : vector<2x128xbf16>, vector<128x512xbf16>, vector<2x512xf32> -> vector<2x512xf32>
    %80 = arith.addf %77, %79 : vector<2x512xf32>
    %81 = vector.extract_strided_slice %80 {offsets = [0, 0], sizes = [2, 384], strides = [1, 1]} : vector<2x512xf32> to vector<2x384xf32>
    %82 = arith.negf %81 : vector<2x384xf32>
    %83 = math.exp %82 : vector<2x384xf32>
    %cst_23 = arith.constant 1.000000e+00 : f32
    %84 = vector.broadcast %cst_23 : f32 to vector<2x384xf32>
    %85 = arith.addf %84, %83 : vector<2x384xf32>
    %86 = arith.divf %84, %85 : vector<2x384xf32>
    %87 = vector.extract_strided_slice %86 {offsets = [0, 0], sizes = [2, 128], strides = [1, 1]} : vector<2x384xf32> to vector<2x128xf32>
    %88 = vector.extract_strided_slice %86 {offsets = [0, 128], sizes = [2, 128], strides = [1, 1]} : vector<2x384xf32> to vector<2x128xf32>
    %89 = vector.extract_strided_slice %86 {offsets = [0, 256], sizes = [2, 128], strides = [1, 1]} : vector<2x384xf32> to vector<2x128xf32>
    %90 = vector.extract_strided_slice %80 {offsets = [0, 384], sizes = [2, 128], strides = [1, 1]} : vector<2x512xf32> to vector<2x128xf32>
    %91 = math.tanh %90 : vector<2x128xf32>
    %92 = arith.mulf %88, %74 : vector<2x128xf32>
    %93 = arith.mulf %87, %91 : vector<2x128xf32>
    %94 = arith.addf %92, %93 : vector<2x128xf32>
    %95 = math.tanh %94 : vector<2x128xf32>
    %96 = arith.mulf %89, %95 : vector<2x128xf32>
    %97 = vector.extract_strided_slice %13 {offsets = [8, 0], sizes = [2, 512], strides = [1, 1]} : vector<16x512xf32> to vector<2x512xf32>
    %98 = arith.truncf %96 : vector<2x128xf32> to vector<2x128xbf16>
    %cst_24 = arith.constant dense<0.000000e+00> : vector<2x512xf32>
    %99 = tpu.matmul %98, %14, %cst_24 {dimension_numbers = #tpu.dot_dimension_numbers<[1], [0], [0], [1], [0, 0, 1, 1], [], []>} : vector<2x128xbf16>, vector<128x512xbf16>, vector<2x512xf32> -> vector<2x512xf32>
    %100 = arith.addf %97, %99 : vector<2x512xf32>
    %101 = vector.extract_strided_slice %100 {offsets = [0, 0], sizes = [2, 384], strides = [1, 1]} : vector<2x512xf32> to vector<2x384xf32>
    %102 = arith.negf %101 : vector<2x384xf32>
    %103 = math.exp %102 : vector<2x384xf32>
    %cst_25 = arith.constant 1.000000e+00 : f32
    %104 = vector.broadcast %cst_25 : f32 to vector<2x384xf32>
    %105 = arith.addf %104, %103 : vector<2x384xf32>
    %106 = arith.divf %104, %105 : vector<2x384xf32>
    %107 = vector.extract_strided_slice %106 {offsets = [0, 0], sizes = [2, 128], strides = [1, 1]} : vector<2x384xf32> to vector<2x128xf32>
    %108 = vector.extract_strided_slice %106 {offsets = [0, 128], sizes = [2, 128], strides = [1, 1]} : vector<2x384xf32> to vector<2x128xf32>
    %109 = vector.extract_strided_slice %106 {offsets = [0, 256], sizes = [2, 128], strides = [1, 1]} : vector<2x384xf32> to vector<2x128xf32>
    %110 = vector.extract_strided_slice %100 {offsets = [0, 384], sizes = [2, 128], strides = [1, 1]} : vector<2x512xf32> to vector<2x128xf32>
    %111 = math.tanh %110 : vector<2x128xf32>
    %112 = arith.mulf %108, %94 : vector<2x128xf32>
    %113 = arith.mulf %107, %111 : vector<2x128xf32>
    %114 = arith.addf %112, %113 : vector<2x128xf32>
    %115 = math.tanh %114 : vector<2x128xf32>
    %116 = arith.mulf %109, %115 : vector<2x128xf32>
    %117 = vector.extract_strided_slice %13 {offsets = [10, 0], sizes = [2, 512], strides = [1, 1]} : vector<16x512xf32> to vector<2x512xf32>
    %118 = arith.truncf %116 : vector<2x128xf32> to vector<2x128xbf16>
    %cst_26 = arith.constant dense<0.000000e+00> : vector<2x512xf32>
    %119 = tpu.matmul %118, %14, %cst_26 {dimension_numbers = #tpu.dot_dimension_numbers<[1], [0], [0], [1], [0, 0, 1, 1], [], []>} : vector<2x128xbf16>, vector<128x512xbf16>, vector<2x512xf32> -> vector<2x512xf32>
    %120 = arith.addf %117, %119 : vector<2x512xf32>
    %121 = vector.extract_strided_slice %120 {offsets = [0, 0], sizes = [2, 384], strides = [1, 1]} : vector<2x512xf32> to vector<2x384xf32>
    %122 = arith.negf %121 : vector<2x384xf32>
    %123 = math.exp %122 : vector<2x384xf32>
    %cst_27 = arith.constant 1.000000e+00 : f32
    %124 = vector.broadcast %cst_27 : f32 to vector<2x384xf32>
    %125 = arith.addf %124, %123 : vector<2x384xf32>
    %126 = arith.divf %124, %125 : vector<2x384xf32>
    %127 = vector.extract_strided_slice %126 {offsets = [0, 0], sizes = [2, 128], strides = [1, 1]} : vector<2x384xf32> to vector<2x128xf32>
    %128 = vector.extract_strided_slice %126 {offsets = [0, 128], sizes = [2, 128], strides = [1, 1]} : vector<2x384xf32> to vector<2x128xf32>
    %129 = vector.extract_strided_slice %126 {offsets = [0, 256], sizes = [2, 128], strides = [1, 1]} : vector<2x384xf32> to vector<2x128xf32>
    %130 = vector.extract_strided_slice %120 {offsets = [0, 384], sizes = [2, 128], strides = [1, 1]} : vector<2x512xf32> to vector<2x128xf32>
    %131 = math.tanh %130 : vector<2x128xf32>
    %132 = arith.mulf %128, %114 : vector<2x128xf32>
    %133 = arith.mulf %127, %131 : vector<2x128xf32>
    %134 = arith.addf %132, %133 : vector<2x128xf32>
    %135 = math.tanh %134 : vector<2x128xf32>
    %136 = arith.mulf %129, %135 : vector<2x128xf32>
    %137 = vector.extract_strided_slice %13 {offsets = [12, 0], sizes = [2, 512], strides = [1, 1]} : vector<16x512xf32> to vector<2x512xf32>
    %138 = arith.truncf %136 : vector<2x128xf32> to vector<2x128xbf16>
    %cst_28 = arith.constant dense<0.000000e+00> : vector<2x512xf32>
    %139 = tpu.matmul %138, %14, %cst_28 {dimension_numbers = #tpu.dot_dimension_numbers<[1], [0], [0], [1], [0, 0, 1, 1], [], []>} : vector<2x128xbf16>, vector<128x512xbf16>, vector<2x512xf32> -> vector<2x512xf32>
    %140 = arith.addf %137, %139 : vector<2x512xf32>
    %141 = vector.extract_strided_slice %140 {offsets = [0, 0], sizes = [2, 384], strides = [1, 1]} : vector<2x512xf32> to vector<2x384xf32>
    %142 = arith.negf %141 : vector<2x384xf32>
    %143 = math.exp %142 : vector<2x384xf32>
    %cst_29 = arith.constant 1.000000e+00 : f32
    %144 = vector.broadcast %cst_29 : f32 to vector<2x384xf32>
    %145 = arith.addf %144, %143 : vector<2x384xf32>
    %146 = arith.divf %144, %145 : vector<2x384xf32>
    %147 = vector.extract_strided_slice %146 {offsets = [0, 0], sizes = [2, 128], strides = [1, 1]} : vector<2x384xf32> to vector<2x128xf32>
    %148 = vector.extract_strided_slice %146 {offsets = [0, 128], sizes = [2, 128], strides = [1, 1]} : vector<2x384xf32> to vector<2x128xf32>
    %149 = vector.extract_strided_slice %146 {offsets = [0, 256], sizes = [2, 128], strides = [1, 1]} : vector<2x384xf32> to vector<2x128xf32>
    %150 = vector.extract_strided_slice %140 {offsets = [0, 384], sizes = [2, 128], strides = [1, 1]} : vector<2x512xf32> to vector<2x128xf32>
    %151 = math.tanh %150 : vector<2x128xf32>
    %152 = arith.mulf %148, %134 : vector<2x128xf32>
    %153 = arith.mulf %147, %151 : vector<2x128xf32>
    %154 = arith.addf %152, %153 : vector<2x128xf32>
    %155 = math.tanh %154 : vector<2x128xf32>
    %156 = arith.mulf %149, %155 : vector<2x128xf32>
    %157 = vector.extract_strided_slice %13 {offsets = [14, 0], sizes = [2, 512], strides = [1, 1]} : vector<16x512xf32> to vector<2x512xf32>
    %158 = arith.truncf %156 : vector<2x128xf32> to vector<2x128xbf16>
    %cst_30 = arith.constant dense<0.000000e+00> : vector<2x512xf32>
    %159 = tpu.matmul %158, %14, %cst_30 {dimension_numbers = #tpu.dot_dimension_numbers<[1], [0], [0], [1], [0, 0, 1, 1], [], []>} : vector<2x128xbf16>, vector<128x512xbf16>, vector<2x512xf32> -> vector<2x512xf32>
    %160 = arith.addf %157, %159 : vector<2x512xf32>
    %161 = vector.extract_strided_slice %160 {offsets = [0, 0], sizes = [2, 384], strides = [1, 1]} : vector<2x512xf32> to vector<2x384xf32>
    %162 = arith.negf %161 : vector<2x384xf32>
    %163 = math.exp %162 : vector<2x384xf32>
    %cst_31 = arith.constant 1.000000e+00 : f32
    %164 = vector.broadcast %cst_31 : f32 to vector<2x384xf32>
    %165 = arith.addf %164, %163 : vector<2x384xf32>
    %166 = arith.divf %164, %165 : vector<2x384xf32>
    %167 = vector.extract_strided_slice %166 {offsets = [0, 0], sizes = [2, 128], strides = [1, 1]} : vector<2x384xf32> to vector<2x128xf32>
    %168 = vector.extract_strided_slice %166 {offsets = [0, 128], sizes = [2, 128], strides = [1, 1]} : vector<2x384xf32> to vector<2x128xf32>
    %169 = vector.extract_strided_slice %166 {offsets = [0, 256], sizes = [2, 128], strides = [1, 1]} : vector<2x384xf32> to vector<2x128xf32>
    %170 = vector.extract_strided_slice %160 {offsets = [0, 384], sizes = [2, 128], strides = [1, 1]} : vector<2x512xf32> to vector<2x128xf32>
    %171 = math.tanh %170 : vector<2x128xf32>
    %172 = arith.mulf %168, %154 : vector<2x128xf32>
    %173 = arith.mulf %167, %171 : vector<2x128xf32>
    %174 = arith.addf %172, %173 : vector<2x128xf32>
    %175 = math.tanh %174 : vector<2x128xf32>
    %176 = arith.mulf %169, %175 : vector<2x128xf32>
    %177 = tpu.concatenate %36, %56, %76, %96, %116, %136, %156, %176 in 0 : vector<2x128xf32>, vector<2x128xf32>, vector<2x128xf32>, vector<2x128xf32>, vector<2x128xf32>, vector<2x128xf32>, vector<2x128xf32>, vector<2x128xf32> -> vector<16x128xf32>
    %178 = arith.truncf %177 : vector<16x128xf32> to vector<16x128xbf16>
    %c0_32 = arith.constant 0 : index
    %c0_33 = arith.constant 0 : index
    %179 = vector.load %arg7[%c0_32, %c0_33] : memref<128x512xbf16, #tpu.memory_space<vmem>>, vector<128x512xbf16>
    %cst_34 = arith.constant dense<0.000000e+00> : vector<16x512xf32>
    %180 = tpu.matmul %178, %179, %cst_34 {dimension_numbers = #tpu.dot_dimension_numbers<[1], [0], [0], [1], [0, 0, 1, 1], [], []>} : vector<16x128xbf16>, vector<128x512xbf16>, vector<16x512xf32> -> vector<16x512xf32>
    %c0_35 = arith.constant 0 : index
    %c0_36 = arith.constant 0 : index
    %181 = vector.load %arg9[%c0_35, %c0_36] : memref<1x512xf32, #tpu.memory_space<vmem>>, vector<1x512xf32>
    %182 = vector.broadcast %181 : vector<1x512xf32> to vector<16x512xf32>
    %183 = arith.addf %180, %182 : vector<16x512xf32>
    %c0_37 = arith.constant 0 : index
    %c0_38 = arith.constant 0 : index
    %184 = vector.load %arg8[%c0_37, %c0_38] : memref<128x512xbf16, #tpu.memory_space<vmem>>, vector<128x512xbf16>
    %cst_39 = arith.constant 0.000000e+00 : f32
    %185 = vector.broadcast %cst_39 : f32 to vector<2x128xf32>
    %cst_40 = arith.constant 0.000000e+00 : f32
    %186 = vector.broadcast %cst_40 : f32 to vector<2x128xf32>
    %187 = vector.extract_strided_slice %183 {offsets = [0, 0], sizes = [2, 512], strides = [1, 1]} : vector<16x512xf32> to vector<2x512xf32>
    %188 = arith.truncf %185 : vector<2x128xf32> to vector<2x128xbf16>
    %cst_41 = arith.constant dense<0.000000e+00> : vector<2x512xf32>
    %189 = tpu.matmul %188, %184, %cst_41 {dimension_numbers = #tpu.dot_dimension_numbers<[1], [0], [0], [1], [0, 0, 1, 1], [], []>} : vector<2x128xbf16>, vector<128x512xbf16>, vector<2x512xf32> -> vector<2x512xf32>
    %190 = arith.addf %187, %189 : vector<2x512xf32>
    %191 = vector.extract_strided_slice %190 {offsets = [0, 0], sizes = [2, 384], strides = [1, 1]} : vector<2x512xf32> to vector<2x384xf32>
    %192 = arith.negf %191 : vector<2x384xf32>
    %193 = math.exp %192 : vector<2x384xf32>
    %cst_42 = arith.constant 1.000000e+00 : f32
    %194 = vector.broadcast %cst_42 : f32 to vector<2x384xf32>
    %195 = arith.addf %194, %193 : vector<2x384xf32>
    %196 = arith.divf %194, %195 : vector<2x384xf32>
    %197 = vector.extract_strided_slice %196 {offsets = [0, 0], sizes = [2, 128], strides = [1, 1]} : vector<2x384xf32> to vector<2x128xf32>
    %198 = vector.extract_strided_slice %196 {offsets = [0, 128], sizes = [2, 128], strides = [1, 1]} : vector<2x384xf32> to vector<2x128xf32>
    %199 = vector.extract_strided_slice %196 {offsets = [0, 256], sizes = [2, 128], strides = [1, 1]} : vector<2x384xf32> to vector<2x128xf32>
    %200 = vector.extract_strided_slice %190 {offsets = [0, 384], sizes = [2, 128], strides = [1, 1]} : vector<2x512xf32> to vector<2x128xf32>
    %201 = math.tanh %200 : vector<2x128xf32>
    %202 = arith.mulf %198, %186 : vector<2x128xf32>
    %203 = arith.mulf %197, %201 : vector<2x128xf32>
    %204 = arith.addf %202, %203 : vector<2x128xf32>
    %205 = math.tanh %204 : vector<2x128xf32>
    %206 = arith.mulf %199, %205 : vector<2x128xf32>
    %207 = vector.extract_strided_slice %183 {offsets = [2, 0], sizes = [2, 512], strides = [1, 1]} : vector<16x512xf32> to vector<2x512xf32>
    %208 = arith.truncf %206 : vector<2x128xf32> to vector<2x128xbf16>
    %cst_43 = arith.constant dense<0.000000e+00> : vector<2x512xf32>
    %209 = tpu.matmul %208, %184, %cst_43 {dimension_numbers = #tpu.dot_dimension_numbers<[1], [0], [0], [1], [0, 0, 1, 1], [], []>} : vector<2x128xbf16>, vector<128x512xbf16>, vector<2x512xf32> -> vector<2x512xf32>
    %210 = arith.addf %207, %209 : vector<2x512xf32>
    %211 = vector.extract_strided_slice %210 {offsets = [0, 0], sizes = [2, 384], strides = [1, 1]} : vector<2x512xf32> to vector<2x384xf32>
    %212 = arith.negf %211 : vector<2x384xf32>
    %213 = math.exp %212 : vector<2x384xf32>
    %cst_44 = arith.constant 1.000000e+00 : f32
    %214 = vector.broadcast %cst_44 : f32 to vector<2x384xf32>
    %215 = arith.addf %214, %213 : vector<2x384xf32>
    %216 = arith.divf %214, %215 : vector<2x384xf32>
    %217 = vector.extract_strided_slice %216 {offsets = [0, 0], sizes = [2, 128], strides = [1, 1]} : vector<2x384xf32> to vector<2x128xf32>
    %218 = vector.extract_strided_slice %216 {offsets = [0, 128], sizes = [2, 128], strides = [1, 1]} : vector<2x384xf32> to vector<2x128xf32>
    %219 = vector.extract_strided_slice %216 {offsets = [0, 256], sizes = [2, 128], strides = [1, 1]} : vector<2x384xf32> to vector<2x128xf32>
    %220 = vector.extract_strided_slice %210 {offsets = [0, 384], sizes = [2, 128], strides = [1, 1]} : vector<2x512xf32> to vector<2x128xf32>
    %221 = math.tanh %220 : vector<2x128xf32>
    %222 = arith.mulf %218, %204 : vector<2x128xf32>
    %223 = arith.mulf %217, %221 : vector<2x128xf32>
    %224 = arith.addf %222, %223 : vector<2x128xf32>
    %225 = math.tanh %224 : vector<2x128xf32>
    %226 = arith.mulf %219, %225 : vector<2x128xf32>
    %227 = vector.extract_strided_slice %183 {offsets = [4, 0], sizes = [2, 512], strides = [1, 1]} : vector<16x512xf32> to vector<2x512xf32>
    %228 = arith.truncf %226 : vector<2x128xf32> to vector<2x128xbf16>
    %cst_45 = arith.constant dense<0.000000e+00> : vector<2x512xf32>
    %229 = tpu.matmul %228, %184, %cst_45 {dimension_numbers = #tpu.dot_dimension_numbers<[1], [0], [0], [1], [0, 0, 1, 1], [], []>} : vector<2x128xbf16>, vector<128x512xbf16>, vector<2x512xf32> -> vector<2x512xf32>
    %230 = arith.addf %227, %229 : vector<2x512xf32>
    %231 = vector.extract_strided_slice %230 {offsets = [0, 0], sizes = [2, 384], strides = [1, 1]} : vector<2x512xf32> to vector<2x384xf32>
    %232 = arith.negf %231 : vector<2x384xf32>
    %233 = math.exp %232 : vector<2x384xf32>
    %cst_46 = arith.constant 1.000000e+00 : f32
    %234 = vector.broadcast %cst_46 : f32 to vector<2x384xf32>
    %235 = arith.addf %234, %233 : vector<2x384xf32>
    %236 = arith.divf %234, %235 : vector<2x384xf32>
    %237 = vector.extract_strided_slice %236 {offsets = [0, 0], sizes = [2, 128], strides = [1, 1]} : vector<2x384xf32> to vector<2x128xf32>
    %238 = vector.extract_strided_slice %236 {offsets = [0, 128], sizes = [2, 128], strides = [1, 1]} : vector<2x384xf32> to vector<2x128xf32>
    %239 = vector.extract_strided_slice %236 {offsets = [0, 256], sizes = [2, 128], strides = [1, 1]} : vector<2x384xf32> to vector<2x128xf32>
    %240 = vector.extract_strided_slice %230 {offsets = [0, 384], sizes = [2, 128], strides = [1, 1]} : vector<2x512xf32> to vector<2x128xf32>
    %241 = math.tanh %240 : vector<2x128xf32>
    %242 = arith.mulf %238, %224 : vector<2x128xf32>
    %243 = arith.mulf %237, %241 : vector<2x128xf32>
    %244 = arith.addf %242, %243 : vector<2x128xf32>
    %245 = math.tanh %244 : vector<2x128xf32>
    %246 = arith.mulf %239, %245 : vector<2x128xf32>
    %247 = vector.extract_strided_slice %183 {offsets = [6, 0], sizes = [2, 512], strides = [1, 1]} : vector<16x512xf32> to vector<2x512xf32>
    %248 = arith.truncf %246 : vector<2x128xf32> to vector<2x128xbf16>
    %cst_47 = arith.constant dense<0.000000e+00> : vector<2x512xf32>
    %249 = tpu.matmul %248, %184, %cst_47 {dimension_numbers = #tpu.dot_dimension_numbers<[1], [0], [0], [1], [0, 0, 1, 1], [], []>} : vector<2x128xbf16>, vector<128x512xbf16>, vector<2x512xf32> -> vector<2x512xf32>
    %250 = arith.addf %247, %249 : vector<2x512xf32>
    %251 = vector.extract_strided_slice %250 {offsets = [0, 0], sizes = [2, 384], strides = [1, 1]} : vector<2x512xf32> to vector<2x384xf32>
    %252 = arith.negf %251 : vector<2x384xf32>
    %253 = math.exp %252 : vector<2x384xf32>
    %cst_48 = arith.constant 1.000000e+00 : f32
    %254 = vector.broadcast %cst_48 : f32 to vector<2x384xf32>
    %255 = arith.addf %254, %253 : vector<2x384xf32>
    %256 = arith.divf %254, %255 : vector<2x384xf32>
    %257 = vector.extract_strided_slice %256 {offsets = [0, 0], sizes = [2, 128], strides = [1, 1]} : vector<2x384xf32> to vector<2x128xf32>
    %258 = vector.extract_strided_slice %256 {offsets = [0, 128], sizes = [2, 128], strides = [1, 1]} : vector<2x384xf32> to vector<2x128xf32>
    %259 = vector.extract_strided_slice %256 {offsets = [0, 256], sizes = [2, 128], strides = [1, 1]} : vector<2x384xf32> to vector<2x128xf32>
    %260 = vector.extract_strided_slice %250 {offsets = [0, 384], sizes = [2, 128], strides = [1, 1]} : vector<2x512xf32> to vector<2x128xf32>
    %261 = math.tanh %260 : vector<2x128xf32>
    %262 = arith.mulf %258, %244 : vector<2x128xf32>
    %263 = arith.mulf %257, %261 : vector<2x128xf32>
    %264 = arith.addf %262, %263 : vector<2x128xf32>
    %265 = math.tanh %264 : vector<2x128xf32>
    %266 = arith.mulf %259, %265 : vector<2x128xf32>
    %267 = vector.extract_strided_slice %183 {offsets = [8, 0], sizes = [2, 512], strides = [1, 1]} : vector<16x512xf32> to vector<2x512xf32>
    %268 = arith.truncf %266 : vector<2x128xf32> to vector<2x128xbf16>
    %cst_49 = arith.constant dense<0.000000e+00> : vector<2x512xf32>
    %269 = tpu.matmul %268, %184, %cst_49 {dimension_numbers = #tpu.dot_dimension_numbers<[1], [0], [0], [1], [0, 0, 1, 1], [], []>} : vector<2x128xbf16>, vector<128x512xbf16>, vector<2x512xf32> -> vector<2x512xf32>
    %270 = arith.addf %267, %269 : vector<2x512xf32>
    %271 = vector.extract_strided_slice %270 {offsets = [0, 0], sizes = [2, 384], strides = [1, 1]} : vector<2x512xf32> to vector<2x384xf32>
    %272 = arith.negf %271 : vector<2x384xf32>
    %273 = math.exp %272 : vector<2x384xf32>
    %cst_50 = arith.constant 1.000000e+00 : f32
    %274 = vector.broadcast %cst_50 : f32 to vector<2x384xf32>
    %275 = arith.addf %274, %273 : vector<2x384xf32>
    %276 = arith.divf %274, %275 : vector<2x384xf32>
    %277 = vector.extract_strided_slice %276 {offsets = [0, 0], sizes = [2, 128], strides = [1, 1]} : vector<2x384xf32> to vector<2x128xf32>
    %278 = vector.extract_strided_slice %276 {offsets = [0, 128], sizes = [2, 128], strides = [1, 1]} : vector<2x384xf32> to vector<2x128xf32>
    %279 = vector.extract_strided_slice %276 {offsets = [0, 256], sizes = [2, 128], strides = [1, 1]} : vector<2x384xf32> to vector<2x128xf32>
    %280 = vector.extract_strided_slice %270 {offsets = [0, 384], sizes = [2, 128], strides = [1, 1]} : vector<2x512xf32> to vector<2x128xf32>
    %281 = math.tanh %280 : vector<2x128xf32>
    %282 = arith.mulf %278, %264 : vector<2x128xf32>
    %283 = arith.mulf %277, %281 : vector<2x128xf32>
    %284 = arith.addf %282, %283 : vector<2x128xf32>
    %285 = math.tanh %284 : vector<2x128xf32>
    %286 = arith.mulf %279, %285 : vector<2x128xf32>
    %287 = vector.extract_strided_slice %183 {offsets = [10, 0], sizes = [2, 512], strides = [1, 1]} : vector<16x512xf32> to vector<2x512xf32>
    %288 = arith.truncf %286 : vector<2x128xf32> to vector<2x128xbf16>
    %cst_51 = arith.constant dense<0.000000e+00> : vector<2x512xf32>
    %289 = tpu.matmul %288, %184, %cst_51 {dimension_numbers = #tpu.dot_dimension_numbers<[1], [0], [0], [1], [0, 0, 1, 1], [], []>} : vector<2x128xbf16>, vector<128x512xbf16>, vector<2x512xf32> -> vector<2x512xf32>
    %290 = arith.addf %287, %289 : vector<2x512xf32>
    %291 = vector.extract_strided_slice %290 {offsets = [0, 0], sizes = [2, 384], strides = [1, 1]} : vector<2x512xf32> to vector<2x384xf32>
    %292 = arith.negf %291 : vector<2x384xf32>
    %293 = math.exp %292 : vector<2x384xf32>
    %cst_52 = arith.constant 1.000000e+00 : f32
    %294 = vector.broadcast %cst_52 : f32 to vector<2x384xf32>
    %295 = arith.addf %294, %293 : vector<2x384xf32>
    %296 = arith.divf %294, %295 : vector<2x384xf32>
    %297 = vector.extract_strided_slice %296 {offsets = [0, 0], sizes = [2, 128], strides = [1, 1]} : vector<2x384xf32> to vector<2x128xf32>
    %298 = vector.extract_strided_slice %296 {offsets = [0, 128], sizes = [2, 128], strides = [1, 1]} : vector<2x384xf32> to vector<2x128xf32>
    %299 = vector.extract_strided_slice %296 {offsets = [0, 256], sizes = [2, 128], strides = [1, 1]} : vector<2x384xf32> to vector<2x128xf32>
    %300 = vector.extract_strided_slice %290 {offsets = [0, 384], sizes = [2, 128], strides = [1, 1]} : vector<2x512xf32> to vector<2x128xf32>
    %301 = math.tanh %300 : vector<2x128xf32>
    %302 = arith.mulf %298, %284 : vector<2x128xf32>
    %303 = arith.mulf %297, %301 : vector<2x128xf32>
    %304 = arith.addf %302, %303 : vector<2x128xf32>
    %305 = math.tanh %304 : vector<2x128xf32>
    %306 = arith.mulf %299, %305 : vector<2x128xf32>
    %307 = vector.extract_strided_slice %183 {offsets = [12, 0], sizes = [2, 512], strides = [1, 1]} : vector<16x512xf32> to vector<2x512xf32>
    %308 = arith.truncf %306 : vector<2x128xf32> to vector<2x128xbf16>
    %cst_53 = arith.constant dense<0.000000e+00> : vector<2x512xf32>
    %309 = tpu.matmul %308, %184, %cst_53 {dimension_numbers = #tpu.dot_dimension_numbers<[1], [0], [0], [1], [0, 0, 1, 1], [], []>} : vector<2x128xbf16>, vector<128x512xbf16>, vector<2x512xf32> -> vector<2x512xf32>
    %310 = arith.addf %307, %309 : vector<2x512xf32>
    %311 = vector.extract_strided_slice %310 {offsets = [0, 0], sizes = [2, 384], strides = [1, 1]} : vector<2x512xf32> to vector<2x384xf32>
    %312 = arith.negf %311 : vector<2x384xf32>
    %313 = math.exp %312 : vector<2x384xf32>
    %cst_54 = arith.constant 1.000000e+00 : f32
    %314 = vector.broadcast %cst_54 : f32 to vector<2x384xf32>
    %315 = arith.addf %314, %313 : vector<2x384xf32>
    %316 = arith.divf %314, %315 : vector<2x384xf32>
    %317 = vector.extract_strided_slice %316 {offsets = [0, 0], sizes = [2, 128], strides = [1, 1]} : vector<2x384xf32> to vector<2x128xf32>
    %318 = vector.extract_strided_slice %316 {offsets = [0, 128], sizes = [2, 128], strides = [1, 1]} : vector<2x384xf32> to vector<2x128xf32>
    %319 = vector.extract_strided_slice %316 {offsets = [0, 256], sizes = [2, 128], strides = [1, 1]} : vector<2x384xf32> to vector<2x128xf32>
    %320 = vector.extract_strided_slice %310 {offsets = [0, 384], sizes = [2, 128], strides = [1, 1]} : vector<2x512xf32> to vector<2x128xf32>
    %321 = math.tanh %320 : vector<2x128xf32>
    %322 = arith.mulf %318, %304 : vector<2x128xf32>
    %323 = arith.mulf %317, %321 : vector<2x128xf32>
    %324 = arith.addf %322, %323 : vector<2x128xf32>
    %325 = math.tanh %324 : vector<2x128xf32>
    %326 = arith.mulf %319, %325 : vector<2x128xf32>
    %327 = vector.extract_strided_slice %183 {offsets = [14, 0], sizes = [2, 512], strides = [1, 1]} : vector<16x512xf32> to vector<2x512xf32>
    %328 = arith.truncf %326 : vector<2x128xf32> to vector<2x128xbf16>
    %cst_55 = arith.constant dense<0.000000e+00> : vector<2x512xf32>
    %329 = tpu.matmul %328, %184, %cst_55 {dimension_numbers = #tpu.dot_dimension_numbers<[1], [0], [0], [1], [0, 0, 1, 1], [], []>} : vector<2x128xbf16>, vector<128x512xbf16>, vector<2x512xf32> -> vector<2x512xf32>
    %330 = arith.addf %327, %329 : vector<2x512xf32>
    %331 = vector.extract_strided_slice %330 {offsets = [0, 0], sizes = [2, 384], strides = [1, 1]} : vector<2x512xf32> to vector<2x384xf32>
    %332 = arith.negf %331 : vector<2x384xf32>
    %333 = math.exp %332 : vector<2x384xf32>
    %cst_56 = arith.constant 1.000000e+00 : f32
    %334 = vector.broadcast %cst_56 : f32 to vector<2x384xf32>
    %335 = arith.addf %334, %333 : vector<2x384xf32>
    %336 = arith.divf %334, %335 : vector<2x384xf32>
    %337 = vector.extract_strided_slice %336 {offsets = [0, 0], sizes = [2, 128], strides = [1, 1]} : vector<2x384xf32> to vector<2x128xf32>
    %338 = vector.extract_strided_slice %336 {offsets = [0, 128], sizes = [2, 128], strides = [1, 1]} : vector<2x384xf32> to vector<2x128xf32>
    %339 = vector.extract_strided_slice %336 {offsets = [0, 256], sizes = [2, 128], strides = [1, 1]} : vector<2x384xf32> to vector<2x128xf32>
    %340 = vector.extract_strided_slice %330 {offsets = [0, 384], sizes = [2, 128], strides = [1, 1]} : vector<2x512xf32> to vector<2x128xf32>
    %341 = math.tanh %340 : vector<2x128xf32>
    %342 = arith.mulf %338, %324 : vector<2x128xf32>
    %343 = arith.mulf %337, %341 : vector<2x128xf32>
    %344 = arith.addf %342, %343 : vector<2x128xf32>
    %345 = math.tanh %344 : vector<2x128xf32>
    %346 = arith.mulf %339, %345 : vector<2x128xf32>
    %347 = tpu.concatenate %206, %226, %246, %266, %286, %306, %326, %346 in 0 : vector<2x128xf32>, vector<2x128xf32>, vector<2x128xf32>, vector<2x128xf32>, vector<2x128xf32>, vector<2x128xf32>, vector<2x128xf32>, vector<2x128xf32> -> vector<16x128xf32>
    %348 = arith.truncf %347 : vector<16x128xf32> to vector<16x128xbf16>
    %c0_57 = arith.constant 0 : index
    %c0_58 = arith.constant 0 : index
    %349 = vector.load %arg10[%c0_57, %c0_58] : memref<128x1xbf16, #tpu.memory_space<vmem>>, vector<128x1xbf16>
    %cst_59 = arith.constant dense<0.000000e+00> : vector<16x1xf32>
    %350 = tpu.matmul %348, %349, %cst_59 {dimension_numbers = #tpu.dot_dimension_numbers<[1], [0], [0], [1], [0, 0, 1, 1], [], []>} : vector<16x128xbf16>, vector<128x1xbf16>, vector<16x1xf32> -> vector<16x1xf32>
    %c0_60 = arith.constant 0 : index
    %c0_61 = arith.constant 0 : index
    %351 = vector.load %arg11[%c0_60, %c0_61] : memref<1x1xf32, #tpu.memory_space<vmem>>, vector<1x1xf32>
    %352 = vector.broadcast %351 : vector<1x1xf32> to vector<16x1xf32>
    %353 = arith.addf %350, %352 : vector<16x1xf32>
    %c0_62 = arith.constant 0 : index
    %c0_63 = arith.constant 0 : index
    %c0_64 = arith.constant 0 : index
    %354 = vector.load %arg12[%c0_62, %c0_63, %c0_64] : memref<1x16x1xf32, #tpu.memory_space<vmem>>, vector<1x16x1xf32>
    %355 = vector.shape_cast %354 : vector<1x16x1xf32> to vector<16x1xf32>
    %356 = vector.shape_cast %353 : vector<16x1xf32> to vector<1x16x1xf32>
    tpu.vector_store %arg12[%c0_62, %c0_63, %c0_64], %356 {strides = array<i32>} : memref<1x16x1xf32, #tpu.memory_space<vmem>>, vector<1x16x1xf32>,
    return
  }
  func.func @transform_0(%arg0: i32) -> (i32, i32, i32) {
    %c0_i32 = arith.constant 0 : i32
    %c0_i32_0 = arith.constant 0 : i32
    %c0_i32_1 = arith.constant 0 : i32
    return %arg0, %c0_i32, %c0_i32_0 : i32, i32, i32
  }
  func.func @transform_1(%arg0: i32) -> (i32, i32, i32) {
    %c0_i32 = arith.constant 0 : i32
    %c0_i32_0 = arith.constant 0 : i32
    %c0_i32_1 = arith.constant 0 : i32
    return %arg0, %c0_i32, %c0_i32_0 : i32, i32, i32
  }
  func.func @transform_2(%arg0: i32) -> (i32, i32) {
    %c0_i32 = arith.constant 0 : i32
    %c0_i32_0 = arith.constant 0 : i32
    %c0_i32_1 = arith.constant 0 : i32
    return %c0_i32, %c0_i32_0 : i32, i32
  }
  func.func @transform_3(%arg0: i32) -> (i32, i32) {
    %c0_i32 = arith.constant 0 : i32
    %c0_i32_0 = arith.constant 0 : i32
    %c0_i32_1 = arith.constant 0 : i32
    return %c0_i32, %c0_i32_0 : i32, i32
  }
  func.func @transform_4(%arg0: i32) -> (i32, i32) {
    %c0_i32 = arith.constant 0 : i32
    %c0_i32_0 = arith.constant 0 : i32
    %c0_i32_1 = arith.constant 0 : i32
    return %c0_i32, %c0_i32_0 : i32, i32
  }
  func.func @transform_5(%arg0: i32) -> (i32, i32) {
    %c0_i32 = arith.constant 0 : i32
    %c0_i32_0 = arith.constant 0 : i32
    %c0_i32_1 = arith.constant 0 : i32
    return %c0_i32, %c0_i32_0 : i32, i32
  }
  func.func @transform_6(%arg0: i32) -> (i32, i32) {
    %c0_i32 = arith.constant 0 : i32
    %c0_i32_0 = arith.constant 0 : i32
    %c0_i32_1 = arith.constant 0 : i32
    return %c0_i32, %c0_i32_0 : i32, i32
  }
  func.func @transform_7(%arg0: i32) -> (i32, i32) {
    %c0_i32 = arith.constant 0 : i32
    %c0_i32_0 = arith.constant 0 : i32
    %c0_i32_1 = arith.constant 0 : i32
    return %c0_i32, %c0_i32_0 : i32, i32
  }
  func.func @transform_8(%arg0: i32) -> (i32, i32) {
    %c0_i32 = arith.constant 0 : i32
    %c0_i32_0 = arith.constant 0 : i32
    %c0_i32_1 = arith.constant 0 : i32
    return %c0_i32, %c0_i32_0 : i32, i32
  }
  func.func @transform_9(%arg0: i32) -> (i32, i32) {
    %c0_i32 = arith.constant 0 : i32
    %c0_i32_0 = arith.constant 0 : i32
    %c0_i32_1 = arith.constant 0 : i32
    return %c0_i32, %c0_i32_0 : i32, i32
  }
  func.func @transform_10(%arg0: i32) -> (i32, i32) {
    %c0_i32 = arith.constant 0 : i32
    %c0_i32_0 = arith.constant 0 : i32
    %c0_i32_1 = arith.constant 0 : i32
    return %c0_i32, %c0_i32_0 : i32, i32
  }
  func.func @transform_11(%arg0: i32) -> (i32, i32, i32) {
    %c0_i32 = arith.constant 0 : i32
    %c0_i32_0 = arith.constant 0 : i32
    %c0_i32_1 = arith.constant 0 : i32
    return %arg0, %c0_i32, %c0_i32_0 : i32, i32, i32
  }
}

</mosaic_0001>

<bundles_post_ra>
// kernel: critic_lstm_forward.1
= control target key start
LH: loop header
LB: loop body
LE: loop exit
PB: predicated region body
PF: predicated region fallthrough
CT: control target
= control target key end

     0   :  { %s5048_s0 = inlined_call_operand.vmem [shape: f32[1,16,6], index: 0, kind: input, shape index: {}]   ;;  %s5049_s1 = inlined_call_operand.vmem [shape: f32[1,16,2], index: 1, kind: input, shape index: {}]   ;;  %s5050_s2 = inlined_call_operand.vmem [shape: bf16[6,512], index: 2, kind: input, shape index: {}]   ;;  %s5051_s3 = inlined_call_operand.vmem [shape: bf16[2,512], index: 3, kind: input, shape index: {}]   ;;  %s5052_s4 = inlined_call_operand.hbm [shape: bf16[128,512], index: 4, kind: input, shape index: {}]   ;;  %s5053_s5 = inlined_call_operand.vmem [shape: f32[1,512], index: 5, kind: input, shape index: {}]   ;;  %s5054_s6 = inlined_call_operand.hbm [shape: bf16[128,512], index: 6, kind: input, shape index: {}]   ;;  %s5055_s7 = inlined_call_operand.hbm [shape: bf16[128,512], index: 7, kind: input, shape index: {}]   ;;  %s5056_s8 = inlined_call_operand.vmem [shape: f32[1,512], index: 8, kind: input, shape index: {}]   ;;  %s5057_s9 = inlined_call_operand.vmem [shape: bf16[128,1], index: 9, kind: input, shape index: {}]   ;;  %s5058_s10 = inlined_call_operand.<no memory space> [shape: f32[1,1], index: 10, kind: input, shape index: {}]   ;;  %s5059_s11 = inlined_call_operand.vmem [shape: f32[1,16,1], index: 11, kind: output, shape index: {}]  }
   0x1   :  { %v16_v0 = vstv %s5058_s10 }
   0x2   :  { %17 = vst [vmem:[#allocation2] sm:$0x1] %v16_v0 }
   0x3   :  { %18 = vsyncpa [#allocation4], 0 }
   0x4   :  { %19 = vsyncpa [#allocation6], 0  ;;  %s3932_s19 = smov [#allocation5]   ;;  %s3933_s21 = smov [#allocation3]  }
   0x5   :  { %s47_s20 = sshll.u32 %s3932_s19, 4  ;;  %s33_s22 = sshll.u32 %s3933_s21, 4  ;;  %s48_s20 = int_to_ptr.vmem [resolvable:$true] %s47_s20  ;;  %s4004_s22 = int_to_ptr.vmem [resolvable:$true] %s33_s22 }
   0x6   :  { %s3862_s25 = scalar_lea.hbm %s5054_s6, 4096 }
   0x7   :  { %p3863_p0 = scmp.ne.s32.totalorder %s5054_s6, %s3862_s25  ;;  %p3866_p1 = scmp.lt.u32.totalorder %s3862_s25, %s5054_s6 }
   0x9   :  { %p3868_p2 = pnand %p3866_p1, %p3863_p0 }
   0xb   :  { %3871 = shalt.err (!%p3868_p2)
}
   0xc   :  { %s3872_s29 = scalar_lea.vmem %s48_s20, 4096  ;;  %p3877_p4 = scmp.lt.s32.totalorder %s48_s20, %s48_s20 }
   0xd   :  { %p3873_p3 = scmp.ne.s32.totalorder %s48_s20, %s3872_s29  ;;  %p3878_p5 = scmp.lt.s32.totalorder %s3872_s29, %s3872_s29 }
   0xf   :  { %p3879_p6 = por %p3878_p5, %p3877_p4 }
  0x11   :  { %p3880_p7 = pnand %p3879_p6, %p3873_p3 }
  0x13   :  { %3883 = shalt.err (!%p3880_p7)
}
  0x14   :  { %s3934_s30 = smov 256   ;;  %s3935_s12 = smov 16  }
  0x15   :  { %53 = dma.hbm_to_vmem [thread:$0]  %s5054_s6, 4096, %s48_s20, [#allocation6], %s3934_s30, %s3934_s30, %s3935_s12  }
  0x16   :  { %s3884_s17 = scalar_lea.hbm %s5052_s4, 4096 }
  0x17   :  { %p3885_p8 = scmp.ne.s32.totalorder %s5052_s4, %s3884_s17  ;;  %p3888_p9 = scmp.lt.u32.totalorder %s3884_s17, %s5052_s4 }
  0x19   :  { %p3890_p10 = pnand %p3888_p9, %p3885_p8 }
  0x1b   :  { %3893 = shalt.err (!%p3890_p10)
}
  0x1c   :  { %s3894_s24 = scalar_lea.vmem %s4004_s22, 4096  ;;  %p3899_p12 = scmp.lt.s32.totalorder %s4004_s22, %s4004_s22 }
  0x1d   :  { %p3895_p11 = scmp.ne.s32.totalorder %s4004_s22, %s3894_s24  ;;  %p3900_p13 = scmp.lt.s32.totalorder %s3894_s24, %s3894_s24 }
  0x1f   :  { %p3901_p0 = por %p3900_p13, %p3899_p12 }
  0x21   :  { %p3902_p1 = pnand %p3901_p0, %p3895_p11 }
  0x23   :  { %3905 = shalt.err (!%p3902_p1)
}
  0x24   :  { %39 = dma.hbm_to_vmem [thread:$0]  %s5052_s4, 4096, %s4004_s22, [#allocation4], %s3934_s30, %s3934_s30, %s3935_s12  }
  0x25   :  { %s3936_s25 = smov [#allocation7]   ;;  %s3906_s10 = scalar_lea.hbm %s5055_s7, 4096 }
  0x26   :  { %s59_s26 = sshll.u32 %s3936_s25, 4  ;;  %p3907_p2 = scmp.ne.s32.totalorder %s5055_s7, %s3906_s10  ;;  %s60_s26 = int_to_ptr.vmem [resolvable:$true] %s59_s26 }
  0x27   :  { %p3910_p3 = scmp.lt.u32.totalorder %s3906_s10, %s5055_s7 }
  0x29   :  { %p3912_p4 = pnand %p3910_p3, %p3907_p2 }
  0x2b   :  { %3915 = shalt.err (!%p3912_p4)
}
  0x2c   :  { %s3916_s16 = scalar_lea.vmem %s60_s26, 4096  ;;  %p3921_p6 = scmp.lt.s32.totalorder %s60_s26, %s60_s26 }
  0x2d   :  { %p3917_p5 = scmp.ne.s32.totalorder %s60_s26, %s3916_s16  ;;  %p3922_p7 = scmp.lt.s32.totalorder %s3916_s16, %s3916_s16 }
  0x2f   :  { %p3923_p8 = por %p3922_p7, %p3921_p6 }
  0x31   :  { %p3924_p9 = pnand %p3923_p8, %p3917_p5 }
  0x33   :  { %3927 = shalt.err (!%p3924_p9)
}
  0x34   :  { %65 = dma.hbm_to_vmem [thread:$0]  %s5055_s7, 4096, %s60_s26, [#allocation6], %s3934_s30, %s3934_s30, %s3935_s12  }
  0x35   :  { %3928 = dma.done.wait [#allocation4], 4096  }
  0x36   :  { %3929 = vsyncadd [#allocation4], 4294963200 }
  0x37   :  { %3930 = dma.done.wait [#allocation6], 8192  }
  0x38   :  { %3931 = vsyncadd [#allocation6], 4294959104  ;;  %v103_v1 = vlaneseq  ;;  %v3937_v2 = vmov 1966171168   ;;  %v3938_v4 = vmov 0   ;;  %vm120_vm0 = vcmask 1040384  }
  0x39   :  { %v101_v3 = vunpack.c.l.s4 %v3937_v2  ;;  %165 = vmatprep.mubr.bf16.mxu1 %v3938_v4  ;;  %586 = vmatprep.mubr.bf16.mxu0 %v3938_v4  ;;  %v4061_v8 = vld [vmem:[#allocation3 + $0x4] ss:$16 sps:$4 sm:$0xff]   ;;  %v4063_v9 = vld [vmem:[#allocation3] ss:$16 sps:$4 sm:$0xff]   ;;  %vm116_vm1 = vcmask 15360   ;;  %vm233_vm2 = vcmask 1042432  }
  0x3a   :  { %v4058_v5 = vshrl.u32 %v103_v1, 7  ;;  %v3174_v10 = vld.sshfl [vmem:[%s5051_s3] sm:$0x33 pattern:$0x75316420]  ;;  %554 = vmatprep.subr.bf16.mxu0 %v4061_v8  ;;  %v88_v16 = vld [vmem:[%s5049_s1 + $0x8] sm:$0xff] }
  0x3b   :  { %v102_v6 = vunpack.c.0.s8 %v101_v3  ;;  %v99_v11 = vcombine.high %v3174_v10, %v3174_v10  ;;  %v4069_v13 = vld [vmem:[#allocation3 + $0x24] ss:$16 sps:$4 sm:$0xff]   ;;  %555 = vmatpush1.bf16.msra.mxu0 %v4063_v9  ;;  %v4072_v14 = vld [vmem:[#allocation3 + $0x20] ss:$16 sps:$4 sm:$0xff]   ;;  %vm229_vm3 = vcmask 48128   ;;  %vm1549_vm4 = vcmask 1041408  }
  0x3c   :  { %v87_v15 = vld [vmem:[%s5049_s1] sm:$0xff]  ;;  %556 = vmatprep.subr.bf16.mxu0 %v4069_v13  ;;  %v86_v31 = vld [vmem:[%s5050_s2 + $0x8] sm:$0x77]  ;;  %v336_v62 = vsub.s32 0, %v4058_v5  ;;  %v5061_v0 = vsub.s32 1, %v4058_v5  ;;  %vm1551_vm5 = vcmask 1043456  }
  0x3d   :  { %v105_v7 = vsub.s32 %v102_v6, %v4058_v5  ;;  %v4082_v20 = vld [vmem:[#allocation3 + $0x44] ss:$16 sps:$4 sm:$0xff]   ;;  %v89_v22 = vpack.c.bf16 %v88_v16, %v87_v15  ;;  %v4086_v23 = vld [vmem:[#allocation3 + $0x40] ss:$16 sps:$4 sm:$0xff]   ;;  %v3182_v35 = vcombine.high %v86_v31, %v86_v31  ;;  %v3181_v39 = vcombine.low %v86_v31, %v86_v31  ;;  %v4135_v44 = vld [vmem:[#allocation3 + $0xc] ss:$16 sps:$4 sm:$0xff]  }
  0x3e   :  { %v85_v24 = vld [vmem:[%s5050_s2] sm:$0x77]  ;;  %v83_v38 = vld [vmem:[%s5048_s0 + $0x8] sm:$0xff]  ;;  %v344_v15 = vsub.s32 2, %v4058_v5  ;;  %v5060_v16 = vsub.s32 3, %v4058_v5  ;;  %vm1553_vm6 = vcmask 1045504  }
  0x3f   :  { %v106_v12 = vrot.slane %v3174_v10, %v105_v7  ;;  %v113_v17 = vrot.slane %v99_v11, %v105_v7  ;;  %557 = vmatpush1.bf16.msra.mxu0 %v4072_v14  ;;  %v4094_v26 = vld [vmem:[#allocation3 + $0x64] ss:$16 sps:$4 sm:$0xff]   ;;  %v3180_v27 = vcombine.high %v85_v24, %v85_v24  ;;  %v4098_v28 = vld [vmem:[#allocation3 + $0x60] ss:$16 sps:$4 sm:$0xff]   ;;  %v3179_v29 = vcombine.low %v85_v24, %v85_v24  ;;  %v4146_v47 = vld [vmem:[#allocation3 + $0x8] ss:$16 sps:$4 sm:$0xff]  }
  0x40   :  { %558 = vmatprep.subr.bf16.mxu0 %v4082_v20  ;;  %v4102_v30 = vld [vmem:[#allocation3 + $0x84] ss:$16 sps:$4 sm:$0xff]   ;;  %v4109_v32 = vld [vmem:[#allocation3 + $0x80] ss:$16 sps:$4 sm:$0xff]   ;;  %v241_v45 = vsel %vm233_vm2, %v3181_v39, 0  ;;  %vm3940_vm7 = vmmov 0  }
  0x41   :  { %v114_v18 = vcombine.high %v106_v12, %v106_v12  ;;  %v122_v19 = vsel %vm120_vm0, %v106_v12, 0  ;;  %v115_v21 = vcombine.high %v113_v17, %v113_v17  ;;  %3175 = vmatprep.subr.msk.bf16.mxu1 %vm120_vm0, %v113_v17  ;;  %v235_v33 = vsel %vm233_vm2, %v3179_v29, 0  ;;  %v4113_v34 = vld [vmem:[#allocation3 + $0xa4] ss:$16 sps:$4 sm:$0xff]   ;;  %v4116_v36 = vld [vmem:[#allocation3 + $0xa0] ss:$16 sps:$4 sm:$0xff]  }
  0x42   :  { %134 = vmatpush1.bf16.msra.mxu1 %v122_v19  ;;  %v82_v37 = vld [vmem:[%s5048_s0] sm:$0xff]  ;;  %v4152_v49 = vld [vmem:[#allocation3 + $0x28] ss:$16 sps:$4 sm:$0xff]   ;;  %vm3165_vm8 = vcmask 7168  }
  0x43   :  { %3177 = vmatprep.subr.msk.bf16.mxu1 %vm120_vm0, %v115_v21  ;;  %v128_v25 = vsel %vm120_vm0, %v114_v18, 0  ;;  %559 = vmatpush1.bf16.msra.mxu0 %v4086_v23  ;;  %v4127_v40 = vld [vmem:[#allocation3 + $0xc4] ss:$16 sps:$4 sm:$0xff]   ;;  %v84_v41 = vpack.c.bf16 %v83_v38, %v82_v37  ;;  %v4130_v42 = vld [vmem:[#allocation3 + $0xc0] ss:$16 sps:$4 sm:$0xff]  }
  0x44   :  { %560 = vmatprep.subr.bf16.mxu0 %v4094_v26  ;;  %v4133_v43 = vld [vmem:[#allocation3 + $0xe4] ss:$16 sps:$4 sm:$0xff]   ;;  %v4139_v46 = vld [vmem:[#allocation3 + $0xe0] ss:$16 sps:$4 sm:$0xff]   ;;  %v4148_v48 = vld [vmem:[#allocation3 + $0x2c] ss:$16 sps:$4 sm:$0xff]  }
  0x45   :  { %3176 = vmatmul.mubr.msk.bf16.vlgmr.msra.gmra.mrb[0].mxu1 %vm116_vm1, %v89_v22  ;;  %v4156_v50 = vld [vmem:[#allocation3 + $0x4c] ss:$16 sps:$4 sm:$0xff]   ;;  %v4162_v51 = vld [vmem:[#allocation3 + $0x48] ss:$16 sps:$4 sm:$0xff]  }
  0x46   :  { %177 = vmatpush1.bf16.msra.mxu1 %v128_v25  ;;  %208 = vmatprep.mubr.bf16.mxu1 %v3938_v4  ;;  %v4166_v52 = vld [vmem:[#allocation3 + $0x6c] ss:$16 sps:$4 sm:$0xff]   ;;  %v4171_v53 = vld [vmem:[#allocation3 + $0x68] ss:$16 sps:$4 sm:$0xff]  }
  0x47   :  { %3183 = vmatprep.subr.msk.bf16.mxu1 %vm233_vm2, %v3180_v27  ;;  %561 = vmatpush1.bf16.msra.mxu0 %v4098_v28  ;;  %v4174_v54 = vld [vmem:[#allocation3 + $0x8c] ss:$16 sps:$4 sm:$0xff]   ;;  %v4179_v55 = vld [vmem:[#allocation3 + $0x88] ss:$16 sps:$4 sm:$0xff]  }
  0x48   :  { %562 = vmatprep.subr.bf16.mxu0 %v4102_v30  ;;  %v4182_v56 = vld [vmem:[#allocation3 + $0xac] ss:$16 sps:$4 sm:$0xff]   ;;  %v4189_v57 = vld [vmem:[#allocation3 + $0xa8] ss:$16 sps:$4 sm:$0xff]  }
  0x49   :  { %v4192_v58 = vld [vmem:[#allocation3 + $0xcc] ss:$16 sps:$4 sm:$0xff]   ;;  %v4197_v59 = vld [vmem:[#allocation3 + $0xc8] ss:$16 sps:$4 sm:$0xff]  }
  0x4a   :  { %v4200_v60 = vld [vmem:[#allocation3 + $0xec] ss:$16 sps:$4 sm:$0xff]   ;;  %v4205_v61 = vld [vmem:[#allocation3 + $0xe8] ss:$16 sps:$4 sm:$0xff]  }
  0x4b   :  { %563 = vmatpush1.bf16.msra.mxu0 %v4109_v32  ;;  %v332_v63 = vld [vmem:[%s5053_s5] sm:$0xf] }
  0x4c   :  { %564 = vmatprep.subr.bf16.mxu0 %v4113_v34  ;;  %v337_v2 = vrot.slane %v332_v63, %v336_v62  ;;  %v341_v6 = vrot.slane %v332_v63, %v5061_v0  ;;  %v345_v19 = vrot.slane %v332_v63, %v344_v15  ;;  %v349_v24 = vrot.slane %v332_v63, %v5060_v16 }
  0x4d   :  { %3178 = vmatmul.mubr.msk.bf16.vlgmr.msra.gmra.mrb[4].mxu1 %vm116_vm1, %v89_v22 }
  0x4e   :  { %247 = vmatpush1.bf16.msra.mxu1 %v235_v33  ;;  %278 = vmatprep.mubr.bf16.mxu1 %v3938_v4 }
  0x4f   :  { %3185 = vmatprep.subr.msk.bf16.mxu1 %vm233_vm2, %v3182_v35  ;;  %565 = vmatpush1.bf16.msra.mxu0 %v4116_v36 }
  0x50   :  { %566 = vmatprep.subr.bf16.mxu0 %v4127_v40 }
  0x53   :  { %567 = vmatpush1.bf16.msra.mxu0 %v4130_v42 }
  0x54   :  { %568 = vmatprep.subr.bf16.mxu0 %v4133_v43 }
  0x55   :  { %3184 = vmatmul.mubr.msk.bf16.vlgmr.msra.gmra.mrb[0].mxu1 %vm229_vm3, %v84_v41 }
  0x56   :  { %290 = vmatpush1.bf16.msra.mxu1 %v241_v45  ;;  %321 = vmatprep.mubr.bf16.mxu1 %v3938_v4 }
  0x57   :  { %595 = vmatprep.subr.bf16.mxu1 %v4135_v44  ;;  %569 = vmatpush1.bf16.msra.mxu0 %v4139_v46 }
  0x58   :  { %665 = vmatprep.subr.bf16.mxu0 %v4061_v8 }
  0x5a   :  { %587 = vmatmul.mubr.bf16.vlgmr.msra.gmra.mrb[0].mxu0 %v3938_v4 }
  0x5b   :  { %666 = vmatpush1.bf16.msra.mxu0 %v4063_v9  ;;  %697 = vmatprep.mubr.bf16.mxu0 %v3938_v4 }
  0x5c   :  { %667 = vmatprep.subr.bf16.mxu0 %v4069_v13 }
  0x5d   :  { %3186 = vmatmul.mubr.msk.bf16.vlgmr.msra.gmra.mrb[4].mxu1 %vm229_vm3, %v84_v41 }
  0x5e   :  { %596 = vmatpush1.bf16.msra.mxu1 %v4146_v47  ;;  %627 = vmatprep.mubr.bf16.mxu1 %v3938_v4 }
  0x5f   :  { %597 = vmatprep.subr.bf16.mxu1 %v4148_v48  ;;  %668 = vmatpush1.bf16.msra.mxu0 %v4072_v14 }
  0x60   :  { %669 = vmatprep.subr.bf16.mxu0 %v4082_v20 }
  0x62   :  { %598 = vmatpush1.bf16.msra.mxu1 %v4152_v49 }
  0x63   :  { %599 = vmatprep.subr.bf16.mxu1 %v4156_v50  ;;  %670 = vmatpush1.bf16.msra.mxu0 %v4086_v23 }
  0x64   :  { %671 = vmatprep.subr.bf16.mxu0 %v4094_v26 }
  0x66   :  { %600 = vmatpush1.bf16.msra.mxu1 %v4162_v51 }
  0x67   :  { %601 = vmatprep.subr.bf16.mxu1 %v4166_v52  ;;  %672 = vmatpush1.bf16.msra.mxu0 %v4098_v28 }
  0x68   :  { %673 = vmatprep.subr.bf16.mxu0 %v4102_v30 }
  0x6a   :  { %602 = vmatpush1.bf16.msra.mxu1 %v4171_v53 }
  0x6b   :  { %603 = vmatprep.subr.bf16.mxu1 %v4174_v54  ;;  %674 = vmatpush1.bf16.msra.mxu0 %v4109_v32 }
  0x6c   :  { %675 = vmatprep.subr.bf16.mxu0 %v4113_v34 }
  0x6e   :  { %604 = vmatpush1.bf16.msra.mxu1 %v4179_v55 }
  0x6f   :  { %605 = vmatprep.subr.bf16.mxu1 %v4182_v56  ;;  %676 = vmatpush1.bf16.msra.mxu0 %v4116_v36 }
  0x70   :  { %677 = vmatprep.subr.bf16.mxu0 %v4127_v40 }
  0x72   :  { %606 = vmatpush1.bf16.msra.mxu1 %v4189_v57 }
  0x73   :  { %607 = vmatprep.subr.bf16.mxu1 %v4192_v58  ;;  %678 = vmatpush1.bf16.msra.mxu0 %v4130_v42 }
  0x74   :  { %679 = vmatprep.subr.bf16.mxu0 %v4133_v43 }
  0x76   :  { %608 = vmatpush1.bf16.msra.mxu1 %v4197_v59 }
  0x77   :  { %609 = vmatprep.subr.bf16.mxu1 %v4200_v60  ;;  %680 = vmatpush1.bf16.msra.mxu0 %v4139_v46 }
  0x78   :  { %794 = vmatprep.subr.bf16.mxu0 %v4061_v8 }
  0x7a   :  { %610 = vmatpush1.bf16.msra.mxu1 %v4205_v61 }
  0x7b   :  { %706 = vmatprep.subr.bf16.mxu1 %v4135_v44 }
  0x7d   :  { %628 = vmatmul.mubr.bf16.vlgmr.msra.gmra.mrb[8].mxu1 %v3938_v4 }
  0x7e   :  { %707 = vmatpush1.bf16.msra.mxu1 %v4146_v47  ;;  %738 = vmatprep.mubr.bf16.mxu1 %v3938_v4 }
  0x7f   :  { %708 = vmatprep.subr.bf16.mxu1 %v4148_v48 }
  0x82   :  { %709 = vmatpush1.bf16.msra.mxu1 %v4152_v49 }
  0x83   :  { %710 = vmatprep.subr.bf16.mxu1 %v4156_v50 }
  0x86   :  { %711 = vmatpush1.bf16.msra.mxu1 %v4162_v51 }
  0x87   :  { %712 = vmatprep.subr.bf16.mxu1 %v4166_v52 }
  0x8a   :  { %713 = vmatpush1.bf16.msra.mxu1 %v4171_v53 }
  0x8b   :  { %714 = vmatprep.subr.bf16.mxu1 %v4174_v54 }
  0x8e   :  { %715 = vmatpush1.bf16.msra.mxu1 %v4179_v55 }
  0x8f   :  { %716 = vmatprep.subr.bf16.mxu1 %v4182_v56 }
  0x92   :  { %717 = vmatpush1.bf16.msra.mxu1 %v4189_v57 }
  0x93   :  { %718 = vmatprep.subr.bf16.mxu1 %v4192_v58 }
  0x96   :  { %719 = vmatpush1.bf16.msra.mxu1 %v4197_v59 }
  0x97   :  { %720 = vmatprep.subr.bf16.mxu1 %v4200_v60 }
  0x9a   :  { %721 = vmatpush1.bf16.msra.mxu1 %v4205_v61 }
  0x9b   :  { %835 = vmatprep.subr.bf16.mxu1 %v4135_v44 }
 0x128   :  { %v280_v1 = vpop.f32.mrb[0].mxu1 }
 0x129   :  { %v282_v3 = vpop.f32.mrb[1].mxu1  ;;  %v4257_v38 = vadd.f32 %v337_v2, %v280_v1 }
 0x12a   :  { %v284_v7 = vpop.f32.mrb[2].mxu1  ;;  %v4255_v37 = vadd.f32 %v341_v6, %v282_v3 }
 0x12b   :  { %v4241_v10 = vadd.f32 %v337_v2, %v284_v7  ;;  %v286_v11 = vpop.f32.mrb[3].mxu1 }
 0x12c   :  { %v4243_v12 = vadd.f32 %v341_v6, %v286_v11 }
 0x12d   :  { %v588_v18 = vpop.f32.mrb[0].mxu0 }
 0x12e   :  { %v590_v22 = vpop.f32.mrb[1].mxu0  ;;  %v636_v41 = vadd.f32 %v588_v18, %v4257_v38 }
 0x12f   :  { %v592_v27 = vpop.f32.mrb[2].mxu0  ;;  %v637_v39 = vadd.f32 %v590_v22, %v4255_v37 }
 0x130   :  { %v323_v17 = vpop.f32.mrb[4].mxu1  ;;  %v593_v33 = vpop.f32.mrb[3].mxu0  ;;  %v3219_v7 = vmul.f32 -1.442695, %v636_v41 }
 0x131   :  { %v325_v21 = vpop.f32.mrb[5].mxu1  ;;  %v3220_v45 = vmul.f32 -1.442695, %v637_v39  ;;  %v4261_v27 = vadd.f32 %v345_v19, %v323_v17 }
 0x132   :  { %v327_v25 = vpop.f32.mrb[6].mxu1 }
 0x133   :  { %v4251_v29 = vadd.f32 %v345_v19, %v327_v25  ;;  %v329_v31 = vpop.f32.mrb[7].mxu1  ;;  %3542 = vpow2.f32 %v3220_v45 }
 0x134   :  { %v4253_v35 = vadd.f32 %v349_v24, %v329_v31  ;;  %3544 = vpow2.f32 %v3219_v7  ;;  %v4263_v31 = vadd.f32 %v349_v24, %v325_v21 }
 0x13d   :  { %v3543_v63 = vpop.eup %3542 }
 0x13e   :  { %v3545_v11 = vpop.eup %3544  ;;  %v650_v25 = vadd.f32 1.0, %v3543_v63 }
 0x13f   :  { %v649_v33 = vadd.f32 1.0, %v3545_v11 }
 0x140   :  { %3546 = vrcp.f32 %v650_v25 }
 0x141   :  { %3548 = vrcp.f32 %v649_v33 }
 0x14a   :  { %v3547_v41 = vpop.eup %3546 }
 0x14b   :  { %v3549_v45 = vpop.eup %3548  ;;  %v659_v7 = vmul.f32 0.0, %v3547_v41 }
 0x150   :  { %v629_v3 = vpop.f32.mrb[8].mxu1 }
 0x151   :  { %v638_v1 = vadd.f32 %v629_v3, %v4261_v27  ;;  %v631_v2 = vpop.f32.mrb[9].mxu1 }
 0x152   :  { %v639_v6 = vadd.f32 %v631_v2, %v4263_v31  ;;  %v633_v18 = vpop.f32.mrb[10].mxu1 }
 0x153   :  { %v3221_v22 = vmul.f32 -1.442695, %v638_v1  ;;  %v634_v39 = vpop.f32.mrb[11].mxu1 }
 0x154   :  { %3550 = vtanh.f32 %v639_v6 }
 0x155   :  { %3552 = vpow2.f32 %v3221_v22 }
 0x15e   :  { %v3551_v17 = vpop.eup %3550 }
 0x15f   :  { %v3553_v19 = vpop.eup %3552  ;;  %v660_v21 = vmul.f32 %v3551_v17, %v3549_v45 }
 0x160   :  { %v651_v24 = vadd.f32 1.0, %v3553_v19 }
 0x161   :  { %v4267_v63 = vadd.f32 %v660_v21, %v659_v7 }
 0x162   :  { %3554 = vrcp.f32 %v651_v24 }
 0x163   :  { %3556 = vtanh.f32 %v4267_v63 }
 0x16c   :  { %v3555_v11 = vpop.eup %3554 }
 0x16d   :  { %v3557_v25 = vpop.eup %3556 }
 0x16e   :  { %v4270_v3 = vmul.f32 %v3557_v25, %v3555_v11 }
 0x170   :  { %v664_v33 = vpack.c.bf16 %v4270_v3, %v4270_v3 }
 0x172   :  { %698 = vmatmul.mubr.bf16.vlgmr.msra.gmra.mrb[4].mxu0 %v664_v33  ;;  %739 = vmatmul.mubr.bf16.vlgmr.msra.gmra.mrb[12].mxu1 %v664_v33 }
 0x173   :  { %795 = vmatpush1.bf16.msra.mxu0 %v4063_v9  ;;  %836 = vmatpush1.bf16.msra.mxu1 %v4146_v47 }
 0x174   :  { %796 = vmatprep.subr.bf16.mxu0 %v4069_v13  ;;  %837 = vmatprep.subr.bf16.mxu1 %v4148_v48 }
 0x175   :  { %826 = vmatprep.mubr.bf16.mxu0 %v3938_v4  ;;  %867 = vmatprep.mubr.bf16.mxu1 %v3938_v4 }
 0x177   :  { %797 = vmatpush1.bf16.msra.mxu0 %v4072_v14  ;;  %838 = vmatpush1.bf16.msra.mxu1 %v4152_v49 }
 0x178   :  { %798 = vmatprep.subr.bf16.mxu0 %v4082_v20  ;;  %839 = vmatprep.subr.bf16.mxu1 %v4156_v50 }
 0x17b   :  { %799 = vmatpush1.bf16.msra.mxu0 %v4086_v23  ;;  %840 = vmatpush1.bf16.msra.mxu1 %v4162_v51 }
 0x17c   :  { %800 = vmatprep.subr.bf16.mxu0 %v4094_v26  ;;  %841 = vmatprep.subr.bf16.mxu1 %v4166_v52 }
 0x17f   :  { %801 = vmatpush1.bf16.msra.mxu0 %v4098_v28  ;;  %842 = vmatpush1.bf16.msra.mxu1 %v4171_v53 }
 0x180   :  { %802 = vmatprep.subr.bf16.mxu0 %v4102_v30  ;;  %843 = vmatprep.subr.bf16.mxu1 %v4174_v54 }
 0x183   :  { %803 = vmatpush1.bf16.msra.mxu0 %v4109_v32  ;;  %844 = vmatpush1.bf16.msra.mxu1 %v4179_v55 }
 0x184   :  { %804 = vmatprep.subr.bf16.mxu0 %v4113_v34  ;;  %845 = vmatprep.subr.bf16.mxu1 %v4182_v56 }
 0x187   :  { %805 = vmatpush1.bf16.msra.mxu0 %v4116_v36  ;;  %846 = vmatpush1.bf16.msra.mxu1 %v4189_v57 }
 0x188   :  { %806 = vmatprep.subr.bf16.mxu0 %v4127_v40  ;;  %847 = vmatprep.subr.bf16.mxu1 %v4192_v58 }
 0x18b   :  { %807 = vmatpush1.bf16.msra.mxu0 %v4130_v42  ;;  %848 = vmatpush1.bf16.msra.mxu1 %v4197_v59 }
 0x18c   :  { %808 = vmatprep.subr.bf16.mxu0 %v4133_v43  ;;  %849 = vmatprep.subr.bf16.mxu1 %v4200_v60 }
 0x18f   :  { %809 = vmatpush1.bf16.msra.mxu0 %v4139_v46  ;;  %850 = vmatpush1.bf16.msra.mxu1 %v4205_v61 }
 0x190   :  { %923 = vmatprep.subr.bf16.mxu0 %v4061_v8  ;;  %964 = vmatprep.subr.bf16.mxu1 %v4135_v44 }
 0x245   :  { %v699_v1 = vpop.f32.mrb[4].mxu0  ;;  %v740_v2 = vpop.f32.mrb[12].mxu1 }
 0x246   :  { %v751_v6 = vrot.slane %v699_v1, 6  ;;  %v701_v18 = vpop.f32.mrb[5].mxu0  ;;  %v742_v22 = vpop.f32.mrb[13].mxu1  ;;  %v753_v25 = vrot.slane %v740_v2, 6  ;;  %v783_v2 = vrot.slane %v4267_v63, 6 }
 0x247   :  { %v752_v39 = vrot.slane %v701_v18, 6  ;;  %v703_v41 = vpop.f32.mrb[6].mxu0  ;;  %v744_v45 = vpop.f32.mrb[14].mxu1  ;;  %v754_v33 = vrot.slane %v742_v22, 6 }
 0x248   :  { %v759_v17 = vadd.f32 %v751_v6, %v4257_v38  ;;  %v704_v19 = vpop.f32.mrb[7].mxu0  ;;  %v745_v7 = vpop.f32.mrb[15].mxu1  ;;  %v761_v16 = vadd.f32 %v753_v25, %v4261_v27 }
 0x249   :  { %v760_v21 = vadd.f32 %v752_v39, %v4255_v37  ;;  %v762_v1 = vadd.f32 %v754_v33, %v4263_v31 }
 0x24a   :  { %v3222_v24 = vmul.f32 -1.442695, %v759_v17  ;;  %v3224_v0 = vmul.f32 -1.442695, %v761_v16 }
 0x24b   :  { %v3223_v11 = vmul.f32 -1.442695, %v760_v21 }
 0x24c   :  { %3558 = vpow2.f32 %v3222_v24 }
 0x24d   :  { %3560 = vpow2.f32 %v3223_v11 }
 0x24e   :  { %3562 = vtanh.f32 %v762_v1 }
 0x24f   :  { %3564 = vpow2.f32 %v3224_v0 }
 0x256   :  { %v3559_v18 = vpop.eup %3558 }
 0x257   :  { %v772_v41 = vadd.f32 1.0, %v3559_v18  ;;  %v3561_v45 = vpop.eup %3560 }
 0x258   :  { %v773_v6 = vadd.f32 1.0, %v3561_v45  ;;  %v3563_v39 = vpop.eup %3562 }
 0x259   :  { %3566 = vrcp.f32 %v772_v41  ;;  %v3565_v17 = vpop.eup %3564 }
 0x25a   :  { %3568 = vrcp.f32 %v773_v6  ;;  %v774_v21 = vadd.f32 1.0, %v3565_v17 }
 0x25c   :  { %3570 = vrcp.f32 %v774_v21 }
 0x263   :  { %v3567_v19 = vpop.eup %3566 }
 0x264   :  { %v786_v7 = vmul.f32 %v3567_v19, %v3563_v39  ;;  %v3569_v22 = vpop.eup %3568 }
 0x265   :  { %v785_v24 = vmul.f32 %v3569_v22, %v783_v2 }
 0x266   :  { %v3571_v16 = vpop.eup %3570 }
 0x267   :  { %v4313_v11 = vadd.f32 %v786_v7, %v785_v24 }
 0x269   :  { %3572 = vtanh.f32 %v4313_v11 }
 0x273   :  { %v3573_v25 = vpop.eup %3572 }
 0x274   :  { %v4316_v0 = vmul.f32 %v3573_v25, %v3571_v16 }
 0x276   :  { %v790_v33 = vpack.c.bf16 %v4316_v0, %v4316_v0 }
 0x278   :  { %v792_v1 = vrot.slane %v790_v33, 1 }
 0x27a   :  { %827 = vmatmul.mubr.bf16.vlgmr.msra.gmra.mrb[8].mxu0 %v792_v1  ;;  %868 = vmatmul.mubr.bf16.vlgmr.msra.gmra.mrb[16].mxu1 %v792_v1 }
 0x27b   :  { %924 = vmatpush1.bf16.msra.mxu0 %v4063_v9  ;;  %965 = vmatpush1.bf16.msra.mxu1 %v4146_v47 }
 0x27c   :  { %925 = vmatprep.subr.bf16.mxu0 %v4069_v13  ;;  %966 = vmatprep.subr.bf16.mxu1 %v4148_v48 }
 0x27d   :  { %955 = vmatprep.mubr.bf16.mxu0 %v3938_v4  ;;  %996 = vmatprep.mubr.bf16.mxu1 %v3938_v4 }
 0x27f   :  { %926 = vmatpush1.bf16.msra.mxu0 %v4072_v14  ;;  %967 = vmatpush1.bf16.msra.mxu1 %v4152_v49 }
 0x280   :  { %927 = vmatprep.subr.bf16.mxu0 %v4082_v20  ;;  %968 = vmatprep.subr.bf16.mxu1 %v4156_v50 }
 0x283   :  { %928 = vmatpush1.bf16.msra.mxu0 %v4086_v23  ;;  %969 = vmatpush1.bf16.msra.mxu1 %v4162_v51 }
 0x284   :  { %929 = vmatprep.subr.bf16.mxu0 %v4094_v26  ;;  %970 = vmatprep.subr.bf16.mxu1 %v4166_v52 }
 0x287   :  { %930 = vmatpush1.bf16.msra.mxu0 %v4098_v28  ;;  %971 = vmatpush1.bf16.msra.mxu1 %v4171_v53 }
 0x288   :  { %931 = vmatprep.subr.bf16.mxu0 %v4102_v30  ;;  %972 = vmatprep.subr.bf16.mxu1 %v4174_v54 }
 0x28b   :  { %932 = vmatpush1.bf16.msra.mxu0 %v4109_v32  ;;  %973 = vmatpush1.bf16.msra.mxu1 %v4179_v55 }
 0x28c   :  { %933 = vmatprep.subr.bf16.mxu0 %v4113_v34  ;;  %974 = vmatprep.subr.bf16.mxu1 %v4182_v56 }
 0x28f   :  { %934 = vmatpush1.bf16.msra.mxu0 %v4116_v36  ;;  %975 = vmatpush1.bf16.msra.mxu1 %v4189_v57 }
 0x290   :  { %935 = vmatprep.subr.bf16.mxu0 %v4127_v40  ;;  %976 = vmatprep.subr.bf16.mxu1 %v4192_v58 }
 0x293   :  { %936 = vmatpush1.bf16.msra.mxu0 %v4130_v42  ;;  %977 = vmatpush1.bf16.msra.mxu1 %v4197_v59 }
 0x294   :  { %937 = vmatprep.subr.bf16.mxu0 %v4133_v43  ;;  %978 = vmatprep.subr.bf16.mxu1 %v4200_v60 }
 0x297   :  { %938 = vmatpush1.bf16.msra.mxu0 %v4139_v46  ;;  %979 = vmatpush1.bf16.msra.mxu1 %v4205_v61 }
 0x298   :  { %1052 = vmatprep.subr.bf16.mxu0 %v4061_v8  ;;  %1093 = vmatprep.subr.bf16.mxu1 %v4135_v44 }
 0x34d   :  { %v828_v63 = vpop.f32.mrb[8].mxu0  ;;  %v869_v18 = vpop.f32.mrb[16].mxu1 }
 0x34e   :  { %v880_v41 = vrot.slane %v828_v63, 4  ;;  %v830_v45 = vpop.f32.mrb[9].mxu0  ;;  %v871_v6 = vpop.f32.mrb[17].mxu1  ;;  %v882_v8 = vrot.slane %v869_v18, 4  ;;  %v912_v18 = vrot.slane %v4313_v11, 6 }
 0x34f   :  { %v881_v39 = vrot.slane %v830_v45, 4  ;;  %v832_v17 = vpop.f32.mrb[10].mxu0  ;;  %v873_v19 = vpop.f32.mrb[18].mxu1  ;;  %v883_v25 = vrot.slane %v871_v6, 4 }
 0x350   :  { %v888_v2 = vadd.f32 %v880_v41, %v4257_v38  ;;  %v833_v7 = vpop.f32.mrb[11].mxu0  ;;  %v874_v22 = vpop.f32.mrb[19].mxu1  ;;  %v890_v33 = vadd.f32 %v882_v8, %v4261_v27 }
 0x351   :  { %v889_v21 = vadd.f32 %v881_v39, %v4255_v37  ;;  %v891_v1 = vadd.f32 %v883_v25, %v4263_v31 }
 0x352   :  { %v3225_v24 = vmul.f32 -1.442695, %v888_v2  ;;  %v3227_v63 = vmul.f32 -1.442695, %v890_v33 }
 0x353   :  { %v3226_v16 = vmul.f32 -1.442695, %v889_v21 }
 0x354   :  { %3574 = vpow2.f32 %v3225_v24 }
 0x355   :  { %3576 = vpow2.f32 %v3226_v16 }
 0x356   :  { %3578 = vtanh.f32 %v891_v1  ;;  %v1550_v1 = vsel %vm1549_vm4, %v4270_v3, %v4316_v0 }
 0x357   :  { %3580 = vpow2.f32 %v3227_v63 }
 0x35e   :  { %v3575_v45 = vpop.eup %3574 }
 0x35f   :  { %v901_v17 = vadd.f32 1.0, %v3575_v45  ;;  %v3577_v19 = vpop.eup %3576 }
 0x360   :  { %v902_v41 = vadd.f32 1.0, %v3577_v19  ;;  %v3579_v39 = vpop.eup %3578 }
 0x361   :  { %3582 = vrcp.f32 %v901_v17  ;;  %v3581_v2 = vpop.eup %3580 }
 0x362   :  { %3584 = vrcp.f32 %v902_v41  ;;  %v903_v21 = vadd.f32 1.0, %v3581_v2 }
 0x364   :  { %3586 = vrcp.f32 %v903_v21 }
 0x36b   :  { %v3583_v7 = vpop.eup %3582 }
 0x36c   :  { %v915_v22 = vmul.f32 %v3583_v7, %v3579_v39  ;;  %v3585_v6 = vpop.eup %3584 }
 0x36d   :  { %v914_v24 = vmul.f32 %v3585_v6, %v912_v18 }
 0x36e   :  { %v3587_v8 = vpop.eup %3586 }
 0x36f   :  { %v4359_v16 = vadd.f32 %v915_v22, %v914_v24 }
 0x371   :  { %3588 = vtanh.f32 %v4359_v16 }
 0x37b   :  { %v3589_v25 = vpop.eup %3588 }
 0x37c   :  { %v918_v33 = vmul.f32 %v3589_v25, %v3587_v8  ;;  %v1041_v8 = vrot.slane %v4359_v16, 6  ;;  %v4416_v16 = vld [vmem:[#allocation3] ss:$16 sps:$4 sm:$0xff]  }
 0x37e   :  { %v919_v63 = vpack.c.bf16 %v918_v33, %v918_v33  ;;  %v4366_v11 = vsel %vm1551_vm5, %v1550_v1, %v918_v33 }
 0x380   :  { %v921_v45 = vrot.slane %v919_v63, 2 }
 0x382   :  { %956 = vmatmul.mubr.bf16.vlgmr.msra.gmra.mrb[12].mxu0 %v921_v45  ;;  %997 = vmatmul.mubr.bf16.vlgmr.msra.gmra.mrb[20].mxu1 %v921_v45 }
 0x383   :  { %1053 = vmatpush1.bf16.msra.mxu0 %v4063_v9  ;;  %1094 = vmatpush1.bf16.msra.mxu1 %v4146_v47  ;;  %v4400_v9 = vld [vmem:[#allocation3 + $0x4] ss:$16 sps:$4 sm:$0xff]  }
 0x384   :  { %1054 = vmatprep.subr.bf16.mxu0 %v4069_v13  ;;  %1095 = vmatprep.subr.bf16.mxu1 %v4148_v48 }
 0x385   :  { %1084 = vmatprep.mubr.bf16.mxu0 %v3938_v4  ;;  %1125 = vmatprep.mubr.bf16.mxu1 %v3938_v4 }
 0x387   :  { %1055 = vmatpush1.bf16.msra.mxu0 %v4072_v14  ;;  %1096 = vmatpush1.bf16.msra.mxu1 %v4152_v49 }
 0x388   :  { %1056 = vmatprep.subr.bf16.mxu0 %v4082_v20  ;;  %1097 = vmatprep.subr.bf16.mxu1 %v4156_v50 }
 0x38b   :  { %1057 = vmatpush1.bf16.msra.mxu0 %v4086_v23  ;;  %1098 = vmatpush1.bf16.msra.mxu1 %v4162_v51 }
 0x38c   :  { %1058 = vmatprep.subr.bf16.mxu0 %v4094_v26  ;;  %1099 = vmatprep.subr.bf16.mxu1 %v4166_v52 }
 0x38f   :  { %1059 = vmatpush1.bf16.msra.mxu0 %v4098_v28  ;;  %1100 = vmatpush1.bf16.msra.mxu1 %v4171_v53 }
 0x390   :  { %1060 = vmatprep.subr.bf16.mxu0 %v4102_v30  ;;  %1101 = vmatprep.subr.bf16.mxu1 %v4174_v54 }
 0x393   :  { %1061 = vmatpush1.bf16.msra.mxu0 %v4109_v32  ;;  %1102 = vmatpush1.bf16.msra.mxu1 %v4179_v55 }
 0x394   :  { %1062 = vmatprep.subr.bf16.mxu0 %v4113_v34  ;;  %1103 = vmatprep.subr.bf16.mxu1 %v4182_v56 }
 0x397   :  { %1063 = vmatpush1.bf16.msra.mxu0 %v4116_v36  ;;  %1104 = vmatpush1.bf16.msra.mxu1 %v4189_v57 }
 0x398   :  { %1064 = vmatprep.subr.bf16.mxu0 %v4127_v40  ;;  %1105 = vmatprep.subr.bf16.mxu1 %v4192_v58 }
 0x39b   :  { %1065 = vmatpush1.bf16.msra.mxu0 %v4130_v42  ;;  %1106 = vmatpush1.bf16.msra.mxu1 %v4197_v59 }
 0x39c   :  { %1066 = vmatprep.subr.bf16.mxu0 %v4133_v43  ;;  %1107 = vmatprep.subr.bf16.mxu1 %v4200_v60 }
 0x39f   :  { %1067 = vmatpush1.bf16.msra.mxu0 %v4139_v46  ;;  %1108 = vmatpush1.bf16.msra.mxu1 %v4205_v61 }
 0x3a0   :  { %1166 = vmatprep.subr.bf16.mxu0 %v4400_v9  ;;  %1207 = vmatprep.subr.bf16.mxu1 %v4135_v44 }
 0x455   :  { %v957_v13 = vpop.f32.mrb[12].mxu0  ;;  %v998_v14 = vpop.f32.mrb[20].mxu1 }
 0x456   :  { %v1009_v20 = vrot.slane %v957_v13, 2  ;;  %v959_v23 = vpop.f32.mrb[13].mxu0  ;;  %v1000_v26 = vpop.f32.mrb[21].mxu1  ;;  %v1011_v19 = vrot.slane %v998_v14, 2 }
 0x457   :  { %v1010_v28 = vrot.slane %v959_v23, 2  ;;  %v961_v30 = vpop.f32.mrb[14].mxu0  ;;  %v1002_v32 = vpop.f32.mrb[22].mxu1  ;;  %v1012_v41 = vrot.slane %v1000_v26, 2  ;;  %v4420_v26 = vld [vmem:[#allocation3 + $0x24] ss:$16 sps:$4 sm:$0xff]  }
 0x458   :  { %v1017_v34 = vadd.f32 %v1009_v20, %v4257_v38  ;;  %v962_v36 = vpop.f32.mrb[15].mxu0  ;;  %v1003_v40 = vpop.f32.mrb[23].mxu1  ;;  %v1019_v39 = vadd.f32 %v1011_v19, %v4261_v27  ;;  %v4442_v30 = vld [vmem:[#allocation3 + $0x60] ss:$16 sps:$4 sm:$0xff]   ;;  %v4454_v32 = vld [vmem:[#allocation3 + $0xa4] ss:$16 sps:$4 sm:$0xff]  }
 0x459   :  { %v1018_v3 = vadd.f32 %v1010_v28, %v4255_v37  ;;  %v1020_v2 = vadd.f32 %v1012_v41, %v4263_v31  ;;  %v4430_v28 = vld [vmem:[#allocation3 + $0x44] ss:$16 sps:$4 sm:$0xff]  }
 0x45a   :  { %v3228_v0 = vmul.f32 -1.442695, %v1017_v34  ;;  %v3230_v7 = vmul.f32 -1.442695, %v1019_v39  ;;  %v4458_v34 = vld [vmem:[#allocation3 + $0xa0] ss:$16 sps:$4 sm:$0xff]  }
 0x45b   :  { %v3229_v17 = vmul.f32 -1.442695, %v1018_v3  ;;  %v4462_v36 = vld [vmem:[#allocation3 + $0xc4] ss:$16 sps:$4 sm:$0xff]  }
 0x45c   :  { %3590 = vpow2.f32 %v3228_v0 }
 0x45d   :  { %3592 = vpow2.f32 %v3229_v17 }
 0x45e   :  { %3594 = vtanh.f32 %v1020_v2 }
 0x45f   :  { %3596 = vpow2.f32 %v3230_v7 }
 0x466   :  { %v3591_v18 = vpop.eup %3590 }
 0x467   :  { %v1030_v22 = vadd.f32 1.0, %v3591_v18  ;;  %v3593_v6 = vpop.eup %3592 }
 0x468   :  { %v1031_v38 = vadd.f32 1.0, %v3593_v6  ;;  %v3595_v37 = vpop.eup %3594 }
 0x469   :  { %3598 = vrcp.f32 %v1030_v22  ;;  %v3597_v21 = vpop.eup %3596 }
 0x46a   :  { %3600 = vrcp.f32 %v1031_v38  ;;  %v1032_v1 = vadd.f32 1.0, %v3597_v21 }
 0x46c   :  { %3602 = vrcp.f32 %v1032_v1 }
 0x473   :  { %v3599_v24 = vpop.eup %3598 }
 0x474   :  { %v1044_v25 = vmul.f32 %v3599_v24, %v3595_v37  ;;  %v3601_v33 = vpop.eup %3600 }
 0x475   :  { %v1043_v27 = vmul.f32 %v3601_v33, %v1041_v8 }
 0x476   :  { %v3603_v31 = vpop.eup %3602 }
 0x477   :  { %v4409_v63 = vadd.f32 %v1044_v25, %v1043_v27 }
 0x479   :  { %3604 = vtanh.f32 %v4409_v63  ;;  %v1158_v33 = vrot.slane %v4409_v63, 6  ;;  %v4487_v63 = vld [vmem:[#allocation3 + $0x8] ss:$16 sps:$4 sm:$0xff]  }
 0x483   :  { %v3605_v45 = vpop.eup %3604 }
 0x484   :  { %v1047_v13 = vmul.f32 %v3605_v45, %v3603_v31 }
 0x486   :  { %v1048_v14 = vpack.c.bf16 %v1047_v13, %v1047_v13  ;;  %v4414_v20 = vsel %vm1553_vm6, %v4366_v11, %v1047_v13  ;;  %v4426_v11 = vld [vmem:[#allocation3 + $0x20] ss:$16 sps:$4 sm:$0xff]  }
 0x488   :  { %v1050_v23 = vrot.slane %v1048_v14, 3 }
 0x48a   :  { %1085 = vmatmul.mubr.bf16.vlgmr.msra.gmra.mrb[16].mxu0 %v1050_v23  ;;  %1126 = vmatmul.mubr.bf16.vlgmr.msra.gmra.mrb[24].mxu1 %v1050_v23 }
 0x48b   :  { %1167 = vmatpush1.bf16.msra.mxu0 %v4416_v16  ;;  %1208 = vmatpush1.bf16.msra.mxu1 %v4146_v47  ;;  %v4434_v47 = vld [vmem:[#allocation3 + $0x40] ss:$16 sps:$4 sm:$0xff]  }
 0x48c   :  { %1168 = vmatprep.subr.bf16.mxu0 %v4420_v26  ;;  %1209 = vmatprep.subr.bf16.mxu1 %v4148_v48  ;;  %v4438_v48 = vld [vmem:[#allocation3 + $0x64] ss:$16 sps:$4 sm:$0xff]  }
 0x48d   :  { %1198 = vmatprep.mubr.bf16.mxu0 %v3938_v4  ;;  %1239 = vmatprep.mubr.bf16.mxu1 %v3938_v4 }
 0x48f   :  { %1169 = vmatpush1.bf16.msra.mxu0 %v4426_v11  ;;  %1210 = vmatpush1.bf16.msra.mxu1 %v4152_v49  ;;  %v4446_v49 = vld [vmem:[#allocation3 + $0x84] ss:$16 sps:$4 sm:$0xff]  }
 0x490   :  { %1170 = vmatprep.subr.bf16.mxu0 %v4430_v28  ;;  %1211 = vmatprep.subr.bf16.mxu1 %v4156_v50  ;;  %v4450_v50 = vld [vmem:[#allocation3 + $0x80] ss:$16 sps:$4 sm:$0xff]  }
 0x493   :  { %1171 = vmatpush1.bf16.msra.mxu0 %v4434_v47  ;;  %1212 = vmatpush1.bf16.msra.mxu1 %v4162_v51 }
 0x494   :  { %1172 = vmatprep.subr.bf16.mxu0 %v4438_v48  ;;  %1213 = vmatprep.subr.bf16.mxu1 %v4166_v52 }
 0x497   :  { %1173 = vmatpush1.bf16.msra.mxu0 %v4442_v30  ;;  %1214 = vmatpush1.bf16.msra.mxu1 %v4171_v53 }
 0x498   :  { %1174 = vmatprep.subr.bf16.mxu0 %v4446_v49  ;;  %1215 = vmatprep.subr.bf16.mxu1 %v4174_v54 }
 0x49b   :  { %1175 = vmatpush1.bf16.msra.mxu0 %v4450_v50  ;;  %1216 = vmatpush1.bf16.msra.mxu1 %v4179_v55 }
 0x49c   :  { %1176 = vmatprep.subr.bf16.mxu0 %v4454_v32  ;;  %1217 = vmatprep.subr.bf16.mxu1 %v4182_v56 }
 0x49f   :  { %1177 = vmatpush1.bf16.msra.mxu0 %v4458_v34  ;;  %1218 = vmatpush1.bf16.msra.mxu1 %v4189_v57 }
 0x4a0   :  { %1178 = vmatprep.subr.bf16.mxu0 %v4462_v36  ;;  %1219 = vmatprep.subr.bf16.mxu1 %v4192_v58 }
 0x4a3   :  { %1179 = vmatpush1.bf16.msra.mxu0 %v4130_v42  ;;  %1220 = vmatpush1.bf16.msra.mxu1 %v4197_v59 }
 0x4a4   :  { %1180 = vmatprep.subr.bf16.mxu0 %v4133_v43  ;;  %1221 = vmatprep.subr.bf16.mxu1 %v4200_v60 }
 0x4a7   :  { %1181 = vmatpush1.bf16.msra.mxu0 %v4139_v46  ;;  %1222 = vmatpush1.bf16.msra.mxu1 %v4205_v61 }
 0x4a8   :  { %1295 = vmatprep.subr.bf16.mxu0 %v4400_v9  ;;  %1336 = vmatprep.subr.bf16.mxu1 %v4135_v44 }
 0x55d   :  { %v1086_v40 = vpop.f32.mrb[16].mxu0  ;;  %v1127_v3 = vpop.f32.mrb[24].mxu1 }
 0x55e   :  { %v1134_v0 = vadd.f32 %v1086_v40, %v4241_v10  ;;  %v1088_v17 = vpop.f32.mrb[17].mxu0  ;;  %v1129_v42 = vpop.f32.mrb[25].mxu1  ;;  %v1136_v18 = vadd.f32 %v1127_v3, %v4251_v29 }
 0x55f   :  { %v1135_v19 = vadd.f32 %v1088_v17, %v4243_v12  ;;  %v1090_v41 = vpop.f32.mrb[18].mxu0  ;;  %v1131_v43 = vpop.f32.mrb[26].mxu1  ;;  %v1137_v44 = vadd.f32 %v1129_v42, %v4253_v35  ;;  %v4497_v17 = vld [vmem:[#allocation3 + $0x28] ss:$16 sps:$4 sm:$0xff]   ;;  %v4501_v42 = vld [vmem:[#allocation3 + $0x4c] ss:$16 sps:$4 sm:$0xff]  }
 0x560   :  { %v3231_v39 = vmul.f32 -1.442695, %v1134_v0  ;;  %v1091_v2 = vpop.f32.mrb[19].mxu0  ;;  %v1132_v7 = vpop.f32.mrb[27].mxu1  ;;  %v3233_v22 = vmul.f32 -1.442695, %v1136_v18 }
 0x561   :  { %v3232_v46 = vmul.f32 -1.442695, %v1135_v19  ;;  %v4491_v0 = vld [vmem:[#allocation3 + $0x2c] ss:$16 sps:$4 sm:$0xff]  }
 0x562   :  { %3606 = vpow2.f32 %v3231_v39 }
 0x563   :  { %3608 = vpow2.f32 %v3232_v46 }
 0x564   :  { %3610 = vtanh.f32 %v1137_v44 }
 0x565   :  { %3612 = vpow2.f32 %v3233_v22 }
 0x56c   :  { %v3607_v6 = vpop.eup %3606 }
 0x56d   :  { %v1147_v38 = vadd.f32 1.0, %v3607_v6  ;;  %v3609_v37 = vpop.eup %3608 }
 0x56e   :  { %v1148_v21 = vadd.f32 1.0, %v3609_v37  ;;  %v3611_v24 = vpop.eup %3610 }
 0x56f   :  { %3614 = vrcp.f32 %v1147_v38  ;;  %v3613_v8 = vpop.eup %3612 }
 0x570   :  { %3616 = vrcp.f32 %v1148_v21  ;;  %v1149_v31 = vadd.f32 1.0, %v3613_v8 }
 0x572   :  { %3618 = vrcp.f32 %v1149_v31 }
 0x579   :  { %v3615_v25 = vpop.eup %3614 }
 0x57a   :  { %v1161_v1 = vmul.f32 %v3615_v25, %v3611_v24  ;;  %v3617_v27 = vpop.eup %3616 }
 0x57b   :  { %v1160_v45 = vmul.f32 %v3617_v27, %v1158_v33 }
 0x57c   :  { %v3619_v14 = vpop.eup %3618 }
 0x57d   :  { %v4479_v13 = vadd.f32 %v1161_v1, %v1160_v45 }
 0x57f   :  { %3620 = vtanh.f32 %v4479_v13  ;;  %v1284_v1 = vrot.slane %v4479_v13, 6  ;;  %v3821_v13 = vld [vmem:[#allocation3 + $0x68] ss:$16 sps:$4 sm:$0xff]  }
 0x589   :  { %v3621_v23 = vpop.eup %3620 }
 0x58a   :  { %v4482_v40 = vmul.f32 %v3621_v23, %v3619_v14 }
 0x58c   :  { %v1165_v3 = vpack.c.bf16 %v4482_v40, %v4482_v40 }
 0x58e   :  { %1199 = vmatmul.mubr.bf16.vlgmr.msra.gmra.mrb[20].mxu0 %v1165_v3  ;;  %1240 = vmatmul.mubr.bf16.vlgmr.msra.gmra.mrb[28].mxu1 %v1165_v3 }
 0x58f   :  { %1296 = vmatpush1.bf16.msra.mxu0 %v4416_v16  ;;  %1337 = vmatpush1.bf16.msra.mxu1 %v4487_v63 }
 0x590   :  { %1297 = vmatprep.subr.bf16.mxu0 %v4420_v26  ;;  %1338 = vmatprep.subr.bf16.mxu1 %v4491_v0 }
 0x591   :  { %1327 = vmatprep.mubr.bf16.mxu0 %v3938_v4  ;;  %1368 = vmatprep.mubr.bf16.mxu1 %v3938_v4 }
 0x593   :  { %1298 = vmatpush1.bf16.msra.mxu0 %v4426_v11  ;;  %1339 = vmatpush1.bf16.msra.mxu1 %v4497_v17 }
 0x594   :  { %1299 = vmatprep.subr.bf16.mxu0 %v4430_v28  ;;  %1340 = vmatprep.subr.bf16.mxu1 %v4501_v42 }
 0x597   :  { %1300 = vmatpush1.bf16.msra.mxu0 %v4434_v47  ;;  %1341 = vmatpush1.bf16.msra.mxu1 %v4162_v51  ;;  %v4520_v51 = vld [vmem:[#allocation3 + $0xc0] ss:$16 sps:$4 sm:$0xff]  }
 0x598   :  { %1301 = vmatprep.subr.bf16.mxu0 %v4438_v48  ;;  %1342 = vmatprep.subr.bf16.mxu1 %v4166_v52  ;;  %v4524_v52 = vld [vmem:[#allocation3 + $0xe4] ss:$16 sps:$4 sm:$0xff]  }
 0x59b   :  { %1302 = vmatpush1.bf16.msra.mxu0 %v4442_v30  ;;  %1343 = vmatpush1.bf16.msra.mxu1 %v4171_v53  ;;  %v4528_v53 = vld [vmem:[#allocation3 + $0xe0] ss:$16 sps:$4 sm:$0xff]  }
 0x59c   :  { %1303 = vmatprep.subr.bf16.mxu0 %v4446_v49  ;;  %1344 = vmatprep.subr.bf16.mxu1 %v4174_v54  ;;  %v3818_v54 = vld [vmem:[#allocation3 + $0xc] ss:$16 sps:$4 sm:$0xff]  }
 0x59f   :  { %1304 = vmatpush1.bf16.msra.mxu0 %v4450_v50  ;;  %1345 = vmatpush1.bf16.msra.mxu1 %v4179_v55 }
 0x5a0   :  { %1305 = vmatprep.subr.bf16.mxu0 %v4454_v32  ;;  %1346 = vmatprep.subr.bf16.mxu1 %v4182_v56 }
 0x5a3   :  { %1306 = vmatpush1.bf16.msra.mxu0 %v4458_v34  ;;  %1347 = vmatpush1.bf16.msra.mxu1 %v4189_v57 }
 0x5a4   :  { %1307 = vmatprep.subr.bf16.mxu0 %v4462_v36  ;;  %1348 = vmatprep.subr.bf16.mxu1 %v4192_v58 }
 0x5a7   :  { %1308 = vmatpush1.bf16.msra.mxu0 %v4520_v51  ;;  %1349 = vmatpush1.bf16.msra.mxu1 %v4197_v59 }
 0x5a8   :  { %1309 = vmatprep.subr.bf16.mxu0 %v4524_v52  ;;  %1350 = vmatprep.subr.bf16.mxu1 %v4200_v60 }
 0x5ab   :  { %1310 = vmatpush1.bf16.msra.mxu0 %v4528_v53  ;;  %1351 = vmatpush1.bf16.msra.mxu1 %v4205_v61 }
 0x5ac   :  { %1424 = vmatprep.subr.bf16.mxu0 %v4400_v9  ;;  %1465 = vmatprep.subr.bf16.mxu1 %v3818_v54 }
 0x661   :  { %v1200_v55 = vpop.f32.mrb[20].mxu0  ;;  %v1241_v56 = vpop.f32.mrb[28].mxu1 }
 0x662   :  { %v1252_v57 = vrot.slane %v1200_v55, 6  ;;  %v1202_v58 = vpop.f32.mrb[21].mxu0  ;;  %v1243_v59 = vpop.f32.mrb[29].mxu1  ;;  %v1254_v9 = vrot.slane %v1241_v56, 6 }
 0x663   :  { %v1253_v19 = vrot.slane %v1202_v58, 6  ;;  %v1204_v41 = vpop.f32.mrb[22].mxu0  ;;  %v1245_v43 = vpop.f32.mrb[30].mxu1  ;;  %v1255_v18 = vrot.slane %v1243_v59, 6 }
 0x664   :  { %v1260_v60 = vadd.f32 %v1252_v57, %v4241_v10  ;;  %v1205_v39 = vpop.f32.mrb[23].mxu0  ;;  %v1246_v2 = vpop.f32.mrb[31].mxu1  ;;  %v1262_v44 = vadd.f32 %v1254_v9, %v4251_v29 }
 0x665   :  { %v1261_v7 = vadd.f32 %v1253_v19, %v4243_v12  ;;  %v1263_v22 = vadd.f32 %v1255_v18, %v4253_v35 }
 0x666   :  { %v3234_v46 = vmul.f32 -1.442695, %v1260_v60  ;;  %v3236_v6 = vmul.f32 -1.442695, %v1262_v44 }
 0x667   :  { %v3235_v61 = vmul.f32 -1.442695, %v1261_v7 }
 0x668   :  { %3622 = vpow2.f32 %v3234_v46 }
 0x669   :  { %3624 = vpow2.f32 %v3235_v61 }
 0x66a   :  { %3626 = vtanh.f32 %v1263_v22 }
 0x66b   :  { %3628 = vpow2.f32 %v3236_v6 }
 0x672   :  { %v3623_v38 = vpop.eup %3622 }
 0x673   :  { %v1273_v37 = vadd.f32 1.0, %v3623_v38  ;;  %v3625_v21 = vpop.eup %3624 }
 0x674   :  { %v1274_v24 = vadd.f32 1.0, %v3625_v21  ;;  %v3627_v8 = vpop.eup %3626 }
 0x675   :  { %3630 = vrcp.f32 %v1273_v37  ;;  %v3629_v25 = vpop.eup %3628 }
 0x676   :  { %3632 = vrcp.f32 %v1274_v24  ;;  %v1275_v45 = vadd.f32 1.0, %v3629_v25 }
 0x678   :  { %3634 = vrcp.f32 %v1275_v45 }
 0x67f   :  { %v3631_v33 = vpop.eup %3630 }
 0x680   :  { %v1287_v27 = vmul.f32 %v3631_v33, %v3627_v8  ;;  %v3633_v31 = vpop.eup %3632 }
 0x681   :  { %v1286_v14 = vmul.f32 %v3633_v31, %v1284_v1 }
 0x682   :  { %v3635_v3 = vpop.eup %3634 }
 0x683   :  { %v4538_v23 = vadd.f32 %v1287_v27, %v1286_v14 }
 0x685   :  { %3636 = vtanh.f32 %v4538_v23  ;;  %v1413_v37 = vrot.slane %v4538_v23, 6 }
 0x68f   :  { %v3637_v54 = vpop.eup %3636 }
 0x690   :  { %v4541_v55 = vmul.f32 %v3637_v54, %v3635_v3  ;;  %v3440_v54 = vld [vmem:[#allocation5 + $0x4] ss:$16 sps:$4 sm:$0xff]  }
 0x692   :  { %v1291_v56 = vpack.c.bf16 %v4541_v55, %v4541_v55  ;;  %v1555_v45 = vsel %vm1549_vm4, %v4482_v40, %v4541_v55  ;;  %v3446_v40 = vld [vmem:[#allocation5 + $0x24] ss:$16 sps:$4 sm:$0xff]   ;;  %v3449_v55 = vld [vmem:[#allocation5 + $0x2c] ss:$16 sps:$4 sm:$0xff]  }
 0x694   :  { %v1293_v57 = vrot.slane %v1291_v56, 1  ;;  %v3443_v56 = vld [vmem:[#allocation5 + $0xc] ss:$16 sps:$4 sm:$0xff]  }
 0x696   :  { %1328 = vmatmul.mubr.bf16.vlgmr.msra.gmra.mrb[24].mxu0 %v1293_v57  ;;  %1369 = vmatmul.mubr.bf16.vlgmr.msra.gmra.mrb[32].mxu1 %v1293_v57  ;;  %v3438_v57 = vld [vmem:[#allocation5] ss:$16 sps:$4 sm:$0xff]  }
 0x697   :  { %1425 = vmatpush1.bf16.msra.mxu0 %v4416_v16  ;;  %1466 = vmatpush1.bf16.msra.mxu1 %v4487_v63  ;;  %v3819_v16 = vld [vmem:[#allocation3 + $0x48] ss:$16 sps:$4 sm:$0xff]  }
 0x698   :  { %1426 = vmatprep.subr.bf16.mxu0 %v4420_v26  ;;  %1467 = vmatprep.subr.bf16.mxu1 %v4491_v0  ;;  %v3820_v26 = vld [vmem:[#allocation3 + $0x6c] ss:$16 sps:$4 sm:$0xff]  }
 0x699   :  { %1456 = vmatprep.mubr.bf16.mxu0 %v3938_v4  ;;  %1497 = vmatprep.mubr.bf16.mxu1 %v3938_v4 }
 0x69b   :  { %1427 = vmatpush1.bf16.msra.mxu0 %v4426_v11  ;;  %1468 = vmatpush1.bf16.msra.mxu1 %v4497_v17  ;;  %v3822_v11 = vld [vmem:[#allocation3 + $0x8c] ss:$16 sps:$4 sm:$0xff]  }
 0x69c   :  { %1428 = vmatprep.subr.bf16.mxu0 %v4430_v28  ;;  %1469 = vmatprep.subr.bf16.mxu1 %v4501_v42  ;;  %v3823_v28 = vld [vmem:[#allocation3 + $0x88] ss:$16 sps:$4 sm:$0xff]  }
 0x69f   :  { %1429 = vmatpush1.bf16.msra.mxu0 %v4434_v47  ;;  %1470 = vmatpush1.bf16.msra.mxu1 %v3819_v16  ;;  %v3824_v47 = vld [vmem:[#allocation3 + $0xac] ss:$16 sps:$4 sm:$0xff]   ;;  %v3441_v16 = vld [vmem:[#allocation5 + $0x8] ss:$16 sps:$4 sm:$0xff]  }
 0x6a0   :  { %1430 = vmatprep.subr.bf16.mxu0 %v4438_v48  ;;  %1471 = vmatprep.subr.bf16.mxu1 %v3820_v26  ;;  %v3825_v48 = vld [vmem:[#allocation3 + $0xa8] ss:$16 sps:$4 sm:$0xff]   ;;  %v3444_v26 = vld [vmem:[#allocation5 + $0x20] ss:$16 sps:$4 sm:$0xff]  }
 0x6a3   :  { %1431 = vmatpush1.bf16.msra.mxu0 %v4442_v30  ;;  %1472 = vmatpush1.bf16.msra.mxu1 %v3821_v13  ;;  %v3826_v30 = vld [vmem:[#allocation3 + $0xcc] ss:$16 sps:$4 sm:$0xff]   ;;  %v3447_v13 = vld [vmem:[#allocation5 + $0x28] ss:$16 sps:$4 sm:$0xff]  }
 0x6a4   :  { %1432 = vmatprep.subr.bf16.mxu0 %v4446_v49  ;;  %1473 = vmatprep.subr.bf16.mxu1 %v3822_v11  ;;  %v3827_v49 = vld [vmem:[#allocation3 + $0xc8] ss:$16 sps:$4 sm:$0xff]   ;;  %v3452_v11 = vld [vmem:[#allocation5 + $0x44] ss:$16 sps:$4 sm:$0xff]  }
 0x6a7   :  { %1433 = vmatpush1.bf16.msra.mxu0 %v4450_v50  ;;  %1474 = vmatpush1.bf16.msra.mxu1 %v3823_v28  ;;  %v3828_v50 = vld [vmem:[#allocation3 + $0xec] ss:$16 sps:$4 sm:$0xff]  }
 0x6a8   :  { %1434 = vmatprep.subr.bf16.mxu0 %v4454_v32  ;;  %1475 = vmatprep.subr.bf16.mxu1 %v3824_v47  ;;  %v3829_v32 = vld [vmem:[#allocation3 + $0xe8] ss:$16 sps:$4 sm:$0xff]   ;;  %v3455_v28 = vld [vmem:[#allocation5 + $0x4c] ss:$16 sps:$4 sm:$0xff]   ;;  %v3450_v47 = vld [vmem:[#allocation5 + $0x40] ss:$16 sps:$4 sm:$0xff]  }
 0x6ab   :  { %1435 = vmatpush1.bf16.msra.mxu0 %v4458_v34  ;;  %1476 = vmatpush1.bf16.msra.mxu1 %v3825_v48  ;;  %v3453_v48 = vld [vmem:[#allocation5 + $0x48] ss:$16 sps:$4 sm:$0xff]  }
 0x6ac   :  { %1436 = vmatprep.subr.bf16.mxu0 %v4462_v36  ;;  %1477 = vmatprep.subr.bf16.mxu1 %v3826_v30  ;;  %v3458_v30 = vld [vmem:[#allocation5 + $0x64] ss:$16 sps:$4 sm:$0xff]  }
 0x6af   :  { %1437 = vmatpush1.bf16.msra.mxu0 %v4520_v51  ;;  %1478 = vmatpush1.bf16.msra.mxu1 %v3827_v49  ;;  %v3461_v49 = vld [vmem:[#allocation5 + $0x6c] ss:$16 sps:$4 sm:$0xff]  }
 0x6b0   :  { %1438 = vmatprep.subr.bf16.mxu0 %v4524_v52  ;;  %1479 = vmatprep.subr.bf16.mxu1 %v3828_v50  ;;  %v3456_v50 = vld [vmem:[#allocation5 + $0x60] ss:$16 sps:$4 sm:$0xff]  }
 0x6b3   :  { %1439 = vmatpush1.bf16.msra.mxu0 %v4528_v53  ;;  %1480 = vmatpush1.bf16.msra.mxu1 %v3829_v32  ;;  %v3459_v32 = vld [vmem:[#allocation5 + $0x68] ss:$16 sps:$4 sm:$0xff]  }
 0x6b4   :  { %1773 = vmatprep.subr.bf16.mxu0 %v3440_v54  ;;  %1816 = vmatprep.subr.bf16.mxu1 %v3443_v56 }
 0x769   :  { %v1329_v63 = vpop.f32.mrb[24].mxu0  ;;  %v1370_v34 = vpop.f32.mrb[32].mxu1 }
 0x76a   :  { %v1381_v0 = vrot.slane %v1329_v63, 4  ;;  %v1331_v17 = vpop.f32.mrb[25].mxu0  ;;  %v1372_v42 = vpop.f32.mrb[33].mxu1  ;;  %v1383_v53 = vrot.slane %v1370_v34, 4  ;;  %v3464_v63 = vld [vmem:[#allocation5 + $0x84] ss:$16 sps:$4 sm:$0xff]  }
 0x76b   :  { %v1382_v36 = vrot.slane %v1331_v17, 4  ;;  %v1333_v58 = vpop.f32.mrb[26].mxu0  ;;  %v1374_v59 = vpop.f32.mrb[34].mxu1  ;;  %v1384_v39 = vrot.slane %v1372_v42, 4  ;;  %v3467_v34 = vld [vmem:[#allocation5 + $0x8c] ss:$16 sps:$4 sm:$0xff]  }
 0x76c   :  { %v1389_v51 = vadd.f32 %v1381_v0, %v4241_v10  ;;  %v1334_v19 = vpop.f32.mrb[27].mxu0  ;;  %v1375_v41 = vpop.f32.mrb[35].mxu1  ;;  %v1391_v2 = vadd.f32 %v1383_v53, %v4251_v29  ;;  %v3462_v0 = vld [vmem:[#allocation5 + $0x80] ss:$16 sps:$4 sm:$0xff]   ;;  %v3465_v17 = vld [vmem:[#allocation5 + $0x88] ss:$16 sps:$4 sm:$0xff]  }
 0x76d   :  { %v1390_v52 = vadd.f32 %v1382_v36, %v4243_v12  ;;  %v1392_v7 = vadd.f32 %v1384_v39, %v4253_v35  ;;  %v3468_v42 = vld [vmem:[#allocation5 + $0xa0] ss:$16 sps:$4 sm:$0xff]   ;;  %v3470_v36 = vld [vmem:[#allocation5 + $0xa4] ss:$16 sps:$4 sm:$0xff]   ;;  %v3471_v58 = vld [vmem:[#allocation5 + $0xa8] ss:$16 sps:$4 sm:$0xff]  }
 0x76e   :  { %v3237_v43 = vmul.f32 -1.442695, %v1389_v51  ;;  %v3239_v46 = vmul.f32 -1.442695, %v1391_v2  ;;  %v3473_v59 = vld [vmem:[#allocation5 + $0xac] ss:$16 sps:$4 sm:$0xff]  }
 0x76f   :  { %v3238_v60 = vmul.f32 -1.442695, %v1390_v52  ;;  %v3476_v51 = vld [vmem:[#allocation5 + $0xc4] ss:$16 sps:$4 sm:$0xff]   ;;  %v3479_v19 = vld [vmem:[#allocation5 + $0xcc] ss:$16 sps:$4 sm:$0xff]  }
 0x770   :  { %3638 = vpow2.f32 %v3237_v43  ;;  %v3474_v41 = vld [vmem:[#allocation5 + $0xc0] ss:$16 sps:$4 sm:$0xff]   ;;  %v3477_v52 = vld [vmem:[#allocation5 + $0xc8] ss:$16 sps:$4 sm:$0xff]   ;;  %v3482_v43 = vld [vmem:[#allocation5 + $0xe4] ss:$16 sps:$4 sm:$0xff]  }
 0x771   :  { %3640 = vpow2.f32 %v3238_v60  ;;  %v3485_v60 = vld [vmem:[#allocation5 + $0xec] ss:$16 sps:$4 sm:$0xff]   ;;  %v3480_v53 = vld [vmem:[#allocation5 + $0xe0] ss:$16 sps:$4 sm:$0xff]   ;;  %v3483_v39 = vld [vmem:[#allocation5 + $0xe8] ss:$16 sps:$4 sm:$0xff]  }
 0x772   :  { %3642 = vtanh.f32 %v1392_v7  ;;  %v4582_v2 = vld [vmem:[#allocation7 + $0x4] ss:$16 sps:$4 sm:$0xff]   ;;  %v4584_v7 = vld [vmem:[#allocation7 + $0xc] ss:$16 sps:$4 sm:$0xff]  }
 0x773   :  { %3644 = vpow2.f32 %v3239_v46 }
 0x77a   :  { %v3639_v61 = vpop.eup %3638 }
 0x77b   :  { %v1402_v9 = vadd.f32 1.0, %v3639_v61  ;;  %v3641_v18 = vpop.eup %3640 }
 0x77c   :  { %v1403_v44 = vadd.f32 1.0, %v3641_v18  ;;  %v3643_v22 = vpop.eup %3642 }
 0x77d   :  { %3646 = vrcp.f32 %v1402_v9  ;;  %v3645_v6 = vpop.eup %3644 }
 0x77e   :  { %3648 = vrcp.f32 %v1403_v44  ;;  %v1404_v8 = vadd.f32 1.0, %v3645_v6 }
 0x780   :  { %3650 = vrcp.f32 %v1404_v8 }
 0x787   :  { %v3647_v38 = vpop.eup %3646 }
 0x788   :  { %v1416_v21 = vmul.f32 %v3647_v38, %v3643_v22  ;;  %v3649_v24 = vpop.eup %3648 }
 0x789   :  { %v1415_v25 = vmul.f32 %v3649_v24, %v1413_v37 }
 0x78a   :  { %v3651_v1 = vpop.eup %3650 }
 0x78b   :  { %v4571_v33 = vadd.f32 %v1416_v21, %v1415_v25 }
 0x78d   :  { %3652 = vtanh.f32 %v4571_v33 }
 0x797   :  { %v3653_v27 = vpop.eup %3652 }
 0x798   :  { %v1419_v31 = vmul.f32 %v3653_v27, %v3651_v1 }
 0x79a   :  { %v1420_v14 = vpack.c.bf16 %v1419_v31, %v1419_v31  ;;  %v4578_v3 = vsel %vm1551_vm5, %v1555_v45, %v1419_v31 }
 0x79c   :  { %v1422_v23 = vrot.slane %v1420_v14, 2 }
 0x79e   :  { %1457 = vmatmul.mubr.bf16.vlgmr.msra.gmra.mrb[28].mxu0 %v1422_v23  ;;  %1498 = vmatmul.mubr.bf16.vlgmr.msra.gmra.mrb[36].mxu1 %v1422_v23 }
 0x79f   :  { %1805 = vmatprep.mubr.bf16.mxu0 %v3938_v4  ;;  %1848 = vmatprep.mubr.bf16.mxu1 %v3938_v4 }
 0x7a0   :  { %1774 = vmatpush1.bf16.msra.mxu0 %v3438_v57  ;;  %1817 = vmatpush1.bf16.msra.mxu1 %v3441_v16 }
 0x7a1   :  { %1775 = vmatprep.subr.bf16.mxu0 %v3446_v40  ;;  %1818 = vmatprep.subr.bf16.mxu1 %v3449_v55  ;;  %v1542_v55 = vrot.slane %v4571_v33, 6  ;;  %v4600_v33 = vld [vmem:[#allocation7 + $0x24] ss:$16 sps:$4 sm:$0xff]  }
 0x7a4   :  { %1776 = vmatpush1.bf16.msra.mxu0 %v3444_v26  ;;  %1819 = vmatpush1.bf16.msra.mxu1 %v3447_v13 }
 0x7a5   :  { %1777 = vmatprep.subr.bf16.mxu0 %v3452_v11  ;;  %1820 = vmatprep.subr.bf16.mxu1 %v3455_v28 }
 0x7a8   :  { %1778 = vmatpush1.bf16.msra.mxu0 %v3450_v47  ;;  %1821 = vmatpush1.bf16.msra.mxu1 %v3453_v48 }
 0x7a9   :  { %1779 = vmatprep.subr.bf16.mxu0 %v3458_v30  ;;  %1822 = vmatprep.subr.bf16.mxu1 %v3461_v49  ;;  %v4595_v49 = vld [vmem:[#allocation7] ss:$16 sps:$4 sm:$0xff]  }
 0x7ac   :  { %1780 = vmatpush1.bf16.msra.mxu0 %v3456_v50  ;;  %1823 = vmatpush1.bf16.msra.mxu1 %v3459_v32  ;;  %v4597_v50 = vld [vmem:[#allocation7 + $0x8] ss:$16 sps:$4 sm:$0xff]  }
 0x7ad   :  { %1781 = vmatprep.subr.bf16.mxu0 %v3464_v63  ;;  %1824 = vmatprep.subr.bf16.mxu1 %v3467_v34  ;;  %v4602_v63 = vld [vmem:[#allocation7 + $0x2c] ss:$16 sps:$4 sm:$0xff]   ;;  %v4606_v34 = vld [vmem:[#allocation7 + $0x20] ss:$16 sps:$4 sm:$0xff]  }
 0x7b0   :  { %1782 = vmatpush1.bf16.msra.mxu0 %v3462_v0  ;;  %1825 = vmatpush1.bf16.msra.mxu1 %v3465_v17  ;;  %v4608_v0 = vld [vmem:[#allocation7 + $0x28] ss:$16 sps:$4 sm:$0xff]   ;;  %v4620_v17 = vld [vmem:[#allocation7 + $0x40] ss:$16 sps:$4 sm:$0xff]  }
 0x7b1   :  { %1783 = vmatprep.subr.bf16.mxu0 %v3470_v36  ;;  %1826 = vmatprep.subr.bf16.mxu1 %v3473_v59  ;;  %v4626_v36 = vld [vmem:[#allocation7 + $0x64] ss:$16 sps:$4 sm:$0xff]   ;;  %v4632_v59 = vld [vmem:[#allocation7 + $0x60] ss:$16 sps:$4 sm:$0xff]  }
 0x7b4   :  { %1784 = vmatpush1.bf16.msra.mxu0 %v3468_v42  ;;  %1827 = vmatpush1.bf16.msra.mxu1 %v3471_v58  ;;  %v4622_v42 = vld [vmem:[#allocation7 + $0x48] ss:$16 sps:$4 sm:$0xff]   ;;  %v4628_v58 = vld [vmem:[#allocation7 + $0x6c] ss:$16 sps:$4 sm:$0xff]  }
 0x7b5   :  { %1785 = vmatprep.subr.bf16.mxu0 %v3476_v51  ;;  %1828 = vmatprep.subr.bf16.mxu1 %v3479_v19  ;;  %v4634_v51 = vld [vmem:[#allocation7 + $0x68] ss:$16 sps:$4 sm:$0xff]   ;;  %v4638_v19 = vld [vmem:[#allocation7 + $0x84] ss:$16 sps:$4 sm:$0xff]  }
 0x7b8   :  { %1786 = vmatpush1.bf16.msra.mxu0 %v3474_v41  ;;  %1829 = vmatpush1.bf16.msra.mxu1 %v3477_v52  ;;  %v4640_v41 = vld [vmem:[#allocation7 + $0x8c] ss:$16 sps:$4 sm:$0xff]   ;;  %v4644_v52 = vld [vmem:[#allocation7 + $0x80] ss:$16 sps:$4 sm:$0xff]  }
 0x7b9   :  { %1787 = vmatprep.subr.bf16.mxu0 %v3482_v43  ;;  %1830 = vmatprep.subr.bf16.mxu1 %v3485_v60  ;;  %v4646_v43 = vld [vmem:[#allocation7 + $0x88] ss:$16 sps:$4 sm:$0xff]   ;;  %v4650_v60 = vld [vmem:[#allocation7 + $0xa4] ss:$16 sps:$4 sm:$0xff]  }
 0x7bc   :  { %1788 = vmatpush1.bf16.msra.mxu0 %v3480_v53  ;;  %1831 = vmatpush1.bf16.msra.mxu1 %v3483_v39  ;;  %v4652_v53 = vld [vmem:[#allocation7 + $0xac] ss:$16 sps:$4 sm:$0xff]   ;;  %v4656_v39 = vld [vmem:[#allocation7 + $0xa0] ss:$16 sps:$4 sm:$0xff]  }
 0x7bd   :  { %2051 = vmatprep.subr.bf16.mxu0 %v4582_v2  ;;  %2092 = vmatprep.subr.bf16.mxu1 %v4584_v7 }
 0x871   :  { %v1458_v46 = vpop.f32.mrb[28].mxu0  ;;  %v1499_v61 = vpop.f32.mrb[36].mxu1 }
 0x872   :  { %v1510_v9 = vrot.slane %v1458_v46, 2  ;;  %v1460_v18 = vpop.f32.mrb[29].mxu0  ;;  %v1501_v44 = vpop.f32.mrb[37].mxu1  ;;  %v1512_v27 = vrot.slane %v1499_v61, 2  ;;  %v4658_v46 = vld [vmem:[#allocation7 + $0xa8] ss:$16 sps:$4 sm:$0xff]  }
 0x873   :  { %v1511_v22 = vrot.slane %v1460_v18, 2  ;;  %v1462_v6 = vpop.f32.mrb[30].mxu0  ;;  %v1503_v38 = vpop.f32.mrb[38].mxu1  ;;  %v1513_v31 = vrot.slane %v1501_v44, 2  ;;  %v4662_v61 = vld [vmem:[#allocation7 + $0xc4] ss:$16 sps:$4 sm:$0xff]  }
 0x874   :  { %v1518_v37 = vadd.f32 %v1510_v9, %v4241_v10  ;;  %v1463_v21 = vpop.f32.mrb[31].mxu0  ;;  %v1504_v24 = vpop.f32.mrb[39].mxu1  ;;  %v1520_v45 = vadd.f32 %v1512_v27, %v4251_v29  ;;  %v4664_v9 = vld [vmem:[#allocation7 + $0xcc] ss:$16 sps:$4 sm:$0xff]   ;;  %v4668_v18 = vld [vmem:[#allocation7 + $0xc0] ss:$16 sps:$4 sm:$0xff]  }
 0x875   :  { %v1519_v8 = vadd.f32 %v1511_v22, %v4243_v12  ;;  %v1521_v14 = vadd.f32 %v1513_v31, %v4253_v35  ;;  %v4670_v44 = vld [vmem:[#allocation7 + $0xc8] ss:$16 sps:$4 sm:$0xff]   ;;  %v4674_v22 = vld [vmem:[#allocation7 + $0xe4] ss:$16 sps:$4 sm:$0xff]   ;;  %v4676_v6 = vld [vmem:[#allocation7 + $0xec] ss:$16 sps:$4 sm:$0xff]  }
 0x876   :  { %v3240_v25 = vmul.f32 -1.442695, %v1518_v37  ;;  %v3242_v23 = vmul.f32 -1.442695, %v1520_v45  ;;  %v4680_v38 = vld [vmem:[#allocation7 + $0xe0] ss:$16 sps:$4 sm:$0xff]  }
 0x877   :  { %v3241_v1 = vmul.f32 -1.442695, %v1519_v8  ;;  %v4682_v37 = vld [vmem:[#allocation7 + $0xe8] ss:$16 sps:$4 sm:$0xff]   ;;  %v1591_v21 = vld [vmem:[%s5056_s8] sm:$0xf] }
 0x878   :  { %3654 = vpow2.f32 %v3240_v25  ;;  %v1596_v25 = vrot.slane %v1591_v21, %v336_v62  ;;  %v5062_v45 = vsub.s32 1, %v4058_v5 }
 0x879   :  { %3656 = vpow2.f32 %v3241_v1  ;;  %v1604_v1 = vrot.slane %v1591_v21, %v344_v15 }
 0x87a   :  { %3658 = vtanh.f32 %v1521_v14  ;;  %v1600_v14 = vrot.slane %v1591_v21, %v5062_v45 }
 0x87b   :  { %3660 = vpow2.f32 %v3242_v23  ;;  %v5063_v23 = vsub.s32 3, %v4058_v5 }
 0x882   :  { %v3655_v54 = vpop.eup %3654 }
 0x883   :  { %v1531_v56 = vadd.f32 1.0, %v3655_v54  ;;  %v3657_v57 = vpop.eup %3656  ;;  %v1608_v54 = vrot.slane %v1591_v21, %v5063_v23 }
 0x884   :  { %v1532_v10 = vadd.f32 1.0, %v3657_v57  ;;  %v3659_v12 = vpop.eup %3658 }
 0x885   :  { %3662 = vrcp.f32 %v1531_v56  ;;  %v3661_v16 = vpop.eup %3660 }
 0x886   :  { %3664 = vrcp.f32 %v1532_v10  ;;  %v1533_v11 = vadd.f32 1.0, %v3661_v16 }
 0x888   :  { %3666 = vrcp.f32 %v1533_v11 }
 0x88f   :  { %v3663_v40 = vpop.eup %3662 }
 0x890   :  { %v1545_v26 = vmul.f32 %v3663_v40, %v3659_v12  ;;  %v3665_v13 = vpop.eup %3664 }
 0x891   :  { %v1544_v29 = vmul.f32 %v3665_v13, %v1542_v55 }
 0x892   :  { %v3667_v35 = vpop.eup %3666 }
 0x893   :  { %v1546_v28 = vadd.f32 %v1545_v26, %v1544_v29 }
 0x895   :  { %3668 = vtanh.f32 %v1546_v28 }
 0x89f   :  { %v3669_v47 = vpop.eup %3668 }
 0x8a0   :  { %v1548_v48 = vmul.f32 %v3669_v47, %v3667_v35 }
 0x8a2   :  { %v1557_v30 = vsel %vm1553_vm6, %v4578_v3, %v1548_v48  ;;  %v4612_v3 = vld [vmem:[#allocation7 + $0x44] ss:$16 sps:$4 sm:$0xff]  }
 0x8a3   :  { %v1558_v32 = vpack.c.bf16 %v1557_v30, %v4414_v20  ;;  %v4614_v20 = vld [vmem:[#allocation7 + $0x4c] ss:$16 sps:$4 sm:$0xff]  }
 0x8a5   :  { %1806 = vmatmul.mubr.bf16.vlgmr.msra.gmra.mrb[32].mxu0 %v1558_v32  ;;  %1849 = vmatmul.mubr.bf16.vlgmr.msra.gmra.mrb[40].mxu1 %v1558_v32 }
 0x8a6   :  { %2052 = vmatpush1.bf16.msra.mxu0 %v4595_v49  ;;  %2093 = vmatpush1.bf16.msra.mxu1 %v4597_v50 }
 0x8a7   :  { %2053 = vmatprep.subr.bf16.mxu0 %v4600_v33  ;;  %2094 = vmatprep.subr.bf16.mxu1 %v4602_v63 }
 0x8a8   :  { %2083 = vmatprep.mubr.bf16.mxu0 %v3938_v4  ;;  %2124 = vmatprep.mubr.bf16.mxu1 %v3938_v4 }
 0x8aa   :  { %2054 = vmatpush1.bf16.msra.mxu0 %v4606_v34  ;;  %2095 = vmatpush1.bf16.msra.mxu1 %v4608_v0 }
 0x8ab   :  { %2055 = vmatprep.subr.bf16.mxu0 %v4612_v3  ;;  %2096 = vmatprep.subr.bf16.mxu1 %v4614_v20 }
 0x8ae   :  { %2056 = vmatpush1.bf16.msra.mxu0 %v4620_v17  ;;  %2097 = vmatpush1.bf16.msra.mxu1 %v4622_v42 }
 0x8af   :  { %2057 = vmatprep.subr.bf16.mxu0 %v4626_v36  ;;  %2098 = vmatprep.subr.bf16.mxu1 %v4628_v58 }
 0x8b2   :  { %2058 = vmatpush1.bf16.msra.mxu0 %v4632_v59  ;;  %2099 = vmatpush1.bf16.msra.mxu1 %v4634_v51 }
 0x8b3   :  { %2059 = vmatprep.subr.bf16.mxu0 %v4638_v19  ;;  %2100 = vmatprep.subr.bf16.mxu1 %v4640_v41 }
 0x8b6   :  { %2060 = vmatpush1.bf16.msra.mxu0 %v4644_v52  ;;  %2101 = vmatpush1.bf16.msra.mxu1 %v4646_v43 }
 0x8b7   :  { %2061 = vmatprep.subr.bf16.mxu0 %v4650_v60  ;;  %2102 = vmatprep.subr.bf16.mxu1 %v4652_v53 }
 0x8ba   :  { %2062 = vmatpush1.bf16.msra.mxu0 %v4656_v39  ;;  %2103 = vmatpush1.bf16.msra.mxu1 %v4658_v46 }
 0x8bb   :  { %2063 = vmatprep.subr.bf16.mxu0 %v4662_v61  ;;  %2104 = vmatprep.subr.bf16.mxu1 %v4664_v9 }
 0x8be   :  { %2064 = vmatpush1.bf16.msra.mxu0 %v4668_v18  ;;  %2105 = vmatpush1.bf16.msra.mxu1 %v4670_v44 }
 0x8bf   :  { %2065 = vmatprep.subr.bf16.mxu0 %v4674_v22  ;;  %2106 = vmatprep.subr.bf16.mxu1 %v4676_v6 }
 0x8c2   :  { %2066 = vmatpush1.bf16.msra.mxu0 %v4680_v38  ;;  %2107 = vmatpush1.bf16.msra.mxu1 %v4682_v37 }
 0x8c3   :  { %2162 = vmatprep.subr.bf16.mxu0 %v4582_v2  ;;  %2203 = vmatprep.subr.bf16.mxu1 %v4584_v7 }
 0x8c5   :  { %2084 = vmatmul.mubr.bf16.vlgmr.msra.gmra.mrb[36].mxu0 %v3938_v4  ;;  %2125 = vmatmul.mubr.bf16.vlgmr.msra.gmra.mrb[44].mxu1 %v3938_v4 }
 0x8c6   :  { %2163 = vmatpush1.bf16.msra.mxu0 %v4595_v49  ;;  %2204 = vmatpush1.bf16.msra.mxu1 %v4597_v50 }
 0x8c7   :  { %2164 = vmatprep.subr.bf16.mxu0 %v4600_v33  ;;  %2205 = vmatprep.subr.bf16.mxu1 %v4602_v63 }
 0x8c8   :  { %2194 = vmatprep.mubr.bf16.mxu0 %v3938_v4  ;;  %2235 = vmatprep.mubr.bf16.mxu1 %v3938_v4 }
 0x8ca   :  { %2165 = vmatpush1.bf16.msra.mxu0 %v4606_v34  ;;  %2206 = vmatpush1.bf16.msra.mxu1 %v4608_v0 }
 0x8cb   :  { %2166 = vmatprep.subr.bf16.mxu0 %v4612_v3  ;;  %2207 = vmatprep.subr.bf16.mxu1 %v4614_v20 }
 0x8ce   :  { %2167 = vmatpush1.bf16.msra.mxu0 %v4620_v17  ;;  %2208 = vmatpush1.bf16.msra.mxu1 %v4622_v42 }
 0x8cf   :  { %2168 = vmatprep.subr.bf16.mxu0 %v4626_v36  ;;  %2209 = vmatprep.subr.bf16.mxu1 %v4628_v58 }
 0x8d2   :  { %2169 = vmatpush1.bf16.msra.mxu0 %v4632_v59  ;;  %2210 = vmatpush1.bf16.msra.mxu1 %v4634_v51 }
 0x8d3   :  { %2170 = vmatprep.subr.bf16.mxu0 %v4638_v19  ;;  %2211 = vmatprep.subr.bf16.mxu1 %v4640_v41 }
 0x8d6   :  { %2171 = vmatpush1.bf16.msra.mxu0 %v4644_v52  ;;  %2212 = vmatpush1.bf16.msra.mxu1 %v4646_v43 }
 0x8d7   :  { %2172 = vmatprep.subr.bf16.mxu0 %v4650_v60  ;;  %2213 = vmatprep.subr.bf16.mxu1 %v4652_v53 }
 0x8da   :  { %2173 = vmatpush1.bf16.msra.mxu0 %v4656_v39  ;;  %2214 = vmatpush1.bf16.msra.mxu1 %v4658_v46 }
 0x8db   :  { %2174 = vmatprep.subr.bf16.mxu0 %v4662_v61  ;;  %2215 = vmatprep.subr.bf16.mxu1 %v4664_v9 }
 0x8de   :  { %2175 = vmatpush1.bf16.msra.mxu0 %v4668_v18  ;;  %2216 = vmatpush1.bf16.msra.mxu1 %v4670_v44 }
 0x8df   :  { %2176 = vmatprep.subr.bf16.mxu0 %v4674_v22  ;;  %2217 = vmatprep.subr.bf16.mxu1 %v4676_v6 }
 0x8e2   :  { %2177 = vmatpush1.bf16.msra.mxu0 %v4680_v38  ;;  %2218 = vmatpush1.bf16.msra.mxu1 %v4682_v37 }
 0x8e3   :  { %2291 = vmatprep.subr.bf16.mxu0 %v4582_v2  ;;  %2332 = vmatprep.subr.bf16.mxu1 %v4584_v7 }
 0x978   :  { %v1807_v24 = vpop.f32.mrb[32].mxu0  ;;  %v1850_v8 = vpop.f32.mrb[40].mxu1 }
 0x979   :  { %v1809_v27 = vpop.f32.mrb[33].mxu0  ;;  %v1852_v31 = vpop.f32.mrb[41].mxu1  ;;  %v4745_v15 = vadd.f32 %v1807_v24, %v1596_v25  ;;  %v4751_v23 = vadd.f32 %v1850_v8, %v1604_v1 }
 0x97a   :  { %v1811_v56 = vpop.f32.mrb[34].mxu0  ;;  %v1854_v57 = vpop.f32.mrb[42].mxu1  ;;  %v4747_v26 = vadd.f32 %v1809_v27, %v1600_v14 }
 0x97b   :  { %v4737_v10 = vadd.f32 %v1811_v56, %v1596_v25  ;;  %v4739_v12 = vadd.f32 %v1854_v57, %v1604_v1  ;;  %v1813_v16 = vpop.f32.mrb[35].mxu0  ;;  %v1856_v40 = vpop.f32.mrb[43].mxu1  ;;  %v4754_v25 = vadd.f32 %v1852_v31, %v1608_v54 }
 0x97c   :  { %v4741_v62 = vadd.f32 %v1813_v16, %v1600_v14  ;;  %v4743_v55 = vadd.f32 %v1856_v40, %v1608_v54 }
 0x998   :  { %v2085_v13 = vpop.f32.mrb[36].mxu0  ;;  %v2126_v11 = vpop.f32.mrb[44].mxu1 }
 0x999   :  { %v2133_v5 = vadd.f32 %v2085_v13, %v4745_v15  ;;  %v2087_v29 = vpop.f32.mrb[37].mxu0  ;;  %v2128_v28 = vpop.f32.mrb[45].mxu1  ;;  %v2135_v24 = vadd.f32 %v2126_v11, %v4751_v23 }
 0x99a   :  { %v2134_v35 = vadd.f32 %v2087_v29, %v4747_v26  ;;  %v2089_v47 = vpop.f32.mrb[38].mxu0  ;;  %v2130_v48 = vpop.f32.mrb[46].mxu1  ;;  %v2136_v27 = vadd.f32 %v2128_v28, %v4754_v25 }
 0x99b   :  { %v3307_v30 = vmul.f32 -1.442695, %v2133_v5  ;;  %v2090_v32 = vpop.f32.mrb[39].mxu0  ;;  %v2131_v21 = vpop.f32.mrb[47].mxu1  ;;  %v3309_v14 = vmul.f32 -1.442695, %v2135_v24 }
 0x99c   :  { %v3308_v45 = vmul.f32 -1.442695, %v2134_v35 }
 0x99d   :  { %3670 = vpow2.f32 %v3307_v30 }
 0x99e   :  { %3672 = vpow2.f32 %v3308_v45 }
 0x99f   :  { %3674 = vtanh.f32 %v2136_v27 }
 0x9a0   :  { %3676 = vpow2.f32 %v3309_v14 }
 0x9a7   :  { %v3671_v56 = vpop.eup %3670 }
 0x9a8   :  { %v2146_v57 = vadd.f32 1.0, %v3671_v56  ;;  %v3673_v16 = vpop.eup %3672 }
 0x9a9   :  { %v2147_v40 = vadd.f32 1.0, %v3673_v16  ;;  %v3675_v13 = vpop.eup %3674 }
 0x9aa   :  { %3678 = vrcp.f32 %v2146_v57  ;;  %v3677_v5 = vpop.eup %3676 }
 0x9ab   :  { %3680 = vrcp.f32 %v2147_v40  ;;  %v2148_v35 = vadd.f32 1.0, %v3677_v5 }
 0x9ad   :  { %3682 = vrcp.f32 %v2148_v35 }
 0x9b4   :  { %v3679_v8 = vpop.eup %3678 }
 0x9b5   :  { %v2157_v1 = vmul.f32 %v3679_v8, %v3675_v13  ;;  %v3681_v29 = vpop.eup %3680 }
 0x9b6   :  { %v2156_v11 = vmul.f32 0.0, %v3681_v29 }
 0x9b7   :  { %v3683_v54 = vpop.eup %3682 }
 0x9b8   :  { %v4757_v31 = vadd.f32 %v2157_v1, %v2156_v11 }
 0x9ba   :  { %3684 = vtanh.f32 %v4757_v31 }
 0x9c4   :  { %v3685_v28 = vpop.eup %3684 }
 0x9c5   :  { %v4760_v47 = vmul.f32 %v3685_v28, %v3683_v54 }
 0x9c7   :  { %v2161_v48 = vpack.c.bf16 %v4760_v47, %v4760_v47 }
 0x9c9   :  { %2195 = vmatmul.mubr.bf16.vlgmr.msra.gmra.mrb[40].mxu0 %v2161_v48  ;;  %2236 = vmatmul.mubr.bf16.vlgmr.msra.gmra.mrb[48].mxu1 %v2161_v48 }
 0x9ca   :  { %2292 = vmatpush1.bf16.msra.mxu0 %v4595_v49  ;;  %2333 = vmatpush1.bf16.msra.mxu1 %v4597_v50 }
 0x9cb   :  { %2293 = vmatprep.subr.bf16.mxu0 %v4600_v33  ;;  %2334 = vmatprep.subr.bf16.mxu1 %v4602_v63 }
 0x9cc   :  { %2323 = vmatprep.mubr.bf16.mxu0 %v3938_v4  ;;  %2364 = vmatprep.mubr.bf16.mxu1 %v3938_v4 }
 0x9ce   :  { %2294 = vmatpush1.bf16.msra.mxu0 %v4606_v34  ;;  %2335 = vmatpush1.bf16.msra.mxu1 %v4608_v0 }
 0x9cf   :  { %2295 = vmatprep.subr.bf16.mxu0 %v4612_v3  ;;  %2336 = vmatprep.subr.bf16.mxu1 %v4614_v20 }
 0x9d2   :  { %2296 = vmatpush1.bf16.msra.mxu0 %v4620_v17  ;;  %2337 = vmatpush1.bf16.msra.mxu1 %v4622_v42 }
 0x9d3   :  { %2297 = vmatprep.subr.bf16.mxu0 %v4626_v36  ;;  %2338 = vmatprep.subr.bf16.mxu1 %v4628_v58 }
 0x9d6   :  { %2298 = vmatpush1.bf16.msra.mxu0 %v4632_v59  ;;  %2339 = vmatpush1.bf16.msra.mxu1 %v4634_v51 }
 0x9d7   :  { %2299 = vmatprep.subr.bf16.mxu0 %v4638_v19  ;;  %2340 = vmatprep.subr.bf16.mxu1 %v4640_v41 }
 0x9da   :  { %2300 = vmatpush1.bf16.msra.mxu0 %v4644_v52  ;;  %2341 = vmatpush1.bf16.msra.mxu1 %v4646_v43 }
 0x9db   :  { %2301 = vmatprep.subr.bf16.mxu0 %v4650_v60  ;;  %2342 = vmatprep.subr.bf16.mxu1 %v4652_v53 }
 0x9de   :  { %2302 = vmatpush1.bf16.msra.mxu0 %v4656_v39  ;;  %2343 = vmatpush1.bf16.msra.mxu1 %v4658_v46 }
 0x9df   :  { %2303 = vmatprep.subr.bf16.mxu0 %v4662_v61  ;;  %2344 = vmatprep.subr.bf16.mxu1 %v4664_v9 }
 0x9e2   :  { %2304 = vmatpush1.bf16.msra.mxu0 %v4668_v18  ;;  %2345 = vmatpush1.bf16.msra.mxu1 %v4670_v44 }
 0x9e3   :  { %2305 = vmatprep.subr.bf16.mxu0 %v4674_v22  ;;  %2346 = vmatprep.subr.bf16.mxu1 %v4676_v6 }
 0x9e6   :  { %2306 = vmatpush1.bf16.msra.mxu0 %v4680_v38  ;;  %2347 = vmatpush1.bf16.msra.mxu1 %v4682_v37 }
 0x9e7   :  { %2420 = vmatprep.subr.bf16.mxu0 %v4582_v2  ;;  %2461 = vmatprep.subr.bf16.mxu1 %v4584_v7 }
 0xa9c   :  { %v2196_v30 = vpop.f32.mrb[40].mxu0  ;;  %v2237_v32 = vpop.f32.mrb[48].mxu1 }
 0xa9d   :  { %v2248_v21 = vrot.slane %v2196_v30, 6  ;;  %v2198_v45 = vpop.f32.mrb[41].mxu0  ;;  %v2239_v24 = vpop.f32.mrb[49].mxu1  ;;  %v2250_v1 = vrot.slane %v2237_v32, 6  ;;  %v2280_v32 = vrot.slane %v4757_v31, 6 }
 0xa9e   :  { %v2249_v27 = vrot.slane %v2198_v45, 6  ;;  %v2200_v14 = vpop.f32.mrb[42].mxu0  ;;  %v2241_v56 = vpop.f32.mrb[50].mxu1  ;;  %v2251_v29 = vrot.slane %v2239_v24, 6 }
 0xa9f   :  { %v2256_v57 = vadd.f32 %v2248_v21, %v4745_v15  ;;  %v2201_v16 = vpop.f32.mrb[43].mxu0  ;;  %v2242_v40 = vpop.f32.mrb[51].mxu1  ;;  %v2258_v35 = vadd.f32 %v2250_v1, %v4751_v23 }
 0xaa0   :  { %v2257_v13 = vadd.f32 %v2249_v27, %v4747_v26  ;;  %v2259_v11 = vadd.f32 %v2251_v29, %v4754_v25 }
 0xaa1   :  { %v3310_v5 = vmul.f32 -1.442695, %v2256_v57  ;;  %v3312_v54 = vmul.f32 -1.442695, %v2258_v35 }
 0xaa2   :  { %v3311_v8 = vmul.f32 -1.442695, %v2257_v13 }
 0xaa3   :  { %3686 = vpow2.f32 %v3310_v5 }
 0xaa4   :  { %3688 = vpow2.f32 %v3311_v8 }
 0xaa5   :  { %3690 = vtanh.f32 %v2259_v11 }
 0xaa6   :  { %3692 = vpow2.f32 %v3312_v54 }
 0xaad   :  { %v3687_v28 = vpop.eup %3686 }
 0xaae   :  { %v2269_v48 = vadd.f32 1.0, %v3687_v28  ;;  %v3689_v30 = vpop.eup %3688 }
 0xaaf   :  { %v2270_v21 = vadd.f32 1.0, %v3689_v30  ;;  %v3691_v45 = vpop.eup %3690 }
 0xab0   :  { %3694 = vrcp.f32 %v2269_v48  ;;  %v3693_v27 = vpop.eup %3692 }
 0xab1   :  { %3696 = vrcp.f32 %v2270_v21  ;;  %v2271_v57 = vadd.f32 1.0, %v3693_v27 }
 0xab3   :  { %3698 = vrcp.f32 %v2271_v57 }
 0xaba   :  { %v3695_v14 = vpop.eup %3694 }
 0xabb   :  { %v2283_v56 = vmul.f32 %v3695_v14, %v3691_v45  ;;  %v3697_v24 = vpop.eup %3696 }
 0xabc   :  { %v2282_v16 = vmul.f32 %v3697_v24, %v2280_v32 }
 0xabd   :  { %v3699_v13 = vpop.eup %3698 }
 0xabe   :  { %v4803_v40 = vadd.f32 %v2283_v56, %v2282_v16 }
 0xac0   :  { %3700 = vtanh.f32 %v4803_v40 }
 0xaca   :  { %v3701_v5 = vpop.eup %3700 }
 0xacb   :  { %v4806_v8 = vmul.f32 %v3701_v5, %v3699_v13 }
 0xacd   :  { %v2287_v1 = vpack.c.bf16 %v4806_v8, %v4806_v8 }
 0xacf   :  { %v2289_v29 = vrot.slane %v2287_v1, 1 }
 0xad1   :  { %2324 = vmatmul.mubr.bf16.vlgmr.msra.gmra.mrb[44].mxu0 %v2289_v29  ;;  %2365 = vmatmul.mubr.bf16.vlgmr.msra.gmra.mrb[52].mxu1 %v2289_v29 }
 0xad2   :  { %2421 = vmatpush1.bf16.msra.mxu0 %v4595_v49  ;;  %2462 = vmatpush1.bf16.msra.mxu1 %v4597_v50 }
 0xad3   :  { %2422 = vmatprep.subr.bf16.mxu0 %v4600_v33  ;;  %2463 = vmatprep.subr.bf16.mxu1 %v4602_v63 }
 0xad4   :  { %2452 = vmatprep.mubr.bf16.mxu0 %v3938_v4  ;;  %2493 = vmatprep.mubr.bf16.mxu1 %v3938_v4 }
 0xad6   :  { %2423 = vmatpush1.bf16.msra.mxu0 %v4606_v34  ;;  %2464 = vmatpush1.bf16.msra.mxu1 %v4608_v0 }
 0xad7   :  { %2424 = vmatprep.subr.bf16.mxu0 %v4612_v3  ;;  %2465 = vmatprep.subr.bf16.mxu1 %v4614_v20 }
 0xada   :  { %2425 = vmatpush1.bf16.msra.mxu0 %v4620_v17  ;;  %2466 = vmatpush1.bf16.msra.mxu1 %v4622_v42 }
 0xadb   :  { %2426 = vmatprep.subr.bf16.mxu0 %v4626_v36  ;;  %2467 = vmatprep.subr.bf16.mxu1 %v4628_v58 }
 0xade   :  { %2427 = vmatpush1.bf16.msra.mxu0 %v4632_v59  ;;  %2468 = vmatpush1.bf16.msra.mxu1 %v4634_v51 }
 0xadf   :  { %2428 = vmatprep.subr.bf16.mxu0 %v4638_v19  ;;  %2469 = vmatprep.subr.bf16.mxu1 %v4640_v41 }
 0xae2   :  { %2429 = vmatpush1.bf16.msra.mxu0 %v4644_v52  ;;  %2470 = vmatpush1.bf16.msra.mxu1 %v4646_v43 }
 0xae3   :  { %2430 = vmatprep.subr.bf16.mxu0 %v4650_v60  ;;  %2471 = vmatprep.subr.bf16.mxu1 %v4652_v53 }
 0xae6   :  { %2431 = vmatpush1.bf16.msra.mxu0 %v4656_v39  ;;  %2472 = vmatpush1.bf16.msra.mxu1 %v4658_v46 }
 0xae7   :  { %2432 = vmatprep.subr.bf16.mxu0 %v4662_v61  ;;  %2473 = vmatprep.subr.bf16.mxu1 %v4664_v9 }
 0xaea   :  { %2433 = vmatpush1.bf16.msra.mxu0 %v4668_v18  ;;  %2474 = vmatpush1.bf16.msra.mxu1 %v4670_v44 }
 0xaeb   :  { %2434 = vmatprep.subr.bf16.mxu0 %v4674_v22  ;;  %2475 = vmatprep.subr.bf16.mxu1 %v4676_v6 }
 0xaee   :  { %2435 = vmatpush1.bf16.msra.mxu0 %v4680_v38  ;;  %2476 = vmatpush1.bf16.msra.mxu1 %v4682_v37 }
 0xaef   :  { %2549 = vmatprep.subr.bf16.mxu0 %v4582_v2  ;;  %2590 = vmatprep.subr.bf16.mxu1 %v4584_v7 }
 0xba4   :  { %v2325_v31 = vpop.f32.mrb[44].mxu0  ;;  %v2366_v35 = vpop.f32.mrb[52].mxu1 }
 0xba5   :  { %v2377_v11 = vrot.slane %v2325_v31, 4  ;;  %v2327_v54 = vpop.f32.mrb[45].mxu0  ;;  %v2368_v28 = vpop.f32.mrb[53].mxu1  ;;  %v2379_v57 = vrot.slane %v2366_v35, 4  ;;  %v2409_v35 = vrot.slane %v4803_v40, 6 }
 0xba6   :  { %v2378_v48 = vrot.slane %v2327_v54, 4  ;;  %v2329_v30 = vpop.f32.mrb[46].mxu0  ;;  %v2370_v21 = vpop.f32.mrb[54].mxu1  ;;  %v2380_v16 = vrot.slane %v2368_v28, 4 }
 0xba7   :  { %v2385_v45 = vadd.f32 %v2377_v11, %v4745_v15  ;;  %v2330_v27 = vpop.f32.mrb[47].mxu0  ;;  %v2371_v14 = vpop.f32.mrb[55].mxu1  ;;  %v2387_v13 = vadd.f32 %v2379_v57, %v4751_v23 }
 0xba8   :  { %v2386_v32 = vadd.f32 %v2378_v48, %v4747_v26  ;;  %v2388_v5 = vadd.f32 %v2380_v16, %v4754_v25  ;;  %v3046_v16 = vsel %vm1549_vm4, %v4760_v47, %v4806_v8 }
 0xba9   :  { %v3313_v56 = vmul.f32 -1.442695, %v2385_v45  ;;  %v3315_v1 = vmul.f32 -1.442695, %v2387_v13 }
 0xbaa   :  { %v3314_v24 = vmul.f32 -1.442695, %v2386_v32 }
 0xbab   :  { %3702 = vpow2.f32 %v3313_v56 }
 0xbac   :  { %3704 = vpow2.f32 %v3314_v24 }
 0xbad   :  { %3706 = vtanh.f32 %v2388_v5 }
 0xbae   :  { %3708 = vpow2.f32 %v3315_v1 }
 0xbb5   :  { %v3703_v29 = vpop.eup %3702 }
 0xbb6   :  { %v2398_v31 = vadd.f32 1.0, %v3703_v29  ;;  %v3705_v54 = vpop.eup %3704 }
 0xbb7   :  { %v2399_v11 = vadd.f32 1.0, %v3705_v54  ;;  %v3707_v48 = vpop.eup %3706 }
 0xbb8   :  { %3710 = vrcp.f32 %v2398_v31  ;;  %v3709_v30 = vpop.eup %3708 }
 0xbb9   :  { %3712 = vrcp.f32 %v2399_v11  ;;  %v2400_v27 = vadd.f32 1.0, %v3709_v30 }
 0xbbb   :  { %3714 = vrcp.f32 %v2400_v27 }
 0xbc2   :  { %v3711_v21 = vpop.eup %3710 }
 0xbc3   :  { %v2412_v45 = vmul.f32 %v3711_v21, %v3707_v48  ;;  %v3713_v28 = vpop.eup %3712 }
 0xbc4   :  { %v2411_v14 = vmul.f32 %v3713_v28, %v2409_v35 }
 0xbc5   :  { %v3715_v56 = vpop.eup %3714 }
 0xbc6   :  { %v4849_v32 = vadd.f32 %v2412_v45, %v2411_v14 }
 0xbc8   :  { %3716 = vtanh.f32 %v4849_v32 }
 0xbd2   :  { %v3717_v24 = vpop.eup %3716 }
 0xbd3   :  { %v2415_v57 = vmul.f32 %v3717_v24, %v3715_v56 }
 0xbd5   :  { %v2416_v13 = vpack.c.bf16 %v2415_v57, %v2415_v57  ;;  %v4856_v5 = vsel %vm1551_vm5, %v3046_v16, %v2415_v57 }
 0xbd7   :  { %v2418_v40 = vrot.slane %v2416_v13, 2 }
 0xbd9   :  { %2453 = vmatmul.mubr.bf16.vlgmr.msra.gmra.mrb[48].mxu0 %v2418_v40  ;;  %2494 = vmatmul.mubr.bf16.vlgmr.msra.gmra.mrb[56].mxu1 %v2418_v40 }
 0xbda   :  { %2550 = vmatpush1.bf16.msra.mxu0 %v4595_v49  ;;  %2591 = vmatpush1.bf16.msra.mxu1 %v4597_v50 }
 0xbdb   :  { %2551 = vmatprep.subr.bf16.mxu0 %v4600_v33  ;;  %2592 = vmatprep.subr.bf16.mxu1 %v4602_v63 }
 0xbdc   :  { %2581 = vmatprep.mubr.bf16.mxu0 %v3938_v4  ;;  %2622 = vmatprep.mubr.bf16.mxu1 %v3938_v4 }
 0xbde   :  { %2552 = vmatpush1.bf16.msra.mxu0 %v4606_v34  ;;  %2593 = vmatpush1.bf16.msra.mxu1 %v4608_v0 }
 0xbdf   :  { %2553 = vmatprep.subr.bf16.mxu0 %v4612_v3  ;;  %2594 = vmatprep.subr.bf16.mxu1 %v4614_v20 }
 0xbe2   :  { %2554 = vmatpush1.bf16.msra.mxu0 %v4620_v17  ;;  %2595 = vmatpush1.bf16.msra.mxu1 %v4622_v42 }
 0xbe3   :  { %2555 = vmatprep.subr.bf16.mxu0 %v4626_v36  ;;  %2596 = vmatprep.subr.bf16.mxu1 %v4628_v58 }
 0xbe6   :  { %2556 = vmatpush1.bf16.msra.mxu0 %v4632_v59  ;;  %2597 = vmatpush1.bf16.msra.mxu1 %v4634_v51 }
 0xbe7   :  { %2557 = vmatprep.subr.bf16.mxu0 %v4638_v19  ;;  %2598 = vmatprep.subr.bf16.mxu1 %v4640_v41 }
 0xbea   :  { %2558 = vmatpush1.bf16.msra.mxu0 %v4644_v52  ;;  %2599 = vmatpush1.bf16.msra.mxu1 %v4646_v43 }
 0xbeb   :  { %2559 = vmatprep.subr.bf16.mxu0 %v4650_v60  ;;  %2600 = vmatprep.subr.bf16.mxu1 %v4652_v53 }
 0xbee   :  { %2560 = vmatpush1.bf16.msra.mxu0 %v4656_v39  ;;  %2601 = vmatpush1.bf16.msra.mxu1 %v4658_v46 }
 0xbef   :  { %2561 = vmatprep.subr.bf16.mxu0 %v4662_v61  ;;  %2602 = vmatprep.subr.bf16.mxu1 %v4664_v9 }
 0xbf2   :  { %2562 = vmatpush1.bf16.msra.mxu0 %v4668_v18  ;;  %2603 = vmatpush1.bf16.msra.mxu1 %v4670_v44 }
 0xbf3   :  { %2563 = vmatprep.subr.bf16.mxu0 %v4674_v22  ;;  %2604 = vmatprep.subr.bf16.mxu1 %v4676_v6 }
 0xbf6   :  { %2564 = vmatpush1.bf16.msra.mxu0 %v4680_v38  ;;  %2605 = vmatpush1.bf16.msra.mxu1 %v4682_v37 }
 0xbf7   :  { %2663 = vmatprep.subr.bf16.mxu0 %v4582_v2  ;;  %2704 = vmatprep.subr.bf16.mxu1 %v4584_v7 }
 0xcac   :  { %v2454_v47 = vpop.f32.mrb[48].mxu0  ;;  %v2495_v8 = vpop.f32.mrb[56].mxu1 }
 0xcad   :  { %v2506_v1 = vrot.slane %v2454_v47, 2  ;;  %v2456_v29 = vpop.f32.mrb[49].mxu0  ;;  %v2497_v31 = vpop.f32.mrb[57].mxu1  ;;  %v2508_v14 = vrot.slane %v2495_v8, 2  ;;  %v2538_v8 = vrot.slane %v4849_v32, 6 }
 0xcae   :  { %v2507_v54 = vrot.slane %v2456_v29, 2  ;;  %v2458_v11 = vpop.f32.mrb[50].mxu0  ;;  %v2499_v48 = vpop.f32.mrb[58].mxu1  ;;  %v2509_v56 = vrot.slane %v2497_v31, 2 }
 0xcaf   :  { %v2514_v30 = vadd.f32 %v2506_v1, %v4745_v15  ;;  %v2459_v21 = vpop.f32.mrb[51].mxu0  ;;  %v2500_v35 = vpop.f32.mrb[59].mxu1  ;;  %v2516_v24 = vadd.f32 %v2508_v14, %v4751_v23 }
 0xcb0   :  { %v2515_v45 = vadd.f32 %v2507_v54, %v4747_v26  ;;  %v2517_v57 = vadd.f32 %v2509_v56, %v4754_v25 }
 0xcb1   :  { %v3316_v28 = vmul.f32 -1.442695, %v2514_v30  ;;  %v3318_v16 = vmul.f32 -1.442695, %v2516_v24 }
 0xcb2   :  { %v3317_v27 = vmul.f32 -1.442695, %v2515_v45 }
 0xcb3   :  { %3718 = vpow2.f32 %v3316_v28 }
 0xcb4   :  { %3720 = vpow2.f32 %v3317_v27 }
 0xcb5   :  { %3722 = vtanh.f32 %v2517_v57 }
 0xcb6   :  { %3724 = vpow2.f32 %v3318_v16 }
 0xcbd   :  { %v3719_v13 = vpop.eup %3718 }
 0xcbe   :  { %v2527_v40 = vadd.f32 1.0, %v3719_v13  ;;  %v3721_v47 = vpop.eup %3720 }
 0xcbf   :  { %v2528_v15 = vadd.f32 1.0, %v3721_v47  ;;  %v3723_v26 = vpop.eup %3722 }
 0xcc0   :  { %3726 = vrcp.f32 %v2527_v40  ;;  %v3725_v1 = vpop.eup %3724 }
 0xcc1   :  { %3728 = vrcp.f32 %v2528_v15  ;;  %v2529_v11 = vadd.f32 1.0, %v3725_v1 }
 0xcc3   :  { %3730 = vrcp.f32 %v2529_v11 }
 0xcca   :  { %v3727_v29 = vpop.eup %3726 }
 0xccb   :  { %v2541_v54 = vmul.f32 %v3727_v29, %v3723_v26  ;;  %v3729_v31 = vpop.eup %3728 }
 0xccc   :  { %v2540_v23 = vmul.f32 %v3729_v31, %v2538_v8 }
 0xccd   :  { %v3731_v25 = vpop.eup %3730 }
 0xcce   :  { %v4897_v48 = vadd.f32 %v2541_v54, %v2540_v23 }
 0xcd0   :  { %3732 = vtanh.f32 %v4897_v48 }
 0xcda   :  { %v3733_v30 = vpop.eup %3732 }
 0xcdb   :  { %v2544_v21 = vmul.f32 %v3733_v30, %v3731_v25  ;;  %v2655_v25 = vrot.slane %v4897_v48, 6 }
 0xcdd   :  { %v2545_v35 = vpack.c.bf16 %v2544_v21, %v2544_v21  ;;  %v4902_v45 = vsel %vm1553_vm6, %v4856_v5, %v2544_v21 }
 0xcdf   :  { %v2547_v28 = vrot.slane %v2545_v35, 3 }
 0xce1   :  { %2582 = vmatmul.mubr.bf16.vlgmr.msra.gmra.mrb[52].mxu0 %v2547_v28  ;;  %2623 = vmatmul.mubr.bf16.vlgmr.msra.gmra.mrb[60].mxu1 %v2547_v28 }
 0xce2   :  { %2664 = vmatpush1.bf16.msra.mxu0 %v4595_v49  ;;  %2705 = vmatpush1.bf16.msra.mxu1 %v4597_v50 }
 0xce3   :  { %2665 = vmatprep.subr.bf16.mxu0 %v4600_v33  ;;  %2706 = vmatprep.subr.bf16.mxu1 %v4602_v63 }
 0xce4   :  { %2695 = vmatprep.mubr.bf16.mxu0 %v3938_v4  ;;  %2736 = vmatprep.mubr.bf16.mxu1 %v3938_v4 }
 0xce6   :  { %2666 = vmatpush1.bf16.msra.mxu0 %v4606_v34  ;;  %2707 = vmatpush1.bf16.msra.mxu1 %v4608_v0 }
 0xce7   :  { %2667 = vmatprep.subr.bf16.mxu0 %v4612_v3  ;;  %2708 = vmatprep.subr.bf16.mxu1 %v4614_v20 }
 0xcea   :  { %2668 = vmatpush1.bf16.msra.mxu0 %v4620_v17  ;;  %2709 = vmatpush1.bf16.msra.mxu1 %v4622_v42 }
 0xceb   :  { %2669 = vmatprep.subr.bf16.mxu0 %v4626_v36  ;;  %2710 = vmatprep.subr.bf16.mxu1 %v4628_v58 }
 0xcee   :  { %2670 = vmatpush1.bf16.msra.mxu0 %v4632_v59  ;;  %2711 = vmatpush1.bf16.msra.mxu1 %v4634_v51 }
 0xcef   :  { %2671 = vmatprep.subr.bf16.mxu0 %v4638_v19  ;;  %2712 = vmatprep.subr.bf16.mxu1 %v4640_v41 }
 0xcf2   :  { %2672 = vmatpush1.bf16.msra.mxu0 %v4644_v52  ;;  %2713 = vmatpush1.bf16.msra.mxu1 %v4646_v43 }
 0xcf3   :  { %2673 = vmatprep.subr.bf16.mxu0 %v4650_v60  ;;  %2714 = vmatprep.subr.bf16.mxu1 %v4652_v53 }
 0xcf6   :  { %2674 = vmatpush1.bf16.msra.mxu0 %v4656_v39  ;;  %2715 = vmatpush1.bf16.msra.mxu1 %v4658_v46 }
 0xcf7   :  { %2675 = vmatprep.subr.bf16.mxu0 %v4662_v61  ;;  %2716 = vmatprep.subr.bf16.mxu1 %v4664_v9 }
 0xcfa   :  { %2676 = vmatpush1.bf16.msra.mxu0 %v4668_v18  ;;  %2717 = vmatpush1.bf16.msra.mxu1 %v4670_v44 }
 0xcfb   :  { %2677 = vmatprep.subr.bf16.mxu0 %v4674_v22  ;;  %2718 = vmatprep.subr.bf16.mxu1 %v4676_v6 }
 0xcfe   :  { %2678 = vmatpush1.bf16.msra.mxu0 %v4680_v38  ;;  %2719 = vmatpush1.bf16.msra.mxu1 %v4682_v37 }
 0xcff   :  { %2792 = vmatprep.subr.bf16.mxu0 %v4582_v2  ;;  %2833 = vmatprep.subr.bf16.mxu1 %v4584_v7 }
 0xdb4   :  { %v2583_v32 = vpop.f32.mrb[52].mxu0  ;;  %v2624_v5 = vpop.f32.mrb[60].mxu1 }
 0xdb5   :  { %v2631_v27 = vadd.f32 %v2583_v32, %v4737_v10  ;;  %v2585_v14 = vpop.f32.mrb[53].mxu0  ;;  %v2626_v56 = vpop.f32.mrb[61].mxu1  ;;  %v2633_v2 = vadd.f32 %v2624_v5, %v4739_v12 }
 0xdb6   :  { %v2632_v24 = vadd.f32 %v2585_v14, %v4741_v62  ;;  %v2587_v57 = vpop.f32.mrb[54].mxu0  ;;  %v2628_v16 = vpop.f32.mrb[62].mxu1  ;;  %v2634_v7 = vadd.f32 %v2626_v56, %v4743_v55 }
 0xdb7   :  { %v3319_v13 = vmul.f32 -1.442695, %v2631_v27  ;;  %v2588_v40 = vpop.f32.mrb[55].mxu0  ;;  %v2629_v47 = vpop.f32.mrb[63].mxu1  ;;  %v3321_v26 = vmul.f32 -1.442695, %v2633_v2 }
 0xdb8   :  { %v3320_v15 = vmul.f32 -1.442695, %v2632_v24 }
 0xdb9   :  { %3734 = vpow2.f32 %v3319_v13 }
 0xdba   :  { %3736 = vpow2.f32 %v3320_v15 }
 0xdbb   :  { %3738 = vtanh.f32 %v2634_v7  ;;  %v3832_v7 = vld [vmem:[#allocation7] ss:$16 sps:$4 sm:$0xff]  }
 0xdbc   :  { %3740 = vpow2.f32 %v3321_v26  ;;  %v3833_v26 = vld [vmem:[#allocation7 + $0x8] ss:$16 sps:$4 sm:$0xff]  }
 0xdc3   :  { %v3735_v1 = vpop.eup %3734 }
 0xdc4   :  { %v2644_v29 = vadd.f32 1.0, %v3735_v1  ;;  %v3737_v8 = vpop.eup %3736  ;;  %v3834_v1 = vld [vmem:[#allocation7 + $0x24] ss:$16 sps:$4 sm:$0xff]  }
 0xdc5   :  { %v2645_v54 = vadd.f32 1.0, %v3737_v8  ;;  %v3739_v31 = vpop.eup %3738  ;;  %v3836_v8 = vld [vmem:[#allocation7 + $0x20] ss:$16 sps:$4 sm:$0xff]  }
 0xdc6   :  { %3742 = vrcp.f32 %v2644_v29  ;;  %v3741_v11 = vpop.eup %3740  ;;  %v3835_v29 = vld [vmem:[#allocation7 + $0x2c] ss:$16 sps:$4 sm:$0xff]  }
 0xdc7   :  { %3744 = vrcp.f32 %v2645_v54  ;;  %v2646_v35 = vadd.f32 1.0, %v3741_v11  ;;  %v3837_v54 = vld [vmem:[#allocation7 + $0x28] ss:$16 sps:$4 sm:$0xff]   ;;  %v3839_v11 = vld [vmem:[#allocation7 + $0x4c] ss:$16 sps:$4 sm:$0xff]  }
 0xdc9   :  { %3746 = vrcp.f32 %v2646_v35  ;;  %v3844_v35 = vld [vmem:[#allocation7 + $0x60] ss:$16 sps:$4 sm:$0xff]  }
 0xdd0   :  { %v3743_v23 = vpop.eup %3742 }
 0xdd1   :  { %v2658_v30 = vmul.f32 %v3743_v23, %v3739_v31  ;;  %v3745_v21 = vpop.eup %3744  ;;  %v3838_v31 = vld [vmem:[#allocation7 + $0x44] ss:$16 sps:$4 sm:$0xff]   ;;  %v3840_v23 = vld [vmem:[#allocation7 + $0x40] ss:$16 sps:$4 sm:$0xff]  }
 0xdd2   :  { %v2657_v28 = vmul.f32 %v3745_v21, %v2655_v25  ;;  %v3841_v25 = vld [vmem:[#allocation7 + $0x48] ss:$16 sps:$4 sm:$0xff]   ;;  %v3843_v21 = vld [vmem:[#allocation7 + $0x6c] ss:$16 sps:$4 sm:$0xff]  }
 0xdd3   :  { %v3747_v5 = vpop.eup %3746 }
 0xdd4   :  { %v4943_v32 = vadd.f32 %v2658_v30, %v2657_v28  ;;  %v3842_v30 = vld [vmem:[#allocation7 + $0x64] ss:$16 sps:$4 sm:$0xff]   ;;  %v3845_v28 = vld [vmem:[#allocation7 + $0x68] ss:$16 sps:$4 sm:$0xff]  }
 0xdd6   :  { %3748 = vtanh.f32 %v4943_v32 }
 0xde0   :  { %v3749_v27 = vpop.eup %3748 }
 0xde1   :  { %v4946_v14 = vmul.f32 %v3749_v27, %v3747_v5  ;;  %v3848_v5 = vld [vmem:[#allocation7 + $0x80] ss:$16 sps:$4 sm:$0xff]   ;;  %v3849_v27 = vld [vmem:[#allocation7 + $0x88] ss:$16 sps:$4 sm:$0xff]  }
 0xde3   :  { %v2662_v56 = vpack.c.bf16 %v4946_v14, %v4946_v14 }
 0xde5   :  { %2696 = vmatmul.mubr.bf16.vlgmr.msra.gmra.mrb[56].mxu0 %v2662_v56  ;;  %2737 = vmatmul.mubr.bf16.vlgmr.msra.gmra.mrb[64].mxu1 %v2662_v56  ;;  %v3850_v56 = vld [vmem:[#allocation7 + $0xa4] ss:$16 sps:$4 sm:$0xff]  }
 0xde6   :  { %2793 = vmatpush1.bf16.msra.mxu0 %v4595_v49  ;;  %2834 = vmatpush1.bf16.msra.mxu1 %v4597_v50  ;;  %v3830_v49 = vld [vmem:[#allocation7 + $0x4] ss:$16 sps:$4 sm:$0xff]   ;;  %v3831_v50 = vld [vmem:[#allocation7 + $0xc] ss:$16 sps:$4 sm:$0xff]  }
 0xde7   :  { %2794 = vmatprep.subr.bf16.mxu0 %v4600_v33  ;;  %2835 = vmatprep.subr.bf16.mxu1 %v4602_v63 }
 0xde8   :  { %2824 = vmatprep.mubr.bf16.mxu0 %v3938_v4  ;;  %2865 = vmatprep.mubr.bf16.mxu1 %v3938_v4 }
 0xdea   :  { %2795 = vmatpush1.bf16.msra.mxu0 %v4606_v34  ;;  %2836 = vmatpush1.bf16.msra.mxu1 %v4608_v0 }
 0xdeb   :  { %2796 = vmatprep.subr.bf16.mxu0 %v4612_v3  ;;  %2837 = vmatprep.subr.bf16.mxu1 %v4614_v20 }
 0xdee   :  { %2797 = vmatpush1.bf16.msra.mxu0 %v4620_v17  ;;  %2838 = vmatpush1.bf16.msra.mxu1 %v4622_v42 }
 0xdef   :  { %2798 = vmatprep.subr.bf16.mxu0 %v4626_v36  ;;  %2839 = vmatprep.subr.bf16.mxu1 %v4628_v58 }
 0xdf2   :  { %2799 = vmatpush1.bf16.msra.mxu0 %v4632_v59  ;;  %2840 = vmatpush1.bf16.msra.mxu1 %v4634_v51 }
 0xdf3   :  { %2800 = vmatprep.subr.bf16.mxu0 %v4638_v19  ;;  %2841 = vmatprep.subr.bf16.mxu1 %v4640_v41 }
 0xdf6   :  { %2801 = vmatpush1.bf16.msra.mxu0 %v4644_v52  ;;  %2842 = vmatpush1.bf16.msra.mxu1 %v4646_v43 }
 0xdf7   :  { %2802 = vmatprep.subr.bf16.mxu0 %v4650_v60  ;;  %2843 = vmatprep.subr.bf16.mxu1 %v4652_v53 }
 0xdfa   :  { %2803 = vmatpush1.bf16.msra.mxu0 %v4656_v39  ;;  %2844 = vmatpush1.bf16.msra.mxu1 %v4658_v46 }
 0xdfb   :  { %2804 = vmatprep.subr.bf16.mxu0 %v4662_v61  ;;  %2845 = vmatprep.subr.bf16.mxu1 %v4664_v9 }
 0xdfe   :  { %2805 = vmatpush1.bf16.msra.mxu0 %v4668_v18  ;;  %2846 = vmatpush1.bf16.msra.mxu1 %v4670_v44 }
 0xdff   :  { %2806 = vmatprep.subr.bf16.mxu0 %v4674_v22  ;;  %2847 = vmatprep.subr.bf16.mxu1 %v4676_v6 }
 0xe02   :  { %2807 = vmatpush1.bf16.msra.mxu0 %v4680_v38  ;;  %2848 = vmatpush1.bf16.msra.mxu1 %v4682_v37  ;;  %v2781_v38 = vrot.slane %v4943_v32, 6  ;;  %v3847_v32 = vld [vmem:[#allocation7 + $0x8c] ss:$16 sps:$4 sm:$0xff]  }
 0xe03   :  { %2921 = vmatprep.subr.bf16.mxu0 %v3830_v49  ;;  %2962 = vmatprep.subr.bf16.mxu1 %v3831_v50  ;;  %v3851_v49 = vld [vmem:[#allocation7 + $0xac] ss:$16 sps:$4 sm:$0xff]   ;;  %v3852_v50 = vld [vmem:[#allocation7 + $0xa0] ss:$16 sps:$4 sm:$0xff]  }
 0xeb8   :  { %v2697_v33 = vpop.f32.mrb[56].mxu0  ;;  %v2738_v63 = vpop.f32.mrb[64].mxu1 }
 0xeb9   :  { %v2749_v34 = vrot.slane %v2697_v33, 6  ;;  %v2699_v0 = vpop.f32.mrb[57].mxu0  ;;  %v2740_v3 = vpop.f32.mrb[65].mxu1  ;;  %v2751_v52 = vrot.slane %v2738_v63, 6  ;;  %v3853_v33 = vld [vmem:[#allocation7 + $0xa8] ss:$16 sps:$4 sm:$0xff]  }
 0xeba   :  { %v2750_v20 = vrot.slane %v2699_v0, 6  ;;  %v2701_v17 = vpop.f32.mrb[58].mxu0  ;;  %v2742_v42 = vpop.f32.mrb[66].mxu1  ;;  %v2752_v43 = vrot.slane %v2740_v3, 6  ;;  %v3854_v63 = vld [vmem:[#allocation7 + $0xc4] ss:$16 sps:$4 sm:$0xff]  }
 0xebb   :  { %v2757_v36 = vadd.f32 %v2749_v34, %v4737_v10  ;;  %v2702_v58 = vpop.f32.mrb[59].mxu0  ;;  %v2743_v59 = vpop.f32.mrb[67].mxu1  ;;  %v2759_v60 = vadd.f32 %v2751_v52, %v4739_v12  ;;  %v3855_v34 = vld [vmem:[#allocation7 + $0xcc] ss:$16 sps:$4 sm:$0xff]   ;;  %v3856_v0 = vld [vmem:[#allocation7 + $0xc0] ss:$16 sps:$4 sm:$0xff]  }
 0xebc   :  { %v2758_v51 = vadd.f32 %v2750_v20, %v4741_v62  ;;  %v2760_v53 = vadd.f32 %v2752_v43, %v4743_v55  ;;  %v3857_v3 = vld [vmem:[#allocation7 + $0xc8] ss:$16 sps:$4 sm:$0xff]   ;;  %v3858_v20 = vld [vmem:[#allocation7 + $0xe4] ss:$16 sps:$4 sm:$0xff]   ;;  %v3859_v17 = vld [vmem:[#allocation7 + $0xec] ss:$16 sps:$4 sm:$0xff]  }
 0xebd   :  { %v3322_v19 = vmul.f32 -1.442695, %v2757_v36  ;;  %v3324_v39 = vmul.f32 -1.442695, %v2759_v60  ;;  %v3860_v42 = vld [vmem:[#allocation7 + $0xe0] ss:$16 sps:$4 sm:$0xff]  }
 0xebe   :  { %v3323_v41 = vmul.f32 -1.442695, %v2758_v51  ;;  %v3861_v36 = vld [vmem:[#allocation7 + $0xe8] ss:$16 sps:$4 sm:$0xff]  }
 0xebf   :  { %3750 = vpow2.f32 %v3322_v19 }
 0xec0   :  { %3752 = vpow2.f32 %v3323_v41 }
 0xec1   :  { %3754 = vtanh.f32 %v2760_v53 }
 0xec2   :  { %3756 = vpow2.f32 %v3324_v39 }
 0xec9   :  { %v3751_v46 = vpop.eup %3750 }
 0xeca   :  { %v2770_v61 = vadd.f32 1.0, %v3751_v46  ;;  %v3753_v9 = vpop.eup %3752 }
 0xecb   :  { %v2771_v18 = vadd.f32 1.0, %v3753_v9  ;;  %v3755_v44 = vpop.eup %3754 }
 0xecc   :  { %3758 = vrcp.f32 %v2770_v61  ;;  %v3757_v22 = vpop.eup %3756 }
 0xecd   :  { %3760 = vrcp.f32 %v2771_v18  ;;  %v2772_v24 = vadd.f32 1.0, %v3757_v22 }
 0xecf   :  { %3762 = vrcp.f32 %v2772_v24 }
 0xed6   :  { %v3759_v6 = vpop.eup %3758 }
 0xed7   :  { %v2784_v37 = vmul.f32 %v3759_v6, %v3755_v44  ;;  %v3761_v48 = vpop.eup %3760 }
 0xed8   :  { %v2783_v57 = vmul.f32 %v3761_v48, %v2781_v38 }
 0xed9   :  { %v3763_v13 = vpop.eup %3762 }
 0xeda   :  { %v4987_v16 = vadd.f32 %v2784_v37, %v2783_v57 }
 0xedc   :  { %3764 = vtanh.f32 %v4987_v16 }
 0xee6   :  { %v3765_v40 = vpop.eup %3764 }
 0xee7   :  { %v4990_v47 = vmul.f32 %v3765_v40, %v3763_v13 }
 0xee9   :  { %v2788_v15 = vpack.c.bf16 %v4990_v47, %v4990_v47 }
 0xeeb   :  { %v2790_v2 = vrot.slane %v2788_v15, 1 }
 0xeed   :  { %2825 = vmatmul.mubr.bf16.vlgmr.msra.gmra.mrb[60].mxu0 %v2790_v2  ;;  %2866 = vmatmul.mubr.bf16.vlgmr.msra.gmra.mrb[68].mxu1 %v2790_v2 }
 0xeee   :  { %2922 = vmatpush1.bf16.msra.mxu0 %v3832_v7  ;;  %2963 = vmatpush1.bf16.msra.mxu1 %v3833_v26  ;;  %v2910_v7 = vrot.slane %v4987_v16, 6 }
 0xeef   :  { %2923 = vmatprep.subr.bf16.mxu0 %v3834_v1  ;;  %2964 = vmatprep.subr.bf16.mxu1 %v3835_v29 }
 0xef0   :  { %2953 = vmatprep.mubr.bf16.mxu0 %v3938_v4  ;;  %2994 = vmatprep.mubr.bf16.mxu1 %v3938_v4  ;;  %v3846_v4 = vld [vmem:[#allocation7 + $0x84] ss:$16 sps:$4 sm:$0xff]  }
 0xef2   :  { %2924 = vmatpush1.bf16.msra.mxu0 %v3836_v8  ;;  %2965 = vmatpush1.bf16.msra.mxu1 %v3837_v54 }
 0xef3   :  { %2925 = vmatprep.subr.bf16.mxu0 %v3838_v31  ;;  %2966 = vmatprep.subr.bf16.mxu1 %v3839_v11 }
 0xef6   :  { %2926 = vmatpush1.bf16.msra.mxu0 %v3840_v23  ;;  %2967 = vmatpush1.bf16.msra.mxu1 %v3841_v25  ;;  %v3049_v25 = vsel %vm1549_vm4, %v4946_v14, %v4990_v47  ;;  %v3536_v14 = vld [vmem:[%s5057_s9 + $0x10] sm:$0xff]   ;;  %v3537_v47 = vld [vmem:[%s5057_s9 + $0x18] sm:$0xff]  }
 0xef7   :  { %2927 = vmatprep.subr.bf16.mxu0 %v3842_v30  ;;  %2968 = vmatprep.subr.bf16.mxu1 %v3843_v21 }
 0xefa   :  { %2928 = vmatpush1.bf16.msra.mxu0 %v3844_v35  ;;  %2969 = vmatpush1.bf16.msra.mxu1 %v3845_v28  ;;  %v3534_v35 = vld [vmem:[%s5057_s9] sm:$0xff]   ;;  %v3939_v28 = vmov 0.0  }
 0xefb   :  { %2929 = vmatprep.subr.bf16.mxu0 %v3846_v4  ;;  %2970 = vmatprep.subr.bf16.mxu1 %v3847_v32  ;;  %v3535_v4 = vld [vmem:[%s5057_s9 + $0x8] sm:$0xff]   ;;  %v3538_v32 = vld [vmem:[%s5057_s9 + $0x20] sm:$0xff]  }
 0xefe   :  { %2930 = vmatpush1.bf16.msra.mxu0 %v3848_v5  ;;  %2971 = vmatpush1.bf16.msra.mxu1 %v3849_v27  ;;  %v3539_v5 = vld [vmem:[%s5057_s9 + $0x28] sm:$0xff]   ;;  %v3540_v27 = vld [vmem:[%s5057_s9 + $0x30] sm:$0xff]  }
 0xeff   :  { %2931 = vmatprep.subr.bf16.mxu0 %v3850_v56  ;;  %2972 = vmatprep.subr.bf16.mxu1 %v3851_v49  ;;  %v3541_v56 = vld [vmem:[%s5057_s9 + $0x38] sm:$0xff]  }
 0xf02   :  { %2932 = vmatpush1.bf16.msra.mxu0 %v3852_v50  ;;  %2973 = vmatpush1.bf16.msra.mxu1 %v3853_v33 }
 0xf03   :  { %2933 = vmatprep.subr.bf16.mxu0 %v3854_v63  ;;  %2974 = vmatprep.subr.bf16.mxu1 %v3855_v34 }
 0xf06   :  { %2934 = vmatpush1.bf16.msra.mxu0 %v3856_v0  ;;  %2975 = vmatpush1.bf16.msra.mxu1 %v3857_v3 }
 0xf07   :  { %2935 = vmatprep.subr.bf16.mxu0 %v3858_v20  ;;  %2976 = vmatprep.subr.bf16.mxu1 %v3859_v17 }
 0xf0a   :  { %2936 = vmatpush1.bf16.msra.mxu0 %v3860_v42  ;;  %2977 = vmatpush1.bf16.msra.mxu1 %v3861_v36 }
 0xf0b   :  { %3349 = vmatprep.subr.bf16.mxu0 %v3939_v28 }
 0xfc0   :  { %v2826_v58 = vpop.f32.mrb[60].mxu0  ;;  %v2867_v59 = vpop.f32.mrb[68].mxu1 }
 0xfc1   :  { %v2878_v51 = vrot.slane %v2826_v58, 4  ;;  %v2828_v19 = vpop.f32.mrb[61].mxu0  ;;  %v2869_v41 = vpop.f32.mrb[69].mxu1  ;;  %v2880_v44 = vrot.slane %v2867_v59, 4 }
 0xfc2   :  { %v2879_v52 = vrot.slane %v2828_v19, 4  ;;  %v2830_v43 = vpop.f32.mrb[62].mxu0  ;;  %v2871_v60 = vpop.f32.mrb[70].mxu1  ;;  %v2881_v22 = vrot.slane %v2869_v41, 4 }
 0xfc3   :  { %v2886_v53 = vadd.f32 %v2878_v51, %v4737_v10  ;;  %v2831_v39 = vpop.f32.mrb[63].mxu0  ;;  %v2872_v46 = vpop.f32.mrb[71].mxu1  ;;  %v2888_v6 = vadd.f32 %v2880_v44, %v4739_v12 }
 0xfc4   :  { %v2887_v61 = vadd.f32 %v2879_v52, %v4741_v62  ;;  %v2889_v38 = vadd.f32 %v2881_v22, %v4743_v55 }
 0xfc5   :  { %v3325_v9 = vmul.f32 -1.442695, %v2886_v53  ;;  %v3327_v37 = vmul.f32 -1.442695, %v2888_v6 }
 0xfc6   :  { %v3326_v18 = vmul.f32 -1.442695, %v2887_v61 }
 0xfc7   :  { %3766 = vpow2.f32 %v3325_v9 }
 0xfc8   :  { %3768 = vpow2.f32 %v3326_v18 }
 0xfc9   :  { %3770 = vtanh.f32 %v2889_v38 }
 0xfca   :  { %3772 = vpow2.f32 %v3327_v37 }
 0xfd1   :  { %v3767_v48 = vpop.eup %3766 }
 0xfd2   :  { %v2899_v24 = vadd.f32 1.0, %v3767_v48  ;;  %v3769_v57 = vpop.eup %3768 }
 0xfd3   :  { %v2900_v13 = vadd.f32 1.0, %v3769_v57  ;;  %v3771_v40 = vpop.eup %3770 }
 0xfd4   :  { %3774 = vrcp.f32 %v2899_v24  ;;  %v3773_v15 = vpop.eup %3772 }
 0xfd5   :  { %3776 = vrcp.f32 %v2900_v13  ;;  %v2901_v29 = vadd.f32 1.0, %v3773_v15  ;;  %v3331_v13 = vld [vmem:[#allocation2] ss:$0 sm:$0xff] }
 0xfd7   :  { %3778 = vrcp.f32 %v2901_v29 }
 0xfde   :  { %v3775_v2 = vpop.eup %3774 }
 0xfdf   :  { %v2913_v26 = vmul.f32 %v3775_v2, %v3771_v40  ;;  %v3777_v1 = vpop.eup %3776 }
 0xfe0   :  { %v2912_v8 = vmul.f32 %v3777_v1, %v2910_v7 }
 0xfe1   :  { %v3779_v31 = vpop.eup %3778 }
 0xfe2   :  { %v5001_v54 = vadd.f32 %v2913_v26, %v2912_v8 }
 0xfe4   :  { %3780 = vtanh.f32 %v5001_v54  ;;  %v3039_v18 = vrot.slane %v5001_v54, 6 }
 0xfee   :  { %v3781_v11 = vpop.eup %3780 }
 0xfef   :  { %v2916_v23 = vmul.f32 %v3781_v11, %v3779_v31 }
 0xff1   :  { %v2917_v30 = vpack.c.bf16 %v2916_v23, %v2916_v23  ;;  %v5008_v21 = vsel %vm1551_vm5, %v3049_v25, %v2916_v23 }
 0xff3   :  { %v2919_v16 = vrot.slane %v2917_v30, 2 }
 0xff5   :  { %2954 = vmatmul.mubr.bf16.vlgmr.msra.gmra.mrb[64].mxu0 %v2919_v16  ;;  %2995 = vmatmul.mubr.bf16.vlgmr.msra.gmra.mrb[72].mxu1 %v2919_v16 }
 0xff6   :  { %3350 = vmatpush3.bf16.msra.mxu0 %v3534_v35  ;;  %3365 = vmatprep.mubr.msk.bf16.mxu0 %vm3940_vm7, %v3939_v28 }
 0xff7   :  { %3351 = vmatprep.subr.bf16.mxu0 %v3939_v28 }
 0xffa   :  { %3352 = vmatpush3.bf16.msra.mxu0 %v3535_v4 }
 0xffb   :  { %3353 = vmatprep.subr.bf16.mxu0 %v3939_v28 }
 0xffe   :  { %3354 = vmatpush3.bf16.msra.mxu0 %v3536_v14 }
 0xfff   :  { %3355 = vmatprep.subr.bf16.mxu0 %v3939_v28 }
0x1002   :  { %3356 = vmatpush3.bf16.msra.mxu0 %v3537_v47 }
0x1003   :  { %3357 = vmatprep.subr.bf16.mxu0 %v3939_v28 }
0x1006   :  { %3358 = vmatpush3.bf16.msra.mxu0 %v3538_v32 }
0x1007   :  { %3359 = vmatprep.subr.bf16.mxu0 %v3939_v28 }
0x100a   :  { %3360 = vmatpush3.bf16.msra.mxu0 %v3539_v5 }
0x100b   :  { %3361 = vmatprep.subr.bf16.mxu0 %v3939_v28 }
0x100e   :  { %3362 = vmatpush3.bf16.msra.mxu0 %v3540_v27 }
0x100f   :  { %3363 = vmatprep.subr.bf16.mxu0 %v3939_v28 }
0x1012   :  { %3364 = vmatpush3.bf16.msra.mxu0 %v3541_v56 }
0x10c8   :  { %v2955_v49 = vpop.f32.mrb[64].mxu0  ;;  %v2996_v50 = vpop.f32.mrb[72].mxu1 }
0x10c9   :  { %v3007_v33 = vrot.slane %v2955_v49, 2  ;;  %v2957_v63 = vpop.f32.mrb[65].mxu0  ;;  %v2998_v34 = vpop.f32.mrb[73].mxu1  ;;  %v3009_v19 = vrot.slane %v2996_v50, 2 }
0x10ca   :  { %v3008_v0 = vrot.slane %v2957_v63, 2  ;;  %v2959_v3 = vpop.f32.mrb[66].mxu0  ;;  %v3000_v20 = vpop.f32.mrb[74].mxu1  ;;  %v3010_v41 = vrot.slane %v2998_v34, 2 }
0x10cb   :  { %v3015_v17 = vadd.f32 %v3007_v33, %v4737_v10  ;;  %v2960_v42 = vpop.f32.mrb[67].mxu0  ;;  %v3001_v36 = vpop.f32.mrb[75].mxu1  ;;  %v3017_v52 = vadd.f32 %v3009_v19, %v4739_v12 }
0x10cc   :  { %v3016_v58 = vadd.f32 %v3008_v0, %v4741_v62  ;;  %v3018_v43 = vadd.f32 %v3010_v41, %v4743_v55 }
0x10cd   :  { %v3328_v59 = vmul.f32 -1.442695, %v3015_v17  ;;  %v3330_v60 = vmul.f32 -1.442695, %v3017_v52 }
0x10ce   :  { %v3329_v51 = vmul.f32 -1.442695, %v3016_v58 }
0x10cf   :  { %3782 = vpow2.f32 %v3328_v59 }
0x10d0   :  { %3784 = vpow2.f32 %v3329_v51 }
0x10d1   :  { %3786 = vtanh.f32 %v3018_v43 }
0x10d2   :  { %3788 = vpow2.f32 %v3330_v60 }
0x10d9   :  { %v3783_v53 = vpop.eup %3782 }
0x10da   :  { %v3028_v39 = vadd.f32 1.0, %v3783_v53  ;;  %v3785_v46 = vpop.eup %3784 }
0x10db   :  { %v3029_v10 = vadd.f32 1.0, %v3785_v46  ;;  %v3787_v62 = vpop.eup %3786 }
0x10dc   :  { %3790 = vrcp.f32 %v3028_v39  ;;  %v3789_v61 = vpop.eup %3788 }
0x10dd   :  { %3792 = vrcp.f32 %v3029_v10  ;;  %v3030_v6 = vadd.f32 1.0, %v3789_v61 }
0x10df   :  { %3794 = vrcp.f32 %v3030_v6 }
0x10e6   :  { %v3791_v9 = vpop.eup %3790 }
0x10e7   :  { %v3042_v44 = vmul.f32 %v3791_v9, %v3787_v62  ;;  %v3793_v22 = vpop.eup %3792 }
0x10e8   :  { %v3041_v12 = vmul.f32 %v3793_v22, %v3039_v18 }
0x10e9   :  { %v3795_v55 = vpop.eup %3794 }
0x10ea   :  { %v3043_v38 = vadd.f32 %v3042_v44, %v3041_v12 }
0x10ec   :  { %3796 = vtanh.f32 %v3043_v38 }
0x10f6   :  { %v3797_v37 = vpop.eup %3796 }
0x10f7   :  { %v3045_v48 = vmul.f32 %v3797_v37, %v3795_v55 }
0x10f9   :  { %v3051_v24 = vsel %vm1553_vm6, %v5008_v21, %v3045_v48 }
0x10fa   :  { %v3052_v57 = vpack.c.bf16 %v3051_v24, %v4902_v45 }
0x10fc   :  { %3366 = vmatmul.mubr.bf16.vlgmr.msra.gmra.mrb[68].mxu0 %v3052_v57 }
0x11cf   :  { %v3158_v40 = vpop.f32.mrb[68].mxu0 }
0x11d0   :  { %v3159_v15 = vadd.f32 %v3331_v13, %v3158_v40  ;;  %v3367_v2 = vpop.f32.mrb[69].mxu0 }
0x11d1   :  { %v3161_v7 = vpop.f32.mrb[70].mxu0 }
0x11d2   :  { %3166 = vst.msk [vmem:[%s5059_s11] sm:$0xff] %vm3165_vm8, %v3159_v15  ;;  %v3162_v26 = vadd.f32 %v3331_v13, %v3161_v7  ;;  %v3368_v1 = vpop.f32.mrb[71].mxu0 }
0x11d4   :  { %3167 = vst.msk [vmem:[%s5059_s11 + $0x8] sm:$0xff] %vm3165_vm8, %v3162_v26 }
0x11d5   :  { %3172 = vsyncpa [#allocation4], 1 }
0x11d6   :  { %3173 = vsyncpa [#allocation6], 1 }

</bundles_post_ra>
